<compile_context>
chip_gen: v6e
topology: v6e:2x2x1
jax: 0.10.0
libtpu: 0.0.40
codegen_flags: <defaults>
</compile_context>

<pallas_src>
import functools
import math

import numpy as np
import jax
import jax.numpy as jnp
from jax.experimental import pallas as pl
from jax.experimental.pallas import tpu as pltpu


# ----------------------------------------------------------------------------
# helpers
# ----------------------------------------------------------------------------
def _shift_lanes(x, off, length):
    """sh[:, q] = x[:, q + off] for 0 <= q+off < length else 0 (static `off`)."""
    if off == 0:
        return x
    c = x.shape[0]
    pad = jnp.zeros((c, abs(off)), x.dtype)
    if off > 0:
        return jnp.concatenate([x[:, off:], pad], axis=1)
    return jnp.concatenate([pad, x[:, :length + off]], axis=1)


# ----------------------------------------------------------------------------
# Fused kernel: all levels, both towers, heads, sigmoid, box decode + clip
# ----------------------------------------------------------------------------
def _retina_head_kernel(x_ref, *refs, num_layers, pad_widths, seg_lens, clip_val):
    # ---- unpack refs: cls layers, bbox layers, constants, outputs -----------
    params = []
    idx = 0
    for _ in range(2 * num_layers):
        params.append((refs[idx], refs[idx + 1]))
        idx += 2
    cls_params = params[:num_layers]
    bbox_params = params[num_layers:]
    anc_ref = refs[idx]          # (A*4, L)   anchors on the padded grids
    mask_ref = refs[idx + 1]     # (1, L)     1.0 on interior pixels, else 0.0
    dm_ref = refs[idx + 2]       # (4, A*4, A*4) decode selection matrices
    dv_ref = refs[idx + 3]       # (2, A*4, 1)   decode sign / clip bounds
    scores_ref = refs[idx + 4]   # out: (1, A*C, L)
    boxes_ref = refs[idx + 5]    # out: (1, A*4, L)

    mask = mask_ref[...]                              # (1, L) f32
    x0 = x_ref[0]                                     # (Cin, L) f32

    # ---- build the 9-tap stack (K = 9*Cin) with per-level lane shifts --------
    def build_taps(cur_f32):
        cur = cur_f32.astype(jnp.bfloat16)            # one cast per layer
        segs = []
        off0 = 0
        for wp, seg_len in zip(pad_widths, seg_lens):
            seg = cur[:, off0:off0 + seg_len]         # 128-aligned static slice
            taps = []
            for dy in (-1, 0, 1):
                for dx in (-1, 0, 1):
                    taps.append(_shift_lanes(seg, dy * wp + dx, seg_len))
            segs.append(jnp.concatenate(taps, axis=0))   # (9*Cin, seg_len)
            off0 += seg_len
        return jnp.concatenate(segs, axis=1)          # (9*Cin, L)

    # ---- 3x3 conv (stride 1, pad 1) as a single bf16 MXU matmul -------------
    def conv(taps, w_ref, b_ref, relu):
        # taps: (9*Cin, L) bf16;  w_ref: (Cout, 9*Cin) bf16;  b_ref: (Cout, 1) f32
        acc = jnp.dot(w_ref[...], taps, preferred_element_type=jnp.float32)
        acc = acc + b_ref[...]
        if relu:
            acc = jnp.maximum(acc, 0.0)
        # re-zero pad ring (and lane padding) so it keeps acting as conv zero-pad
        return acc * mask

    taps0 = build_taps(x0)                            # shared by both towers

    def tower(tower_params):
        cur = conv(taps0, tower_params[0][0], tower_params[0][1],
                   relu=(num_layers > 1))
        for i in range(1, num_layers):
            cur = conv(build_taps(cur), tower_params[i][0], tower_params[i][1],
                       relu=(i < num_layers - 1))
        return cur

    cls_out = tower(cls_params)                       # (A*C, L) logits
    bbox_out = tower(bbox_params)                     # (A*4, L) deltas

    # ---- fused epilogue: sigmoid + AnchorBoxesCoder.decode + clip (lane-dense)
    scores_ref[0] = jax.nn.sigmoid(cls_out).astype(scores_ref.dtype)

    anc = anc_ref[...]                                # (A*4, L)
    m_ctr, m_size = dm_ref[0], dm_ref[1]
    m_dctr, m_dsize = dm_ref[2], dm_ref[3]
    sign = dv_ref[0]                                  # (A*4, 1): -0.5 / +0.5
    bound = dv_ref[1]                                 # (A*4, 1): img_w / img_h

    ctr = jnp.dot(m_ctr, anc, preferred_element_type=jnp.float32)
    size = jnp.dot(m_size, anc, preferred_element_type=jnp.float32)
    dctr = jnp.dot(m_dctr, bbox_out, preferred_element_type=jnp.float32)
    dsize = jnp.dot(m_dsize, bbox_out, preferred_element_type=jnp.float32)

    pred_ctr = dctr * size + ctr
    pred_size = jnp.exp(jnp.minimum(dsize, clip_val)) * size   # box_code_clip
    boxes = jnp.clip(pred_ctr + sign * pred_size, 0.0, bound)  # clip-to-image
    boxes_ref[0] = boxes.astype(boxes_ref.dtype)


def retina_head_fused(x_all, params_flat, anchors_all, mask_all, dec_mats, dec_vecs,
                      *, num_layers, pad_widths, seg_lens, clip_val,
                      num_anchors, num_classes,
                      vmem_limit_bytes=48 * 1024 * 1024):
    """x_all: (N, Cin, L) — per-image, all levels' padded grids flattened and
    concatenated on the lane axis (each level's segment is a multiple of 128)."""
    n, cin, lc = x_all.shape
    a4 = 4 * num_anchors
    ac = num_anchors * num_classes

    in_specs = [pl.BlockSpec((1, cin, lc), lambda i: (i, 0, 0))]
    for arr in params_flat:      # weights (Cout, 9*Cin) bf16, biases (Cout, 1) f32
        in_specs.append(pl.BlockSpec(arr.shape, lambda i: (0, 0)))
    in_specs.append(pl.BlockSpec((a4, lc), lambda i: (0, 0)))          # anchors
    in_specs.append(pl.BlockSpec((1, lc), lambda i: (0, 0)))           # mask
    in_specs.append(pl.BlockSpec(dec_mats.shape, lambda i: (0, 0, 0)))
    in_specs.append(pl.BlockSpec(dec_vecs.shape, lambda i: (0, 0, 0)))

    out_shape = (jax.ShapeDtypeStruct((n, ac, lc), jnp.float32),
                 jax.ShapeDtypeStruct((n, a4, lc), jnp.float32))
    out_specs = (pl.BlockSpec((1, ac, lc), lambda i: (i, 0, 0)),
                 pl.BlockSpec((1, a4, lc), lambda i: (i, 0, 0)))

    kernel = functools.partial(
        _retina_head_kernel, num_layers=num_layers,
        pad_widths=tuple(pad_widths), seg_lens=tuple(seg_lens),
        clip_val=float(clip_val))

    return pl.pallas_call(
        kernel,
        out_shape=out_shape,
        grid_spec=pltpu.PrefetchScalarGridSpec(
            num_scalar_prefetch=0,
            grid=(n,),                            # parallel over batch images
            in_specs=in_specs,
            out_specs=out_specs,
        ),
        compiler_params=pltpu.CompilerParams(
            dimension_semantics=("parallel",),
            vmem_limit_bytes=vmem_limit_bytes,
        ),
    )(x_all, *params_flat, anchors_all, mask_all, dec_mats, dec_vecs)


# ----------------------------------------------------------------------------
# RetinaNetHead (inference path) wrapper
# ----------------------------------------------------------------------------
class RetinaNetHeadPallas:
    def __init__(self, in_channels=32, feat_channels=32, num_classes=4,
                 num_anchors=3, num_tower_convs=4,
                 nms_thresh=0.5, score_thresh=0.05, seed=0):
        self.num_classes = num_classes
        self.num_anchors = num_anchors
        self.nms_thresh = nms_thresh
        self.score_thresh = score_thresh
        self.box_code_clip = math.log(1000.0 / 16)
        self.aspect_ratios = (0.5, 1.0, 2.0)          # A = 3 anchors / location
        self.num_layers = num_tower_convs + 1

        key = jax.random.PRNGKey(seed)

        def conv_param(k, cin, cout, bias_fill=0.0):
            # conceptual conv weight w[ky, kx, cin, cout]; stored MXU-ready as
            # (cout, tap*cin + cin) bf16 to match the 9-tap stacked activation,
            # bias stored as (cout, 1) f32 (lane-broadcastable).
            w = 0.05 * jax.random.normal(k, (3, 3, cin, cout), dtype=jnp.float32)
            w2 = jnp.transpose(w, (3, 0, 1, 2)).reshape(cout, 9 * cin)
            b = jnp.full((cout, 1), bias_fill, dtype=jnp.float32)
            return w2.astype(jnp.bfloat16), b

        keys = jax.random.split(key, 2 * num_tower_convs + 2)
        cls_params, bbox_params = [], []
        for i in range(num_tower_convs):
            cin_i = in_channels if i == 0 else feat_channels
            cls_params.append(conv_param(keys[i], cin_i, feat_channels))
            bbox_params.append(conv_param(keys[num_tower_convs + i], cin_i, feat_channels))
        prior_bias = -math.log((1.0 - 0.01) / 0.01)   # RetinaNet focal-loss prior
        cls_params.append(conv_param(keys[-2], feat_channels,
                                     num_anchors * num_classes, prior_bias))
        bbox_params.append(conv_param(keys[-1], feat_channels, num_anchors * 4))

        self.params_flat = []
        for w, b in cls_params + bbox_params:         # cls layers first, then bbox
            self.params_flat += [w, b]

    # -------- anchor table on the 1-pixel-padded grid, (A*4, P) layout -------
    def _anchors_padded_t(self, h, w, image_size):
        img_h, img_w = image_size
        sy, sx = img_h / h, img_w / w
        base = 4.0 * sx
        ws = np.asarray([base * math.sqrt(1.0 / ar) for ar in self.aspect_ratios],
                        np.float32)
        hs = np.asarray([base * math.sqrt(ar) for ar in self.aspect_ratios], np.float32)
        cy = (np.arange(h + 2, dtype=np.float32) - 0.5) * sy   # = (y + 0.5)*sy interior
        cx = (np.arange(w + 2, dtype=np.float32) - 0.5) * sx
        cyg, cxg = np.meshgrid(cy, cx, indexing="ij")          # (H+2, W+2)
        x1 = cxg[None] - 0.5 * ws[:, None, None]
        y1 = cyg[None] - 0.5 * hs[:, None, None]
        x2 = cxg[None] + 0.5 * ws[:, None, None]
        y2 = cyg[None] + 0.5 * hs[:, None, None]
        anc = np.stack([x1, y1, x2, y2], axis=1)               # (A, 4, H+2, W+2)
        return jnp.asarray(anc.reshape(4 * self.num_anchors, (h + 2) * (w + 2)))

    @staticmethod
    def _interior_mask(h, w):
        m = np.zeros((h + 2, w + 2), np.float32)
        m[1:h + 1, 1:w + 1] = 1.0
        return jnp.asarray(m.reshape(1, (h + 2) * (w + 2)))

    # -------- constant selection matrices for the row-parallel box decode ----
    def _decode_consts(self, image_size):
        img_h, img_w = image_size
        a, n4 = self.num_anchors, 4 * self.num_anchors
        m_ctr = np.zeros((n4, n4), np.float32)
        m_size = np.zeros((n4, n4), np.float32)
        m_dctr = np.zeros((n4, n4), np.float32)
        m_dsize = np.zeros((n4, n4), np.float32)
        sign = np.zeros((n4, 1), np.float32)
        bound = np.zeros((n4, 1), np.float32)
        for ai in range(a):
            for c in range(4):
                r, o = ai * 4 + c, ai * 4
                if c % 2 == 0:                                 # x coordinates
                    m_ctr[r, o + 0] = m_ctr[r, o + 2] = 0.5
                    m_size[r, o + 0], m_size[r, o + 2] = -1.0, 1.0
                    m_dctr[r, o + 0] = 1.0
                    m_dsize[r, o + 2] = 1.0
                    bound[r, 0] = img_w
                else:                                          # y coordinates
                    m_ctr[r, o + 1] = m_ctr[r, o + 3] = 0.5
                    m_size[r, o + 1], m_size[r, o + 3] = -1.0, 1.0
                    m_dctr[r, o + 1] = 1.0
                    m_dsize[r, o + 3] = 1.0
                    bound[r, 0] = img_h
                sign[r, 0] = -0.5 if c < 2 else 0.5
        dec_mats = jnp.asarray(np.stack([m_ctr, m_size, m_dctr, m_dsize], axis=0))
        dec_vecs = jnp.asarray(np.stack([sign, bound], axis=0))
        return dec_mats, dec_vecs

    # -------- forward (eval / inference branch of the reference forward) -----
    def forward(self, features_nchw, image_size):
        """features_nchw: list of (N, C, H, W) arrays. Returns per-level sigmoid
        scores and decoded, clipped boxes in permute_and_flatten (N, H*W*A, C) order."""
        a, c = self.num_anchors, self.num_classes
        dec_mats, dec_vecs = self._decode_consts(image_size)

        n = features_nchw[0].shape[0]
        x_parts, anc_parts, mask_parts = [], [], []
        pad_widths, seg_lens, level_dims = [], [], []
        for feat in features_nchw:
            _, cin, h, w = feat.shape
            p = (h + 2) * (w + 2)
            p_pad = ((p + 127) // 128) * 128           # lane-dense segment length
            xp = jnp.pad(feat, ((0, 0), (0, 0), (1, 1), (1, 1))).reshape(n, cin, p)
            x_parts.append(jnp.pad(xp, ((0, 0), (0, 0), (0, p_pad - p))))
            anc = self._anchors_padded_t(h, w, image_size)
            anc_parts.append(jnp.pad(anc, ((0, 0), (0, p_pad - p))))
            m = self._interior_mask(h, w)
            mask_parts.append(jnp.pad(m, ((0, 0), (0, p_pad - p))))
            pad_widths.append(w + 2)
            seg_lens.append(p_pad)
            level_dims.append((h, w, p, p_pad))

        x_all = jnp.concatenate(x_parts, axis=2)       # (N, Cin, L)
        anchors_all = jnp.concatenate(anc_parts, axis=1)
        mask_all = jnp.concatenate(mask_parts, axis=1)

        scores_t, boxes_t = retina_head_fused(
            x_all, self.params_flat, anchors_all, mask_all, dec_mats, dec_vecs,
            num_layers=self.num_layers, pad_widths=pad_widths, seg_lens=seg_lens,
            clip_val=self.box_code_clip, num_anchors=a, num_classes=c)

        scores_levels, boxes_levels = [], []
        off = 0
        for (h, w, p, p_pad) in level_dims:
            def unpad(t, cdim, off=off, h=h, w=w, p=p):
                # (N, A*cdim, L) -> level slice -> drop pad ring -> permute_and_flatten
                t = t[:, :, off:off + p]
                t = t.reshape(n, a, cdim, h + 2, w + 2)[:, :, :, 1:h + 1, 1:w + 1]
                t = jnp.transpose(t, (0, 3, 4, 1, 2))  # (N, H, W, A, cdim)
                return t.reshape(n, h * w * a, cdim)
            scores_levels.append(unpad(scores_t, c))
            boxes_levels.append(unpad(boxes_t, 4))
            off += p_pad

        # TODO(synk): score-thresholding, per-level top-k sort and batched_nms of
        # post_detection_single_image are data-dependent-shape host ops with no
        # clean Pallas equivalent; returning per-level scores/boxes (pre-NMS).
        return {"scores": scores_levels, "boxes": boxes_levels}


# ----------------------------------------------------------------------------
if __name__ == "__main__":
    key = jax.random.PRNGKey(0)
    n, cin = 2, 32
    image_size = (64, 64)
    k0, k1 = jax.random.split(key)
    # two FPN levels at strides 8 and 16 (NCHW, like the PyTorch module expects)
    features = [
        jax.random.normal(k0, (n, cin, 8, 8), dtype=jnp.float32),
        jax.random.normal(k1, (n, cin, 4, 4), dtype=jnp.float32),
    ]

    head = RetinaNetHeadPallas(in_channels=cin, feat_channels=32,
                               num_classes=4, num_anchors=3,
                               num_tower_convs=4,
                               nms_thresh=0.5, score_thresh=0.05, seed=0)

    out = head.forward(features, image_size)
    out = jax.block_until_ready(out)

    # shape / sanity checks
    assert out["scores"][0].shape == (n, 8 * 8 * 3, 4)
    assert out["boxes"][0].shape == (n, 8 * 8 * 3, 4)
    assert out["scores"][1].shape == (n, 4 * 4 * 3, 4)
    assert out["boxes"][1].shape == (n, 4 * 4 * 3, 4)
    for s, b in zip(out["scores"], out["boxes"]):
        assert bool(jnp.all((s >= 0.0) & (s <= 1.0)))
        assert bool(jnp.all(jnp.isfinite(b)))
        assert bool(jnp.all((b >= 0.0) & (b <= 64.0)))
    print("KERNEL_OK")
</pallas_src>

<mosaic_0001>
module attributes {stable_mosaic.version = 11 : i64} {
  func.func @_retina_head_kernel(%arg0: i32, %arg1: memref<1x32x256xf32, #tpu.memory_space<vmem>>, %arg2: memref<32x288xbf16, #tpu.memory_space<vmem>>, %arg3: memref<32x1xf32, #tpu.memory_space<vmem>>, %arg4: memref<32x288xbf16, #tpu.memory_space<vmem>>, %arg5: memref<32x1xf32, #tpu.memory_space<vmem>>, %arg6: memref<32x288xbf16, #tpu.memory_space<vmem>>, %arg7: memref<32x1xf32, #tpu.memory_space<vmem>>, %arg8: memref<32x288xbf16, #tpu.memory_space<vmem>>, %arg9: memref<32x1xf32, #tpu.memory_space<vmem>>, %arg10: memref<12x288xbf16, #tpu.memory_space<vmem>>, %arg11: memref<12x1xf32, #tpu.memory_space<vmem>>, %arg12: memref<32x288xbf16, #tpu.memory_space<vmem>>, %arg13: memref<32x1xf32, #tpu.memory_space<vmem>>, %arg14: memref<32x288xbf16, #tpu.memory_space<vmem>>, %arg15: memref<32x1xf32, #tpu.memory_space<vmem>>, %arg16: memref<32x288xbf16, #tpu.memory_space<vmem>>, %arg17: memref<32x1xf32, #tpu.memory_space<vmem>>, %arg18: memref<32x288xbf16, #tpu.memory_space<vmem>>, %arg19: memref<32x1xf32, #tpu.memory_space<vmem>>, %arg20: memref<12x288xbf16, #tpu.memory_space<vmem>>, %arg21: memref<12x1xf32, #tpu.memory_space<vmem>>, %arg22: memref<12x256xf32, #tpu.memory_space<vmem>>, %arg23: memref<1x256xf32, #tpu.memory_space<vmem>>, %arg24: memref<4x12x12xf32, #tpu.memory_space<vmem>>, %arg25: memref<2x12x1xf32, #tpu.memory_space<vmem>>, %arg26: memref<1x12x256xf32, #tpu.memory_space<vmem>>, %arg27: memref<1x12x256xf32, #tpu.memory_space<vmem>>) attributes {dimension_semantics = [#tpu.dimension_semantics<parallel>], iteration_bounds = array<i64: 2>, scalar_prefetch = 0 : i64, scratch_operands = 0 : i64, tpu.core_type = #tpu.core_type<tc>, window_params = [{transform_indices = @transform_0, window_bounds = array<i64: 1, 32, 256>}, {pipeline_mode = #tpu.pipeline_mode<synchronous>, transform_indices = @transform_1, window_bounds = array<i64: 32, 288>}, {pipeline_mode = #tpu.pipeline_mode<synchronous>, transform_indices = @transform_2, window_bounds = array<i64: 32, 1>}, {pipeline_mode = #tpu.pipeline_mode<synchronous>, transform_indices = @transform_3, window_bounds = array<i64: 32, 288>}, {pipeline_mode = #tpu.pipeline_mode<synchronous>, transform_indices = @transform_4, window_bounds = array<i64: 32, 1>}, {pipeline_mode = #tpu.pipeline_mode<synchronous>, transform_indices = @transform_5, window_bounds = array<i64: 32, 288>}, {pipeline_mode = #tpu.pipeline_mode<synchronous>, transform_indices = @transform_6, window_bounds = array<i64: 32, 1>}, {pipeline_mode = #tpu.pipeline_mode<synchronous>, transform_indices = @transform_7, window_bounds = array<i64: 32, 288>}, {pipeline_mode = #tpu.pipeline_mode<synchronous>, transform_indices = @transform_8, window_bounds = array<i64: 32, 1>}, {pipeline_mode = #tpu.pipeline_mode<synchronous>, transform_indices = @transform_9, window_bounds = array<i64: 12, 288>}, {pipeline_mode = #tpu.pipeline_mode<synchronous>, transform_indices = @transform_10, window_bounds = array<i64: 12, 1>}, {pipeline_mode = #tpu.pipeline_mode<synchronous>, transform_indices = @transform_11, window_bounds = array<i64: 32, 288>}, {pipeline_mode = #tpu.pipeline_mode<synchronous>, transform_indices = @transform_12, window_bounds = array<i64: 32, 1>}, {pipeline_mode = #tpu.pipeline_mode<synchronous>, transform_indices = @transform_13, window_bounds = array<i64: 32, 288>}, {pipeline_mode = #tpu.pipeline_mode<synchronous>, transform_indices = @transform_14, window_bounds = array<i64: 32, 1>}, {pipeline_mode = #tpu.pipeline_mode<synchronous>, transform_indices = @transform_15, window_bounds = array<i64: 32, 288>}, {pipeline_mode = #tpu.pipeline_mode<synchronous>, transform_indices = @transform_16, window_bounds = array<i64: 32, 1>}, {pipeline_mode = #tpu.pipeline_mode<synchronous>, transform_indices = @transform_17, window_bounds = array<i64: 32, 288>}, {pipeline_mode = #tpu.pipeline_mode<synchronous>, transform_indices = @transform_18, window_bounds = array<i64: 32, 1>}, {pipeline_mode = #tpu.pipeline_mode<synchronous>, transform_indices = @transform_19, window_bounds = array<i64: 12, 288>}, {pipeline_mode = #tpu.pipeline_mode<synchronous>, transform_indices = @transform_20, window_bounds = array<i64: 12, 1>}, {pipeline_mode = #tpu.pipeline_mode<synchronous>, transform_indices = @transform_21, window_bounds = array<i64: 12, 256>}, {pipeline_mode = #tpu.pipeline_mode<synchronous>, transform_indices = @transform_22, window_bounds = array<i64: 1, 256>}, {pipeline_mode = #tpu.pipeline_mode<synchronous>, transform_indices = @transform_23, window_bounds = array<i64: 4, 12, 12>}, {pipeline_mode = #tpu.pipeline_mode<synchronous>, transform_indices = @transform_24, window_bounds = array<i64: 2, 12, 1>}, {transform_indices = @transform_25, window_bounds = array<i64: 1, 12, 256>}, {transform_indices = @transform_26, window_bounds = array<i64: 1, 12, 256>}]} {
    %c0 = arith.constant 0 : index
    %c0_0 = arith.constant 0 : index
    %0 = vector.load %arg23[%c0, %c0_0] : memref<1x256xf32, #tpu.memory_space<vmem>>, vector<1x256xf32>
    %c0_1 = arith.constant 0 : index
    %c0_2 = arith.constant 0 : index
    %c0_3 = arith.constant 0 : index
    %1 = vector.load %arg1[%c0_1, %c0_2, %c0_3] : memref<1x32x256xf32, #tpu.memory_space<vmem>>, vector<1x32x256xf32>
    %2 = vector.shape_cast %1 : vector<1x32x256xf32> to vector<32x256xf32>
    %3 = arith.truncf %2 : vector<32x256xf32> to vector<32x256xbf16>
    %4 = vector.extract_strided_slice %3 {offsets = [0, 0], sizes = [32, 128], strides = [1, 1]} : vector<32x256xbf16> to vector<32x128xbf16>
    %cst = arith.constant 0.000000e+00 : bf16
    %5 = vector.broadcast %cst : bf16 to vector<32x11xbf16>
    %6 = vector.extract_strided_slice %4 {offsets = [0, 0], sizes = [32, 117], strides = [1, 1]} : vector<32x128xbf16> to vector<32x117xbf16>
    %7 = tpu.concatenate %5, %6 in 1 : vector<32x11xbf16>, vector<32x117xbf16> -> vector<32x128xbf16>
    %cst_4 = arith.constant 0.000000e+00 : bf16
    %8 = vector.broadcast %cst_4 : bf16 to vector<32x10xbf16>
    %9 = vector.extract_strided_slice %4 {offsets = [0, 0], sizes = [32, 118], strides = [1, 1]} : vector<32x128xbf16> to vector<32x118xbf16>
    %10 = tpu.concatenate %8, %9 in 1 : vector<32x10xbf16>, vector<32x118xbf16> -> vector<32x128xbf16>
    %cst_5 = arith.constant 0.000000e+00 : bf16
    %11 = vector.broadcast %cst_5 : bf16 to vector<32x9xbf16>
    %12 = vector.extract_strided_slice %4 {offsets = [0, 0], sizes = [32, 119], strides = [1, 1]} : vector<32x128xbf16> to vector<32x119xbf16>
    %13 = tpu.concatenate %11, %12 in 1 : vector<32x9xbf16>, vector<32x119xbf16> -> vector<32x128xbf16>
    %cst_6 = arith.constant 0.000000e+00 : bf16
    %14 = vector.broadcast %cst_6 : bf16 to vector<32x1xbf16>
    %15 = vector.extract_strided_slice %4 {offsets = [0, 0], sizes = [32, 127], strides = [1, 1]} : vector<32x128xbf16> to vector<32x127xbf16>
    %16 = tpu.concatenate %14, %15 in 1 : vector<32x1xbf16>, vector<32x127xbf16> -> vector<32x128xbf16>
    %cst_7 = arith.constant 0.000000e+00 : bf16
    %17 = vector.broadcast %cst_7 : bf16 to vector<32x1xbf16>
    %18 = vector.extract_strided_slice %4 {offsets = [0, 1], sizes = [32, 127], strides = [1, 1]} : vector<32x128xbf16> to vector<32x127xbf16>
    %19 = tpu.concatenate %18, %17 in 1 : vector<32x127xbf16>, vector<32x1xbf16> -> vector<32x128xbf16>
    %cst_8 = arith.constant 0.000000e+00 : bf16
    %20 = vector.broadcast %cst_8 : bf16 to vector<32x9xbf16>
    %21 = vector.extract_strided_slice %4 {offsets = [0, 9], sizes = [32, 119], strides = [1, 1]} : vector<32x128xbf16> to vector<32x119xbf16>
    %22 = tpu.concatenate %21, %20 in 1 : vector<32x119xbf16>, vector<32x9xbf16> -> vector<32x128xbf16>
    %cst_9 = arith.constant 0.000000e+00 : bf16
    %23 = vector.broadcast %cst_9 : bf16 to vector<32x10xbf16>
    %24 = vector.extract_strided_slice %4 {offsets = [0, 10], sizes = [32, 118], strides = [1, 1]} : vector<32x128xbf16> to vector<32x118xbf16>
    %25 = tpu.concatenate %24, %23 in 1 : vector<32x118xbf16>, vector<32x10xbf16> -> vector<32x128xbf16>
    %cst_10 = arith.constant 0.000000e+00 : bf16
    %26 = vector.broadcast %cst_10 : bf16 to vector<32x11xbf16>
    %27 = vector.extract_strided_slice %4 {offsets = [0, 11], sizes = [32, 117], strides = [1, 1]} : vector<32x128xbf16> to vector<32x117xbf16>
    %28 = tpu.concatenate %27, %26 in 1 : vector<32x117xbf16>, vector<32x11xbf16> -> vector<32x128xbf16>
    %29 = tpu.concatenate %7, %10, %13, %16, %4, %19, %22, %25, %28 in 0 : vector<32x128xbf16>, vector<32x128xbf16>, vector<32x128xbf16>, vector<32x128xbf16>, vector<32x128xbf16>, vector<32x128xbf16>, vector<32x128xbf16>, vector<32x128xbf16>, vector<32x128xbf16> -> vector<288x128xbf16>
    %30 = vector.extract_strided_slice %3 {offsets = [0, 128], sizes = [32, 128], strides = [1, 1]} : vector<32x256xbf16> to vector<32x128xbf16>
    %cst_11 = arith.constant 0.000000e+00 : bf16
    %31 = vector.broadcast %cst_11 : bf16 to vector<32x7xbf16>
    %32 = vector.extract_strided_slice %30 {offsets = [0, 0], sizes = [32, 121], strides = [1, 1]} : vector<32x128xbf16> to vector<32x121xbf16>
    %33 = tpu.concatenate %31, %32 in 1 : vector<32x7xbf16>, vector<32x121xbf16> -> vector<32x128xbf16>
    %cst_12 = arith.constant 0.000000e+00 : bf16
    %34 = vector.broadcast %cst_12 : bf16 to vector<32x6xbf16>
    %35 = vector.extract_strided_slice %30 {offsets = [0, 0], sizes = [32, 122], strides = [1, 1]} : vector<32x128xbf16> to vector<32x122xbf16>
    %36 = tpu.concatenate %34, %35 in 1 : vector<32x6xbf16>, vector<32x122xbf16> -> vector<32x128xbf16>
    %cst_13 = arith.constant 0.000000e+00 : bf16
    %37 = vector.broadcast %cst_13 : bf16 to vector<32x5xbf16>
    %38 = vector.extract_strided_slice %30 {offsets = [0, 0], sizes = [32, 123], strides = [1, 1]} : vector<32x128xbf16> to vector<32x123xbf16>
    %39 = tpu.concatenate %37, %38 in 1 : vector<32x5xbf16>, vector<32x123xbf16> -> vector<32x128xbf16>
    %cst_14 = arith.constant 0.000000e+00 : bf16
    %40 = vector.broadcast %cst_14 : bf16 to vector<32x1xbf16>
    %41 = vector.extract_strided_slice %30 {offsets = [0, 0], sizes = [32, 127], strides = [1, 1]} : vector<32x128xbf16> to vector<32x127xbf16>
    %42 = tpu.concatenate %40, %41 in 1 : vector<32x1xbf16>, vector<32x127xbf16> -> vector<32x128xbf16>
    %cst_15 = arith.constant 0.000000e+00 : bf16
    %43 = vector.broadcast %cst_15 : bf16 to vector<32x1xbf16>
    %44 = vector.extract_strided_slice %30 {offsets = [0, 1], sizes = [32, 127], strides = [1, 1]} : vector<32x128xbf16> to vector<32x127xbf16>
    %45 = tpu.concatenate %44, %43 in 1 : vector<32x127xbf16>, vector<32x1xbf16> -> vector<32x128xbf16>
    %cst_16 = arith.constant 0.000000e+00 : bf16
    %46 = vector.broadcast %cst_16 : bf16 to vector<32x5xbf16>
    %47 = vector.extract_strided_slice %30 {offsets = [0, 5], sizes = [32, 123], strides = [1, 1]} : vector<32x128xbf16> to vector<32x123xbf16>
    %48 = tpu.concatenate %47, %46 in 1 : vector<32x123xbf16>, vector<32x5xbf16> -> vector<32x128xbf16>
    %cst_17 = arith.constant 0.000000e+00 : bf16
    %49 = vector.broadcast %cst_17 : bf16 to vector<32x6xbf16>
    %50 = vector.extract_strided_slice %30 {offsets = [0, 6], sizes = [32, 122], strides = [1, 1]} : vector<32x128xbf16> to vector<32x122xbf16>
    %51 = tpu.concatenate %50, %49 in 1 : vector<32x122xbf16>, vector<32x6xbf16> -> vector<32x128xbf16>
    %cst_18 = arith.constant 0.000000e+00 : bf16
    %52 = vector.broadcast %cst_18 : bf16 to vector<32x7xbf16>
    %53 = vector.extract_strided_slice %30 {offsets = [0, 7], sizes = [32, 121], strides = [1, 1]} : vector<32x128xbf16> to vector<32x121xbf16>
    %54 = tpu.concatenate %53, %52 in 1 : vector<32x121xbf16>, vector<32x7xbf16> -> vector<32x128xbf16>
    %55 = tpu.concatenate %33, %36, %39, %42, %30, %45, %48, %51, %54 in 0 : vector<32x128xbf16>, vector<32x128xbf16>, vector<32x128xbf16>, vector<32x128xbf16>, vector<32x128xbf16>, vector<32x128xbf16>, vector<32x128xbf16>, vector<32x128xbf16>, vector<32x128xbf16> -> vector<288x128xbf16>
    %56 = tpu.concatenate %29, %55 in 1 : vector<288x128xbf16>, vector<288x128xbf16> -> vector<288x256xbf16>
    %c0_19 = arith.constant 0 : index
    %c0_20 = arith.constant 0 : index
    %57 = vector.load %arg2[%c0_19, %c0_20] : memref<32x288xbf16, #tpu.memory_space<vmem>>, vector<32x288xbf16>
    %cst_21 = arith.constant dense<0.000000e+00> : vector<32x256xf32>
    %58 = tpu.matmul %57, %56, %cst_21 {dimension_numbers = #tpu.dot_dimension_numbers<[1], [0], [0], [1], [0, 0, 1, 1], [], []>} : vector<32x288xbf16>, vector<288x256xbf16>, vector<32x256xf32> -> vector<32x256xf32>
    %c0_22 = arith.constant 0 : index
    %c0_23 = arith.constant 0 : index
    %59 = vector.load %arg3[%c0_22, %c0_23] : memref<32x1xf32, #tpu.memory_space<vmem>>, vector<32x1xf32>
    %60 = vector.broadcast %59 : vector<32x1xf32> to vector<32x256xf32>
    %61 = arith.addf %58, %60 : vector<32x256xf32>
    %cst_24 = arith.constant 0.000000e+00 : f32
    %62 = vector.broadcast %cst_24 : f32 to vector<32x256xf32>
    %63 = arith.maximumf %61, %62 : vector<32x256xf32>
    %64 = vector.broadcast %0 : vector<1x256xf32> to vector<32x256xf32>
    %65 = arith.mulf %63, %64 : vector<32x256xf32>
    %66 = arith.truncf %65 : vector<32x256xf32> to vector<32x256xbf16>
    %67 = vector.extract_strided_slice %66 {offsets = [0, 0], sizes = [32, 128], strides = [1, 1]} : vector<32x256xbf16> to vector<32x128xbf16>
    %cst_25 = arith.constant 0.000000e+00 : bf16
    %68 = vector.broadcast %cst_25 : bf16 to vector<32x11xbf16>
    %69 = vector.extract_strided_slice %67 {offsets = [0, 0], sizes = [32, 117], strides = [1, 1]} : vector<32x128xbf16> to vector<32x117xbf16>
    %70 = tpu.concatenate %68, %69 in 1 : vector<32x11xbf16>, vector<32x117xbf16> -> vector<32x128xbf16>
    %cst_26 = arith.constant 0.000000e+00 : bf16
    %71 = vector.broadcast %cst_26 : bf16 to vector<32x10xbf16>
    %72 = vector.extract_strided_slice %67 {offsets = [0, 0], sizes = [32, 118], strides = [1, 1]} : vector<32x128xbf16> to vector<32x118xbf16>
    %73 = tpu.concatenate %71, %72 in 1 : vector<32x10xbf16>, vector<32x118xbf16> -> vector<32x128xbf16>
    %cst_27 = arith.constant 0.000000e+00 : bf16
    %74 = vector.broadcast %cst_27 : bf16 to vector<32x9xbf16>
    %75 = vector.extract_strided_slice %67 {offsets = [0, 0], sizes = [32, 119], strides = [1, 1]} : vector<32x128xbf16> to vector<32x119xbf16>
    %76 = tpu.concatenate %74, %75 in 1 : vector<32x9xbf16>, vector<32x119xbf16> -> vector<32x128xbf16>
    %cst_28 = arith.constant 0.000000e+00 : bf16
    %77 = vector.broadcast %cst_28 : bf16 to vector<32x1xbf16>
    %78 = vector.extract_strided_slice %67 {offsets = [0, 0], sizes = [32, 127], strides = [1, 1]} : vector<32x128xbf16> to vector<32x127xbf16>
    %79 = tpu.concatenate %77, %78 in 1 : vector<32x1xbf16>, vector<32x127xbf16> -> vector<32x128xbf16>
    %cst_29 = arith.constant 0.000000e+00 : bf16
    %80 = vector.broadcast %cst_29 : bf16 to vector<32x1xbf16>
    %81 = vector.extract_strided_slice %67 {offsets = [0, 1], sizes = [32, 127], strides = [1, 1]} : vector<32x128xbf16> to vector<32x127xbf16>
    %82 = tpu.concatenate %81, %80 in 1 : vector<32x127xbf16>, vector<32x1xbf16> -> vector<32x128xbf16>
    %cst_30 = arith.constant 0.000000e+00 : bf16
    %83 = vector.broadcast %cst_30 : bf16 to vector<32x9xbf16>
    %84 = vector.extract_strided_slice %67 {offsets = [0, 9], sizes = [32, 119], strides = [1, 1]} : vector<32x128xbf16> to vector<32x119xbf16>
    %85 = tpu.concatenate %84, %83 in 1 : vector<32x119xbf16>, vector<32x9xbf16> -> vector<32x128xbf16>
    %cst_31 = arith.constant 0.000000e+00 : bf16
    %86 = vector.broadcast %cst_31 : bf16 to vector<32x10xbf16>
    %87 = vector.extract_strided_slice %67 {offsets = [0, 10], sizes = [32, 118], strides = [1, 1]} : vector<32x128xbf16> to vector<32x118xbf16>
    %88 = tpu.concatenate %87, %86 in 1 : vector<32x118xbf16>, vector<32x10xbf16> -> vector<32x128xbf16>
    %cst_32 = arith.constant 0.000000e+00 : bf16
    %89 = vector.broadcast %cst_32 : bf16 to vector<32x11xbf16>
    %90 = vector.extract_strided_slice %67 {offsets = [0, 11], sizes = [32, 117], strides = [1, 1]} : vector<32x128xbf16> to vector<32x117xbf16>
    %91 = tpu.concatenate %90, %89 in 1 : vector<32x117xbf16>, vector<32x11xbf16> -> vector<32x128xbf16>
    %92 = tpu.concatenate %70, %73, %76, %79, %67, %82, %85, %88, %91 in 0 : vector<32x128xbf16>, vector<32x128xbf16>, vector<32x128xbf16>, vector<32x128xbf16>, vector<32x128xbf16>, vector<32x128xbf16>, vector<32x128xbf16>, vector<32x128xbf16>, vector<32x128xbf16> -> vector<288x128xbf16>
    %93 = vector.extract_strided_slice %66 {offsets = [0, 128], sizes = [32, 128], strides = [1, 1]} : vector<32x256xbf16> to vector<32x128xbf16>
    %cst_33 = arith.constant 0.000000e+00 : bf16
    %94 = vector.broadcast %cst_33 : bf16 to vector<32x7xbf16>
    %95 = vector.extract_strided_slice %93 {offsets = [0, 0], sizes = [32, 121], strides = [1, 1]} : vector<32x128xbf16> to vector<32x121xbf16>
    %96 = tpu.concatenate %94, %95 in 1 : vector<32x7xbf16>, vector<32x121xbf16> -> vector<32x128xbf16>
    %cst_34 = arith.constant 0.000000e+00 : bf16
    %97 = vector.broadcast %cst_34 : bf16 to vector<32x6xbf16>
    %98 = vector.extract_strided_slice %93 {offsets = [0, 0], sizes = [32, 122], strides = [1, 1]} : vector<32x128xbf16> to vector<32x122xbf16>
    %99 = tpu.concatenate %97, %98 in 1 : vector<32x6xbf16>, vector<32x122xbf16> -> vector<32x128xbf16>
    %cst_35 = arith.constant 0.000000e+00 : bf16
    %100 = vector.broadcast %cst_35 : bf16 to vector<32x5xbf16>
    %101 = vector.extract_strided_slice %93 {offsets = [0, 0], sizes = [32, 123], strides = [1, 1]} : vector<32x128xbf16> to vector<32x123xbf16>
    %102 = tpu.concatenate %100, %101 in 1 : vector<32x5xbf16>, vector<32x123xbf16> -> vector<32x128xbf16>
    %cst_36 = arith.constant 0.000000e+00 : bf16
    %103 = vector.broadcast %cst_36 : bf16 to vector<32x1xbf16>
    %104 = vector.extract_strided_slice %93 {offsets = [0, 0], sizes = [32, 127], strides = [1, 1]} : vector<32x128xbf16> to vector<32x127xbf16>
    %105 = tpu.concatenate %103, %104 in 1 : vector<32x1xbf16>, vector<32x127xbf16> -> vector<32x128xbf16>
    %cst_37 = arith.constant 0.000000e+00 : bf16
    %106 = vector.broadcast %cst_37 : bf16 to vector<32x1xbf16>
    %107 = vector.extract_strided_slice %93 {offsets = [0, 1], sizes = [32, 127], strides = [1, 1]} : vector<32x128xbf16> to vector<32x127xbf16>
    %108 = tpu.concatenate %107, %106 in 1 : vector<32x127xbf16>, vector<32x1xbf16> -> vector<32x128xbf16>
    %cst_38 = arith.constant 0.000000e+00 : bf16
    %109 = vector.broadcast %cst_38 : bf16 to vector<32x5xbf16>
    %110 = vector.extract_strided_slice %93 {offsets = [0, 5], sizes = [32, 123], strides = [1, 1]} : vector<32x128xbf16> to vector<32x123xbf16>
    %111 = tpu.concatenate %110, %109 in 1 : vector<32x123xbf16>, vector<32x5xbf16> -> vector<32x128xbf16>
    %cst_39 = arith.constant 0.000000e+00 : bf16
    %112 = vector.broadcast %cst_39 : bf16 to vector<32x6xbf16>
    %113 = vector.extract_strided_slice %93 {offsets = [0, 6], sizes = [32, 122], strides = [1, 1]} : vector<32x128xbf16> to vector<32x122xbf16>
    %114 = tpu.concatenate %113, %112 in 1 : vector<32x122xbf16>, vector<32x6xbf16> -> vector<32x128xbf16>
    %cst_40 = arith.constant 0.000000e+00 : bf16
    %115 = vector.broadcast %cst_40 : bf16 to vector<32x7xbf16>
    %116 = vector.extract_strided_slice %93 {offsets = [0, 7], sizes = [32, 121], strides = [1, 1]} : vector<32x128xbf16> to vector<32x121xbf16>
    %117 = tpu.concatenate %116, %115 in 1 : vector<32x121xbf16>, vector<32x7xbf16> -> vector<32x128xbf16>
    %118 = tpu.concatenate %96, %99, %102, %105, %93, %108, %111, %114, %117 in 0 : vector<32x128xbf16>, vector<32x128xbf16>, vector<32x128xbf16>, vector<32x128xbf16>, vector<32x128xbf16>, vector<32x128xbf16>, vector<32x128xbf16>, vector<32x128xbf16>, vector<32x128xbf16> -> vector<288x128xbf16>
    %119 = tpu.concatenate %92, %118 in 1 : vector<288x128xbf16>, vector<288x128xbf16> -> vector<288x256xbf16>
    %c0_41 = arith.constant 0 : index
    %c0_42 = arith.constant 0 : index
    %120 = vector.load %arg4[%c0_41, %c0_42] : memref<32x288xbf16, #tpu.memory_space<vmem>>, vector<32x288xbf16>
    %cst_43 = arith.constant dense<0.000000e+00> : vector<32x256xf32>
    %121 = tpu.matmul %120, %119, %cst_43 {dimension_numbers = #tpu.dot_dimension_numbers<[1], [0], [0], [1], [0, 0, 1, 1], [], []>} : vector<32x288xbf16>, vector<288x256xbf16>, vector<32x256xf32> -> vector<32x256xf32>
    %c0_44 = arith.constant 0 : index
    %c0_45 = arith.constant 0 : index
    %122 = vector.load %arg5[%c0_44, %c0_45] : memref<32x1xf32, #tpu.memory_space<vmem>>, vector<32x1xf32>
    %123 = vector.broadcast %122 : vector<32x1xf32> to vector<32x256xf32>
    %124 = arith.addf %121, %123 : vector<32x256xf32>
    %cst_46 = arith.constant 0.000000e+00 : f32
    %125 = vector.broadcast %cst_46 : f32 to vector<32x256xf32>
    %126 = arith.maximumf %124, %125 : vector<32x256xf32>
    %127 = vector.broadcast %0 : vector<1x256xf32> to vector<32x256xf32>
    %128 = arith.mulf %126, %127 : vector<32x256xf32>
    %129 = arith.truncf %128 : vector<32x256xf32> to vector<32x256xbf16>
    %130 = vector.extract_strided_slice %129 {offsets = [0, 0], sizes = [32, 128], strides = [1, 1]} : vector<32x256xbf16> to vector<32x128xbf16>
    %cst_47 = arith.constant 0.000000e+00 : bf16
    %131 = vector.broadcast %cst_47 : bf16 to vector<32x11xbf16>
    %132 = vector.extract_strided_slice %130 {offsets = [0, 0], sizes = [32, 117], strides = [1, 1]} : vector<32x128xbf16> to vector<32x117xbf16>
    %133 = tpu.concatenate %131, %132 in 1 : vector<32x11xbf16>, vector<32x117xbf16> -> vector<32x128xbf16>
    %cst_48 = arith.constant 0.000000e+00 : bf16
    %134 = vector.broadcast %cst_48 : bf16 to vector<32x10xbf16>
    %135 = vector.extract_strided_slice %130 {offsets = [0, 0], sizes = [32, 118], strides = [1, 1]} : vector<32x128xbf16> to vector<32x118xbf16>
    %136 = tpu.concatenate %134, %135 in 1 : vector<32x10xbf16>, vector<32x118xbf16> -> vector<32x128xbf16>
    %cst_49 = arith.constant 0.000000e+00 : bf16
    %137 = vector.broadcast %cst_49 : bf16 to vector<32x9xbf16>
    %138 = vector.extract_strided_slice %130 {offsets = [0, 0], sizes = [32, 119], strides = [1, 1]} : vector<32x128xbf16> to vector<32x119xbf16>
    %139 = tpu.concatenate %137, %138 in 1 : vector<32x9xbf16>, vector<32x119xbf16> -> vector<32x128xbf16>
    %cst_50 = arith.constant 0.000000e+00 : bf16
    %140 = vector.broadcast %cst_50 : bf16 to vector<32x1xbf16>
    %141 = vector.extract_strided_slice %130 {offsets = [0, 0], sizes = [32, 127], strides = [1, 1]} : vector<32x128xbf16> to vector<32x127xbf16>
    %142 = tpu.concatenate %140, %141 in 1 : vector<32x1xbf16>, vector<32x127xbf16> -> vector<32x128xbf16>
    %cst_51 = arith.constant 0.000000e+00 : bf16
    %143 = vector.broadcast %cst_51 : bf16 to vector<32x1xbf16>
    %144 = vector.extract_strided_slice %130 {offsets = [0, 1], sizes = [32, 127], strides = [1, 1]} : vector<32x128xbf16> to vector<32x127xbf16>
    %145 = tpu.concatenate %144, %143 in 1 : vector<32x127xbf16>, vector<32x1xbf16> -> vector<32x128xbf16>
    %cst_52 = arith.constant 0.000000e+00 : bf16
    %146 = vector.broadcast %cst_52 : bf16 to vector<32x9xbf16>
    %147 = vector.extract_strided_slice %130 {offsets = [0, 9], sizes = [32, 119], strides = [1, 1]} : vector<32x128xbf16> to vector<32x119xbf16>
    %148 = tpu.concatenate %147, %146 in 1 : vector<32x119xbf16>, vector<32x9xbf16> -> vector<32x128xbf16>
    %cst_53 = arith.constant 0.000000e+00 : bf16
    %149 = vector.broadcast %cst_53 : bf16 to vector<32x10xbf16>
    %150 = vector.extract_strided_slice %130 {offsets = [0, 10], sizes = [32, 118], strides = [1, 1]} : vector<32x128xbf16> to vector<32x118xbf16>
    %151 = tpu.concatenate %150, %149 in 1 : vector<32x118xbf16>, vector<32x10xbf16> -> vector<32x128xbf16>
    %cst_54 = arith.constant 0.000000e+00 : bf16
    %152 = vector.broadcast %cst_54 : bf16 to vector<32x11xbf16>
    %153 = vector.extract_strided_slice %130 {offsets = [0, 11], sizes = [32, 117], strides = [1, 1]} : vector<32x128xbf16> to vector<32x117xbf16>
    %154 = tpu.concatenate %153, %152 in 1 : vector<32x117xbf16>, vector<32x11xbf16> -> vector<32x128xbf16>
    %155 = tpu.concatenate %133, %136, %139, %142, %130, %145, %148, %151, %154 in 0 : vector<32x128xbf16>, vector<32x128xbf16>, vector<32x128xbf16>, vector<32x128xbf16>, vector<32x128xbf16>, vector<32x128xbf16>, vector<32x128xbf16>, vector<32x128xbf16>, vector<32x128xbf16> -> vector<288x128xbf16>
    %156 = vector.extract_strided_slice %129 {offsets = [0, 128], sizes = [32, 128], strides = [1, 1]} : vector<32x256xbf16> to vector<32x128xbf16>
    %cst_55 = arith.constant 0.000000e+00 : bf16
    %157 = vector.broadcast %cst_55 : bf16 to vector<32x7xbf16>
    %158 = vector.extract_strided_slice %156 {offsets = [0, 0], sizes = [32, 121], strides = [1, 1]} : vector<32x128xbf16> to vector<32x121xbf16>
    %159 = tpu.concatenate %157, %158 in 1 : vector<32x7xbf16>, vector<32x121xbf16> -> vector<32x128xbf16>
    %cst_56 = arith.constant 0.000000e+00 : bf16
    %160 = vector.broadcast %cst_56 : bf16 to vector<32x6xbf16>
    %161 = vector.extract_strided_slice %156 {offsets = [0, 0], sizes = [32, 122], strides = [1, 1]} : vector<32x128xbf16> to vector<32x122xbf16>
    %162 = tpu.concatenate %160, %161 in 1 : vector<32x6xbf16>, vector<32x122xbf16> -> vector<32x128xbf16>
    %cst_57 = arith.constant 0.000000e+00 : bf16
    %163 = vector.broadcast %cst_57 : bf16 to vector<32x5xbf16>
    %164 = vector.extract_strided_slice %156 {offsets = [0, 0], sizes = [32, 123], strides = [1, 1]} : vector<32x128xbf16> to vector<32x123xbf16>
    %165 = tpu.concatenate %163, %164 in 1 : vector<32x5xbf16>, vector<32x123xbf16> -> vector<32x128xbf16>
    %cst_58 = arith.constant 0.000000e+00 : bf16
    %166 = vector.broadcast %cst_58 : bf16 to vector<32x1xbf16>
    %167 = vector.extract_strided_slice %156 {offsets = [0, 0], sizes = [32, 127], strides = [1, 1]} : vector<32x128xbf16> to vector<32x127xbf16>
    %168 = tpu.concatenate %166, %167 in 1 : vector<32x1xbf16>, vector<32x127xbf16> -> vector<32x128xbf16>
    %cst_59 = arith.constant 0.000000e+00 : bf16
    %169 = vector.broadcast %cst_59 : bf16 to vector<32x1xbf16>
    %170 = vector.extract_strided_slice %156 {offsets = [0, 1], sizes = [32, 127], strides = [1, 1]} : vector<32x128xbf16> to vector<32x127xbf16>
    %171 = tpu.concatenate %170, %169 in 1 : vector<32x127xbf16>, vector<32x1xbf16> -> vector<32x128xbf16>
    %cst_60 = arith.constant 0.000000e+00 : bf16
    %172 = vector.broadcast %cst_60 : bf16 to vector<32x5xbf16>
    %173 = vector.extract_strided_slice %156 {offsets = [0, 5], sizes = [32, 123], strides = [1, 1]} : vector<32x128xbf16> to vector<32x123xbf16>
    %174 = tpu.concatenate %173, %172 in 1 : vector<32x123xbf16>, vector<32x5xbf16> -> vector<32x128xbf16>
    %cst_61 = arith.constant 0.000000e+00 : bf16
    %175 = vector.broadcast %cst_61 : bf16 to vector<32x6xbf16>
    %176 = vector.extract_strided_slice %156 {offsets = [0, 6], sizes = [32, 122], strides = [1, 1]} : vector<32x128xbf16> to vector<32x122xbf16>
    %177 = tpu.concatenate %176, %175 in 1 : vector<32x122xbf16>, vector<32x6xbf16> -> vector<32x128xbf16>
    %cst_62 = arith.constant 0.000000e+00 : bf16
    %178 = vector.broadcast %cst_62 : bf16 to vector<32x7xbf16>
    %179 = vector.extract_strided_slice %156 {offsets = [0, 7], sizes = [32, 121], strides = [1, 1]} : vector<32x128xbf16> to vector<32x121xbf16>
    %180 = tpu.concatenate %179, %178 in 1 : vector<32x121xbf16>, vector<32x7xbf16> -> vector<32x128xbf16>
    %181 = tpu.concatenate %159, %162, %165, %168, %156, %171, %174, %177, %180 in 0 : vector<32x128xbf16>, vector<32x128xbf16>, vector<32x128xbf16>, vector<32x128xbf16>, vector<32x128xbf16>, vector<32x128xbf16>, vector<32x128xbf16>, vector<32x128xbf16>, vector<32x128xbf16> -> vector<288x128xbf16>
    %182 = tpu.concatenate %155, %181 in 1 : vector<288x128xbf16>, vector<288x128xbf16> -> vector<288x256xbf16>
    %c0_63 = arith.constant 0 : index
    %c0_64 = arith.constant 0 : index
    %183 = vector.load %arg6[%c0_63, %c0_64] : memref<32x288xbf16, #tpu.memory_space<vmem>>, vector<32x288xbf16>
    %cst_65 = arith.constant dense<0.000000e+00> : vector<32x256xf32>
    %184 = tpu.matmul %183, %182, %cst_65 {dimension_numbers = #tpu.dot_dimension_numbers<[1], [0], [0], [1], [0, 0, 1, 1], [], []>} : vector<32x288xbf16>, vector<288x256xbf16>, vector<32x256xf32> -> vector<32x256xf32>
    %c0_66 = arith.constant 0 : index
    %c0_67 = arith.constant 0 : index
    %185 = vector.load %arg7[%c0_66, %c0_67] : memref<32x1xf32, #tpu.memory_space<vmem>>, vector<32x1xf32>
    %186 = vector.broadcast %185 : vector<32x1xf32> to vector<32x256xf32>
    %187 = arith.addf %184, %186 : vector<32x256xf32>
    %cst_68 = arith.constant 0.000000e+00 : f32
    %188 = vector.broadcast %cst_68 : f32 to vector<32x256xf32>
    %189 = arith.maximumf %187, %188 : vector<32x256xf32>
    %190 = vector.broadcast %0 : vector<1x256xf32> to vector<32x256xf32>
    %191 = arith.mulf %189, %190 : vector<32x256xf32>
    %192 = arith.truncf %191 : vector<32x256xf32> to vector<32x256xbf16>
    %193 = vector.extract_strided_slice %192 {offsets = [0, 0], sizes = [32, 128], strides = [1, 1]} : vector<32x256xbf16> to vector<32x128xbf16>
    %cst_69 = arith.constant 0.000000e+00 : bf16
    %194 = vector.broadcast %cst_69 : bf16 to vector<32x11xbf16>
    %195 = vector.extract_strided_slice %193 {offsets = [0, 0], sizes = [32, 117], strides = [1, 1]} : vector<32x128xbf16> to vector<32x117xbf16>
    %196 = tpu.concatenate %194, %195 in 1 : vector<32x11xbf16>, vector<32x117xbf16> -> vector<32x128xbf16>
    %cst_70 = arith.constant 0.000000e+00 : bf16
    %197 = vector.broadcast %cst_70 : bf16 to vector<32x10xbf16>
    %198 = vector.extract_strided_slice %193 {offsets = [0, 0], sizes = [32, 118], strides = [1, 1]} : vector<32x128xbf16> to vector<32x118xbf16>
    %199 = tpu.concatenate %197, %198 in 1 : vector<32x10xbf16>, vector<32x118xbf16> -> vector<32x128xbf16>
    %cst_71 = arith.constant 0.000000e+00 : bf16
    %200 = vector.broadcast %cst_71 : bf16 to vector<32x9xbf16>
    %201 = vector.extract_strided_slice %193 {offsets = [0, 0], sizes = [32, 119], strides = [1, 1]} : vector<32x128xbf16> to vector<32x119xbf16>
    %202 = tpu.concatenate %200, %201 in 1 : vector<32x9xbf16>, vector<32x119xbf16> -> vector<32x128xbf16>
    %cst_72 = arith.constant 0.000000e+00 : bf16
    %203 = vector.broadcast %cst_72 : bf16 to vector<32x1xbf16>
    %204 = vector.extract_strided_slice %193 {offsets = [0, 0], sizes = [32, 127], strides = [1, 1]} : vector<32x128xbf16> to vector<32x127xbf16>
    %205 = tpu.concatenate %203, %204 in 1 : vector<32x1xbf16>, vector<32x127xbf16> -> vector<32x128xbf16>
    %cst_73 = arith.constant 0.000000e+00 : bf16
    %206 = vector.broadcast %cst_73 : bf16 to vector<32x1xbf16>
    %207 = vector.extract_strided_slice %193 {offsets = [0, 1], sizes = [32, 127], strides = [1, 1]} : vector<32x128xbf16> to vector<32x127xbf16>
    %208 = tpu.concatenate %207, %206 in 1 : vector<32x127xbf16>, vector<32x1xbf16> -> vector<32x128xbf16>
    %cst_74 = arith.constant 0.000000e+00 : bf16
    %209 = vector.broadcast %cst_74 : bf16 to vector<32x9xbf16>
    %210 = vector.extract_strided_slice %193 {offsets = [0, 9], sizes = [32, 119], strides = [1, 1]} : vector<32x128xbf16> to vector<32x119xbf16>
    %211 = tpu.concatenate %210, %209 in 1 : vector<32x119xbf16>, vector<32x9xbf16> -> vector<32x128xbf16>
    %cst_75 = arith.constant 0.000000e+00 : bf16
    %212 = vector.broadcast %cst_75 : bf16 to vector<32x10xbf16>
    %213 = vector.extract_strided_slice %193 {offsets = [0, 10], sizes = [32, 118], strides = [1, 1]} : vector<32x128xbf16> to vector<32x118xbf16>
    %214 = tpu.concatenate %213, %212 in 1 : vector<32x118xbf16>, vector<32x10xbf16> -> vector<32x128xbf16>
    %cst_76 = arith.constant 0.000000e+00 : bf16
    %215 = vector.broadcast %cst_76 : bf16 to vector<32x11xbf16>
    %216 = vector.extract_strided_slice %193 {offsets = [0, 11], sizes = [32, 117], strides = [1, 1]} : vector<32x128xbf16> to vector<32x117xbf16>
    %217 = tpu.concatenate %216, %215 in 1 : vector<32x117xbf16>, vector<32x11xbf16> -> vector<32x128xbf16>
    %218 = tpu.concatenate %196, %199, %202, %205, %193, %208, %211, %214, %217 in 0 : vector<32x128xbf16>, vector<32x128xbf16>, vector<32x128xbf16>, vector<32x128xbf16>, vector<32x128xbf16>, vector<32x128xbf16>, vector<32x128xbf16>, vector<32x128xbf16>, vector<32x128xbf16> -> vector<288x128xbf16>
    %219 = vector.extract_strided_slice %192 {offsets = [0, 128], sizes = [32, 128], strides = [1, 1]} : vector<32x256xbf16> to vector<32x128xbf16>
    %cst_77 = arith.constant 0.000000e+00 : bf16
    %220 = vector.broadcast %cst_77 : bf16 to vector<32x7xbf16>
    %221 = vector.extract_strided_slice %219 {offsets = [0, 0], sizes = [32, 121], strides = [1, 1]} : vector<32x128xbf16> to vector<32x121xbf16>
    %222 = tpu.concatenate %220, %221 in 1 : vector<32x7xbf16>, vector<32x121xbf16> -> vector<32x128xbf16>
    %cst_78 = arith.constant 0.000000e+00 : bf16
    %223 = vector.broadcast %cst_78 : bf16 to vector<32x6xbf16>
    %224 = vector.extract_strided_slice %219 {offsets = [0, 0], sizes = [32, 122], strides = [1, 1]} : vector<32x128xbf16> to vector<32x122xbf16>
    %225 = tpu.concatenate %223, %224 in 1 : vector<32x6xbf16>, vector<32x122xbf16> -> vector<32x128xbf16>
    %cst_79 = arith.constant 0.000000e+00 : bf16
    %226 = vector.broadcast %cst_79 : bf16 to vector<32x5xbf16>
    %227 = vector.extract_strided_slice %219 {offsets = [0, 0], sizes = [32, 123], strides = [1, 1]} : vector<32x128xbf16> to vector<32x123xbf16>
    %228 = tpu.concatenate %226, %227 in 1 : vector<32x5xbf16>, vector<32x123xbf16> -> vector<32x128xbf16>
    %cst_80 = arith.constant 0.000000e+00 : bf16
    %229 = vector.broadcast %cst_80 : bf16 to vector<32x1xbf16>
    %230 = vector.extract_strided_slice %219 {offsets = [0, 0], sizes = [32, 127], strides = [1, 1]} : vector<32x128xbf16> to vector<32x127xbf16>
    %231 = tpu.concatenate %229, %230 in 1 : vector<32x1xbf16>, vector<32x127xbf16> -> vector<32x128xbf16>
    %cst_81 = arith.constant 0.000000e+00 : bf16
    %232 = vector.broadcast %cst_81 : bf16 to vector<32x1xbf16>
    %233 = vector.extract_strided_slice %219 {offsets = [0, 1], sizes = [32, 127], strides = [1, 1]} : vector<32x128xbf16> to vector<32x127xbf16>
    %234 = tpu.concatenate %233, %232 in 1 : vector<32x127xbf16>, vector<32x1xbf16> -> vector<32x128xbf16>
    %cst_82 = arith.constant 0.000000e+00 : bf16
    %235 = vector.broadcast %cst_82 : bf16 to vector<32x5xbf16>
    %236 = vector.extract_strided_slice %219 {offsets = [0, 5], sizes = [32, 123], strides = [1, 1]} : vector<32x128xbf16> to vector<32x123xbf16>
    %237 = tpu.concatenate %236, %235 in 1 : vector<32x123xbf16>, vector<32x5xbf16> -> vector<32x128xbf16>
    %cst_83 = arith.constant 0.000000e+00 : bf16
    %238 = vector.broadcast %cst_83 : bf16 to vector<32x6xbf16>
    %239 = vector.extract_strided_slice %219 {offsets = [0, 6], sizes = [32, 122], strides = [1, 1]} : vector<32x128xbf16> to vector<32x122xbf16>
    %240 = tpu.concatenate %239, %238 in 1 : vector<32x122xbf16>, vector<32x6xbf16> -> vector<32x128xbf16>
    %cst_84 = arith.constant 0.000000e+00 : bf16
    %241 = vector.broadcast %cst_84 : bf16 to vector<32x7xbf16>
    %242 = vector.extract_strided_slice %219 {offsets = [0, 7], sizes = [32, 121], strides = [1, 1]} : vector<32x128xbf16> to vector<32x121xbf16>
    %243 = tpu.concatenate %242, %241 in 1 : vector<32x121xbf16>, vector<32x7xbf16> -> vector<32x128xbf16>
    %244 = tpu.concatenate %222, %225, %228, %231, %219, %234, %237, %240, %243 in 0 : vector<32x128xbf16>, vector<32x128xbf16>, vector<32x128xbf16>, vector<32x128xbf16>, vector<32x128xbf16>, vector<32x128xbf16>, vector<32x128xbf16>, vector<32x128xbf16>, vector<32x128xbf16> -> vector<288x128xbf16>
    %245 = tpu.concatenate %218, %244 in 1 : vector<288x128xbf16>, vector<288x128xbf16> -> vector<288x256xbf16>
    %c0_85 = arith.constant 0 : index
    %c0_86 = arith.constant 0 : index
    %246 = vector.load %arg8[%c0_85, %c0_86] : memref<32x288xbf16, #tpu.memory_space<vmem>>, vector<32x288xbf16>
    %cst_87 = arith.constant dense<0.000000e+00> : vector<32x256xf32>
    %247 = tpu.matmul %246, %245, %cst_87 {dimension_numbers = #tpu.dot_dimension_numbers<[1], [0], [0], [1], [0, 0, 1, 1], [], []>} : vector<32x288xbf16>, vector<288x256xbf16>, vector<32x256xf32> -> vector<32x256xf32>
    %c0_88 = arith.constant 0 : index
    %c0_89 = arith.constant 0 : index
    %248 = vector.load %arg9[%c0_88, %c0_89] : memref<32x1xf32, #tpu.memory_space<vmem>>, vector<32x1xf32>
    %249 = vector.broadcast %248 : vector<32x1xf32> to vector<32x256xf32>
    %250 = arith.addf %247, %249 : vector<32x256xf32>
    %cst_90 = arith.constant 0.000000e+00 : f32
    %251 = vector.broadcast %cst_90 : f32 to vector<32x256xf32>
    %252 = arith.maximumf %250, %251 : vector<32x256xf32>
    %253 = vector.broadcast %0 : vector<1x256xf32> to vector<32x256xf32>
    %254 = arith.mulf %252, %253 : vector<32x256xf32>
    %255 = arith.truncf %254 : vector<32x256xf32> to vector<32x256xbf16>
    %256 = vector.extract_strided_slice %255 {offsets = [0, 0], sizes = [32, 128], strides = [1, 1]} : vector<32x256xbf16> to vector<32x128xbf16>
    %cst_91 = arith.constant 0.000000e+00 : bf16
    %257 = vector.broadcast %cst_91 : bf16 to vector<32x11xbf16>
    %258 = vector.extract_strided_slice %256 {offsets = [0, 0], sizes = [32, 117], strides = [1, 1]} : vector<32x128xbf16> to vector<32x117xbf16>
    %259 = tpu.concatenate %257, %258 in 1 : vector<32x11xbf16>, vector<32x117xbf16> -> vector<32x128xbf16>
    %cst_92 = arith.constant 0.000000e+00 : bf16
    %260 = vector.broadcast %cst_92 : bf16 to vector<32x10xbf16>
    %261 = vector.extract_strided_slice %256 {offsets = [0, 0], sizes = [32, 118], strides = [1, 1]} : vector<32x128xbf16> to vector<32x118xbf16>
    %262 = tpu.concatenate %260, %261 in 1 : vector<32x10xbf16>, vector<32x118xbf16> -> vector<32x128xbf16>
    %cst_93 = arith.constant 0.000000e+00 : bf16
    %263 = vector.broadcast %cst_93 : bf16 to vector<32x9xbf16>
    %264 = vector.extract_strided_slice %256 {offsets = [0, 0], sizes = [32, 119], strides = [1, 1]} : vector<32x128xbf16> to vector<32x119xbf16>
    %265 = tpu.concatenate %263, %264 in 1 : vector<32x9xbf16>, vector<32x119xbf16> -> vector<32x128xbf16>
    %cst_94 = arith.constant 0.000000e+00 : bf16
    %266 = vector.broadcast %cst_94 : bf16 to vector<32x1xbf16>
    %267 = vector.extract_strided_slice %256 {offsets = [0, 0], sizes = [32, 127], strides = [1, 1]} : vector<32x128xbf16> to vector<32x127xbf16>
    %268 = tpu.concatenate %266, %267 in 1 : vector<32x1xbf16>, vector<32x127xbf16> -> vector<32x128xbf16>
    %cst_95 = arith.constant 0.000000e+00 : bf16
    %269 = vector.broadcast %cst_95 : bf16 to vector<32x1xbf16>
    %270 = vector.extract_strided_slice %256 {offsets = [0, 1], sizes = [32, 127], strides = [1, 1]} : vector<32x128xbf16> to vector<32x127xbf16>
    %271 = tpu.concatenate %270, %269 in 1 : vector<32x127xbf16>, vector<32x1xbf16> -> vector<32x128xbf16>
    %cst_96 = arith.constant 0.000000e+00 : bf16
    %272 = vector.broadcast %cst_96 : bf16 to vector<32x9xbf16>
    %273 = vector.extract_strided_slice %256 {offsets = [0, 9], sizes = [32, 119], strides = [1, 1]} : vector<32x128xbf16> to vector<32x119xbf16>
    %274 = tpu.concatenate %273, %272 in 1 : vector<32x119xbf16>, vector<32x9xbf16> -> vector<32x128xbf16>
    %cst_97 = arith.constant 0.000000e+00 : bf16
    %275 = vector.broadcast %cst_97 : bf16 to vector<32x10xbf16>
    %276 = vector.extract_strided_slice %256 {offsets = [0, 10], sizes = [32, 118], strides = [1, 1]} : vector<32x128xbf16> to vector<32x118xbf16>
    %277 = tpu.concatenate %276, %275 in 1 : vector<32x118xbf16>, vector<32x10xbf16> -> vector<32x128xbf16>
    %cst_98 = arith.constant 0.000000e+00 : bf16
    %278 = vector.broadcast %cst_98 : bf16 to vector<32x11xbf16>
    %279 = vector.extract_strided_slice %256 {offsets = [0, 11], sizes = [32, 117], strides = [1, 1]} : vector<32x128xbf16> to vector<32x117xbf16>
    %280 = tpu.concatenate %279, %278 in 1 : vector<32x117xbf16>, vector<32x11xbf16> -> vector<32x128xbf16>
    %281 = tpu.concatenate %259, %262, %265, %268, %256, %271, %274, %277, %280 in 0 : vector<32x128xbf16>, vector<32x128xbf16>, vector<32x128xbf16>, vector<32x128xbf16>, vector<32x128xbf16>, vector<32x128xbf16>, vector<32x128xbf16>, vector<32x128xbf16>, vector<32x128xbf16> -> vector<288x128xbf16>
    %282 = vector.extract_strided_slice %255 {offsets = [0, 128], sizes = [32, 128], strides = [1, 1]} : vector<32x256xbf16> to vector<32x128xbf16>
    %cst_99 = arith.constant 0.000000e+00 : bf16
    %283 = vector.broadcast %cst_99 : bf16 to vector<32x7xbf16>
    %284 = vector.extract_strided_slice %282 {offsets = [0, 0], sizes = [32, 121], strides = [1, 1]} : vector<32x128xbf16> to vector<32x121xbf16>
    %285 = tpu.concatenate %283, %284 in 1 : vector<32x7xbf16>, vector<32x121xbf16> -> vector<32x128xbf16>
    %cst_100 = arith.constant 0.000000e+00 : bf16
    %286 = vector.broadcast %cst_100 : bf16 to vector<32x6xbf16>
    %287 = vector.extract_strided_slice %282 {offsets = [0, 0], sizes = [32, 122], strides = [1, 1]} : vector<32x128xbf16> to vector<32x122xbf16>
    %288 = tpu.concatenate %286, %287 in 1 : vector<32x6xbf16>, vector<32x122xbf16> -> vector<32x128xbf16>
    %cst_101 = arith.constant 0.000000e+00 : bf16
    %289 = vector.broadcast %cst_101 : bf16 to vector<32x5xbf16>
    %290 = vector.extract_strided_slice %282 {offsets = [0, 0], sizes = [32, 123], strides = [1, 1]} : vector<32x128xbf16> to vector<32x123xbf16>
    %291 = tpu.concatenate %289, %290 in 1 : vector<32x5xbf16>, vector<32x123xbf16> -> vector<32x128xbf16>
    %cst_102 = arith.constant 0.000000e+00 : bf16
    %292 = vector.broadcast %cst_102 : bf16 to vector<32x1xbf16>
    %293 = vector.extract_strided_slice %282 {offsets = [0, 0], sizes = [32, 127], strides = [1, 1]} : vector<32x128xbf16> to vector<32x127xbf16>
    %294 = tpu.concatenate %292, %293 in 1 : vector<32x1xbf16>, vector<32x127xbf16> -> vector<32x128xbf16>
    %cst_103 = arith.constant 0.000000e+00 : bf16
    %295 = vector.broadcast %cst_103 : bf16 to vector<32x1xbf16>
    %296 = vector.extract_strided_slice %282 {offsets = [0, 1], sizes = [32, 127], strides = [1, 1]} : vector<32x128xbf16> to vector<32x127xbf16>
    %297 = tpu.concatenate %296, %295 in 1 : vector<32x127xbf16>, vector<32x1xbf16> -> vector<32x128xbf16>
    %cst_104 = arith.constant 0.000000e+00 : bf16
    %298 = vector.broadcast %cst_104 : bf16 to vector<32x5xbf16>
    %299 = vector.extract_strided_slice %282 {offsets = [0, 5], sizes = [32, 123], strides = [1, 1]} : vector<32x128xbf16> to vector<32x123xbf16>
    %300 = tpu.concatenate %299, %298 in 1 : vector<32x123xbf16>, vector<32x5xbf16> -> vector<32x128xbf16>
    %cst_105 = arith.constant 0.000000e+00 : bf16
    %301 = vector.broadcast %cst_105 : bf16 to vector<32x6xbf16>
    %302 = vector.extract_strided_slice %282 {offsets = [0, 6], sizes = [32, 122], strides = [1, 1]} : vector<32x128xbf16> to vector<32x122xbf16>
    %303 = tpu.concatenate %302, %301 in 1 : vector<32x122xbf16>, vector<32x6xbf16> -> vector<32x128xbf16>
    %cst_106 = arith.constant 0.000000e+00 : bf16
    %304 = vector.broadcast %cst_106 : bf16 to vector<32x7xbf16>
    %305 = vector.extract_strided_slice %282 {offsets = [0, 7], sizes = [32, 121], strides = [1, 1]} : vector<32x128xbf16> to vector<32x121xbf16>
    %306 = tpu.concatenate %305, %304 in 1 : vector<32x121xbf16>, vector<32x7xbf16> -> vector<32x128xbf16>
    %307 = tpu.concatenate %285, %288, %291, %294, %282, %297, %300, %303, %306 in 0 : vector<32x128xbf16>, vector<32x128xbf16>, vector<32x128xbf16>, vector<32x128xbf16>, vector<32x128xbf16>, vector<32x128xbf16>, vector<32x128xbf16>, vector<32x128xbf16>, vector<32x128xbf16> -> vector<288x128xbf16>
    %308 = tpu.concatenate %281, %307 in 1 : vector<288x128xbf16>, vector<288x128xbf16> -> vector<288x256xbf16>
    %c0_107 = arith.constant 0 : index
    %c0_108 = arith.constant 0 : index
    %309 = vector.load %arg10[%c0_107, %c0_108] : memref<12x288xbf16, #tpu.memory_space<vmem>>, vector<12x288xbf16>
    %cst_109 = arith.constant dense<0.000000e+00> : vector<12x256xf32>
    %310 = tpu.matmul %309, %308, %cst_109 {dimension_numbers = #tpu.dot_dimension_numbers<[1], [0], [0], [1], [0, 0, 1, 1], [], []>} : vector<12x288xbf16>, vector<288x256xbf16>, vector<12x256xf32> -> vector<12x256xf32>
    %c0_110 = arith.constant 0 : index
    %c0_111 = arith.constant 0 : index
    %311 = vector.load %arg11[%c0_110, %c0_111] : memref<12x1xf32, #tpu.memory_space<vmem>>, vector<12x1xf32>
    %312 = vector.broadcast %311 : vector<12x1xf32> to vector<12x256xf32>
    %313 = arith.addf %310, %312 : vector<12x256xf32>
    %314 = vector.broadcast %0 : vector<1x256xf32> to vector<12x256xf32>
    %315 = arith.mulf %313, %314 : vector<12x256xf32>
    %c0_112 = arith.constant 0 : index
    %c0_113 = arith.constant 0 : index
    %316 = vector.load %arg12[%c0_112, %c0_113] : memref<32x288xbf16, #tpu.memory_space<vmem>>, vector<32x288xbf16>
    %cst_114 = arith.constant dense<0.000000e+00> : vector<32x256xf32>
    %317 = tpu.matmul %316, %56, %cst_114 {dimension_numbers = #tpu.dot_dimension_numbers<[1], [0], [0], [1], [0, 0, 1, 1], [], []>} : vector<32x288xbf16>, vector<288x256xbf16>, vector<32x256xf32> -> vector<32x256xf32>
    %c0_115 = arith.constant 0 : index
    %c0_116 = arith.constant 0 : index
    %318 = vector.load %arg13[%c0_115, %c0_116] : memref<32x1xf32, #tpu.memory_space<vmem>>, vector<32x1xf32>
    %319 = vector.broadcast %318 : vector<32x1xf32> to vector<32x256xf32>
    %320 = arith.addf %317, %319 : vector<32x256xf32>
    %cst_117 = arith.constant 0.000000e+00 : f32
    %321 = vector.broadcast %cst_117 : f32 to vector<32x256xf32>
    %322 = arith.maximumf %320, %321 : vector<32x256xf32>
    %323 = vector.broadcast %0 : vector<1x256xf32> to vector<32x256xf32>
    %324 = arith.mulf %322, %323 : vector<32x256xf32>
    %325 = arith.truncf %324 : vector<32x256xf32> to vector<32x256xbf16>
    %326 = vector.extract_strided_slice %325 {offsets = [0, 0], sizes = [32, 128], strides = [1, 1]} : vector<32x256xbf16> to vector<32x128xbf16>
    %cst_118 = arith.constant 0.000000e+00 : bf16
    %327 = vector.broadcast %cst_118 : bf16 to vector<32x11xbf16>
    %328 = vector.extract_strided_slice %326 {offsets = [0, 0], sizes = [32, 117], strides = [1, 1]} : vector<32x128xbf16> to vector<32x117xbf16>
    %329 = tpu.concatenate %327, %328 in 1 : vector<32x11xbf16>, vector<32x117xbf16> -> vector<32x128xbf16>
    %cst_119 = arith.constant 0.000000e+00 : bf16
    %330 = vector.broadcast %cst_119 : bf16 to vector<32x10xbf16>
    %331 = vector.extract_strided_slice %326 {offsets = [0, 0], sizes = [32, 118], strides = [1, 1]} : vector<32x128xbf16> to vector<32x118xbf16>
    %332 = tpu.concatenate %330, %331 in 1 : vector<32x10xbf16>, vector<32x118xbf16> -> vector<32x128xbf16>
    %cst_120 = arith.constant 0.000000e+00 : bf16
    %333 = vector.broadcast %cst_120 : bf16 to vector<32x9xbf16>
    %334 = vector.extract_strided_slice %326 {offsets = [0, 0], sizes = [32, 119], strides = [1, 1]} : vector<32x128xbf16> to vector<32x119xbf16>
    %335 = tpu.concatenate %333, %334 in 1 : vector<32x9xbf16>, vector<32x119xbf16> -> vector<32x128xbf16>
    %cst_121 = arith.constant 0.000000e+00 : bf16
    %336 = vector.broadcast %cst_121 : bf16 to vector<32x1xbf16>
    %337 = vector.extract_strided_slice %326 {offsets = [0, 0], sizes = [32, 127], strides = [1, 1]} : vector<32x128xbf16> to vector<32x127xbf16>
    %338 = tpu.concatenate %336, %337 in 1 : vector<32x1xbf16>, vector<32x127xbf16> -> vector<32x128xbf16>
    %cst_122 = arith.constant 0.000000e+00 : bf16
    %339 = vector.broadcast %cst_122 : bf16 to vector<32x1xbf16>
    %340 = vector.extract_strided_slice %326 {offsets = [0, 1], sizes = [32, 127], strides = [1, 1]} : vector<32x128xbf16> to vector<32x127xbf16>
    %341 = tpu.concatenate %340, %339 in 1 : vector<32x127xbf16>, vector<32x1xbf16> -> vector<32x128xbf16>
    %cst_123 = arith.constant 0.000000e+00 : bf16
    %342 = vector.broadcast %cst_123 : bf16 to vector<32x9xbf16>
    %343 = vector.extract_strided_slice %326 {offsets = [0, 9], sizes = [32, 119], strides = [1, 1]} : vector<32x128xbf16> to vector<32x119xbf16>
    %344 = tpu.concatenate %343, %342 in 1 : vector<32x119xbf16>, vector<32x9xbf16> -> vector<32x128xbf16>
    %cst_124 = arith.constant 0.000000e+00 : bf16
    %345 = vector.broadcast %cst_124 : bf16 to vector<32x10xbf16>
    %346 = vector.extract_strided_slice %326 {offsets = [0, 10], sizes = [32, 118], strides = [1, 1]} : vector<32x128xbf16> to vector<32x118xbf16>
    %347 = tpu.concatenate %346, %345 in 1 : vector<32x118xbf16>, vector<32x10xbf16> -> vector<32x128xbf16>
    %cst_125 = arith.constant 0.000000e+00 : bf16
    %348 = vector.broadcast %cst_125 : bf16 to vector<32x11xbf16>
    %349 = vector.extract_strided_slice %326 {offsets = [0, 11], sizes = [32, 117], strides = [1, 1]} : vector<32x128xbf16> to vector<32x117xbf16>
    %350 = tpu.concatenate %349, %348 in 1 : vector<32x117xbf16>, vector<32x11xbf16> -> vector<32x128xbf16>
    %351 = tpu.concatenate %329, %332, %335, %338, %326, %341, %344, %347, %350 in 0 : vector<32x128xbf16>, vector<32x128xbf16>, vector<32x128xbf16>, vector<32x128xbf16>, vector<32x128xbf16>, vector<32x128xbf16>, vector<32x128xbf16>, vector<32x128xbf16>, vector<32x128xbf16> -> vector<288x128xbf16>
    %352 = vector.extract_strided_slice %325 {offsets = [0, 128], sizes = [32, 128], strides = [1, 1]} : vector<32x256xbf16> to vector<32x128xbf16>
    %cst_126 = arith.constant 0.000000e+00 : bf16
    %353 = vector.broadcast %cst_126 : bf16 to vector<32x7xbf16>
    %354 = vector.extract_strided_slice %352 {offsets = [0, 0], sizes = [32, 121], strides = [1, 1]} : vector<32x128xbf16> to vector<32x121xbf16>
    %355 = tpu.concatenate %353, %354 in 1 : vector<32x7xbf16>, vector<32x121xbf16> -> vector<32x128xbf16>
    %cst_127 = arith.constant 0.000000e+00 : bf16
    %356 = vector.broadcast %cst_127 : bf16 to vector<32x6xbf16>
    %357 = vector.extract_strided_slice %352 {offsets = [0, 0], sizes = [32, 122], strides = [1, 1]} : vector<32x128xbf16> to vector<32x122xbf16>
    %358 = tpu.concatenate %356, %357 in 1 : vector<32x6xbf16>, vector<32x122xbf16> -> vector<32x128xbf16>
    %cst_128 = arith.constant 0.000000e+00 : bf16
    %359 = vector.broadcast %cst_128 : bf16 to vector<32x5xbf16>
    %360 = vector.extract_strided_slice %352 {offsets = [0, 0], sizes = [32, 123], strides = [1, 1]} : vector<32x128xbf16> to vector<32x123xbf16>
    %361 = tpu.concatenate %359, %360 in 1 : vector<32x5xbf16>, vector<32x123xbf16> -> vector<32x128xbf16>
    %cst_129 = arith.constant 0.000000e+00 : bf16
    %362 = vector.broadcast %cst_129 : bf16 to vector<32x1xbf16>
    %363 = vector.extract_strided_slice %352 {offsets = [0, 0], sizes = [32, 127], strides = [1, 1]} : vector<32x128xbf16> to vector<32x127xbf16>
    %364 = tpu.concatenate %362, %363 in 1 : vector<32x1xbf16>, vector<32x127xbf16> -> vector<32x128xbf16>
    %cst_130 = arith.constant 0.000000e+00 : bf16
    %365 = vector.broadcast %cst_130 : bf16 to vector<32x1xbf16>
    %366 = vector.extract_strided_slice %352 {offsets = [0, 1], sizes = [32, 127], strides = [1, 1]} : vector<32x128xbf16> to vector<32x127xbf16>
    %367 = tpu.concatenate %366, %365 in 1 : vector<32x127xbf16>, vector<32x1xbf16> -> vector<32x128xbf16>
    %cst_131 = arith.constant 0.000000e+00 : bf16
    %368 = vector.broadcast %cst_131 : bf16 to vector<32x5xbf16>
    %369 = vector.extract_strided_slice %352 {offsets = [0, 5], sizes = [32, 123], strides = [1, 1]} : vector<32x128xbf16> to vector<32x123xbf16>
    %370 = tpu.concatenate %369, %368 in 1 : vector<32x123xbf16>, vector<32x5xbf16> -> vector<32x128xbf16>
    %cst_132 = arith.constant 0.000000e+00 : bf16
    %371 = vector.broadcast %cst_132 : bf16 to vector<32x6xbf16>
    %372 = vector.extract_strided_slice %352 {offsets = [0, 6], sizes = [32, 122], strides = [1, 1]} : vector<32x128xbf16> to vector<32x122xbf16>
    %373 = tpu.concatenate %372, %371 in 1 : vector<32x122xbf16>, vector<32x6xbf16> -> vector<32x128xbf16>
    %cst_133 = arith.constant 0.000000e+00 : bf16
    %374 = vector.broadcast %cst_133 : bf16 to vector<32x7xbf16>
    %375 = vector.extract_strided_slice %352 {offsets = [0, 7], sizes = [32, 121], strides = [1, 1]} : vector<32x128xbf16> to vector<32x121xbf16>
    %376 = tpu.concatenate %375, %374 in 1 : vector<32x121xbf16>, vector<32x7xbf16> -> vector<32x128xbf16>
    %377 = tpu.concatenate %355, %358, %361, %364, %352, %367, %370, %373, %376 in 0 : vector<32x128xbf16>, vector<32x128xbf16>, vector<32x128xbf16>, vector<32x128xbf16>, vector<32x128xbf16>, vector<32x128xbf16>, vector<32x128xbf16>, vector<32x128xbf16>, vector<32x128xbf16> -> vector<288x128xbf16>
    %378 = tpu.concatenate %351, %377 in 1 : vector<288x128xbf16>, vector<288x128xbf16> -> vector<288x256xbf16>
    %c0_134 = arith.constant 0 : index
    %c0_135 = arith.constant 0 : index
    %379 = vector.load %arg14[%c0_134, %c0_135] : memref<32x288xbf16, #tpu.memory_space<vmem>>, vector<32x288xbf16>
    %cst_136 = arith.constant dense<0.000000e+00> : vector<32x256xf32>
    %380 = tpu.matmul %379, %378, %cst_136 {dimension_numbers = #tpu.dot_dimension_numbers<[1], [0], [0], [1], [0, 0, 1, 1], [], []>} : vector<32x288xbf16>, vector<288x256xbf16>, vector<32x256xf32> -> vector<32x256xf32>
    %c0_137 = arith.constant 0 : index
    %c0_138 = arith.constant 0 : index
    %381 = vector.load %arg15[%c0_137, %c0_138] : memref<32x1xf32, #tpu.memory_space<vmem>>, vector<32x1xf32>
    %382 = vector.broadcast %381 : vector<32x1xf32> to vector<32x256xf32>
    %383 = arith.addf %380, %382 : vector<32x256xf32>
    %cst_139 = arith.constant 0.000000e+00 : f32
    %384 = vector.broadcast %cst_139 : f32 to vector<32x256xf32>
    %385 = arith.maximumf %383, %384 : vector<32x256xf32>
    %386 = vector.broadcast %0 : vector<1x256xf32> to vector<32x256xf32>
    %387 = arith.mulf %385, %386 : vector<32x256xf32>
    %388 = arith.truncf %387 : vector<32x256xf32> to vector<32x256xbf16>
    %389 = vector.extract_strided_slice %388 {offsets = [0, 0], sizes = [32, 128], strides = [1, 1]} : vector<32x256xbf16> to vector<32x128xbf16>
    %cst_140 = arith.constant 0.000000e+00 : bf16
    %390 = vector.broadcast %cst_140 : bf16 to vector<32x11xbf16>
    %391 = vector.extract_strided_slice %389 {offsets = [0, 0], sizes = [32, 117], strides = [1, 1]} : vector<32x128xbf16> to vector<32x117xbf16>
    %392 = tpu.concatenate %390, %391 in 1 : vector<32x11xbf16>, vector<32x117xbf16> -> vector<32x128xbf16>
    %cst_141 = arith.constant 0.000000e+00 : bf16
    %393 = vector.broadcast %cst_141 : bf16 to vector<32x10xbf16>
    %394 = vector.extract_strided_slice %389 {offsets = [0, 0], sizes = [32, 118], strides = [1, 1]} : vector<32x128xbf16> to vector<32x118xbf16>
    %395 = tpu.concatenate %393, %394 in 1 : vector<32x10xbf16>, vector<32x118xbf16> -> vector<32x128xbf16>
    %cst_142 = arith.constant 0.000000e+00 : bf16
    %396 = vector.broadcast %cst_142 : bf16 to vector<32x9xbf16>
    %397 = vector.extract_strided_slice %389 {offsets = [0, 0], sizes = [32, 119], strides = [1, 1]} : vector<32x128xbf16> to vector<32x119xbf16>
    %398 = tpu.concatenate %396, %397 in 1 : vector<32x9xbf16>, vector<32x119xbf16> -> vector<32x128xbf16>
    %cst_143 = arith.constant 0.000000e+00 : bf16
    %399 = vector.broadcast %cst_143 : bf16 to vector<32x1xbf16>
    %400 = vector.extract_strided_slice %389 {offsets = [0, 0], sizes = [32, 127], strides = [1, 1]} : vector<32x128xbf16> to vector<32x127xbf16>
    %401 = tpu.concatenate %399, %400 in 1 : vector<32x1xbf16>, vector<32x127xbf16> -> vector<32x128xbf16>
    %cst_144 = arith.constant 0.000000e+00 : bf16
    %402 = vector.broadcast %cst_144 : bf16 to vector<32x1xbf16>
    %403 = vector.extract_strided_slice %389 {offsets = [0, 1], sizes = [32, 127], strides = [1, 1]} : vector<32x128xbf16> to vector<32x127xbf16>
    %404 = tpu.concatenate %403, %402 in 1 : vector<32x127xbf16>, vector<32x1xbf16> -> vector<32x128xbf16>
    %cst_145 = arith.constant 0.000000e+00 : bf16
    %405 = vector.broadcast %cst_145 : bf16 to vector<32x9xbf16>
    %406 = vector.extract_strided_slice %389 {offsets = [0, 9], sizes = [32, 119], strides = [1, 1]} : vector<32x128xbf16> to vector<32x119xbf16>
    %407 = tpu.concatenate %406, %405 in 1 : vector<32x119xbf16>, vector<32x9xbf16> -> vector<32x128xbf16>
    %cst_146 = arith.constant 0.000000e+00 : bf16
    %408 = vector.broadcast %cst_146 : bf16 to vector<32x10xbf16>
    %409 = vector.extract_strided_slice %389 {offsets = [0, 10], sizes = [32, 118], strides = [1, 1]} : vector<32x128xbf16> to vector<32x118xbf16>
    %410 = tpu.concatenate %409, %408 in 1 : vector<32x118xbf16>, vector<32x10xbf16> -> vector<32x128xbf16>
    %cst_147 = arith.constant 0.000000e+00 : bf16
    %411 = vector.broadcast %cst_147 : bf16 to vector<32x11xbf16>
    %412 = vector.extract_strided_slice %389 {offsets = [0, 11], sizes = [32, 117], strides = [1, 1]} : vector<32x128xbf16> to vector<32x117xbf16>
    %413 = tpu.concatenate %412, %411 in 1 : vector<32x117xbf16>, vector<32x11xbf16> -> vector<32x128xbf16>
    %414 = tpu.concatenate %392, %395, %398, %401, %389, %404, %407, %410, %413 in 0 : vector<32x128xbf16>, vector<32x128xbf16>, vector<32x128xbf16>, vector<32x128xbf16>, vector<32x128xbf16>, vector<32x128xbf16>, vector<32x128xbf16>, vector<32x128xbf16>, vector<32x128xbf16> -> vector<288x128xbf16>
    %415 = vector.extract_strided_slice %388 {offsets = [0, 128], sizes = [32, 128], strides = [1, 1]} : vector<32x256xbf16> to vector<32x128xbf16>
    %cst_148 = arith.constant 0.000000e+00 : bf16
    %416 = vector.broadcast %cst_148 : bf16 to vector<32x7xbf16>
    %417 = vector.extract_strided_slice %415 {offsets = [0, 0], sizes = [32, 121], strides = [1, 1]} : vector<32x128xbf16> to vector<32x121xbf16>
    %418 = tpu.concatenate %416, %417 in 1 : vector<32x7xbf16>, vector<32x121xbf16> -> vector<32x128xbf16>
    %cst_149 = arith.constant 0.000000e+00 : bf16
    %419 = vector.broadcast %cst_149 : bf16 to vector<32x6xbf16>
    %420 = vector.extract_strided_slice %415 {offsets = [0, 0], sizes = [32, 122], strides = [1, 1]} : vector<32x128xbf16> to vector<32x122xbf16>
    %421 = tpu.concatenate %419, %420 in 1 : vector<32x6xbf16>, vector<32x122xbf16> -> vector<32x128xbf16>
    %cst_150 = arith.constant 0.000000e+00 : bf16
    %422 = vector.broadcast %cst_150 : bf16 to vector<32x5xbf16>
    %423 = vector.extract_strided_slice %415 {offsets = [0, 0], sizes = [32, 123], strides = [1, 1]} : vector<32x128xbf16> to vector<32x123xbf16>
    %424 = tpu.concatenate %422, %423 in 1 : vector<32x5xbf16>, vector<32x123xbf16> -> vector<32x128xbf16>
    %cst_151 = arith.constant 0.000000e+00 : bf16
    %425 = vector.broadcast %cst_151 : bf16 to vector<32x1xbf16>
    %426 = vector.extract_strided_slice %415 {offsets = [0, 0], sizes = [32, 127], strides = [1, 1]} : vector<32x128xbf16> to vector<32x127xbf16>
    %427 = tpu.concatenate %425, %426 in 1 : vector<32x1xbf16>, vector<32x127xbf16> -> vector<32x128xbf16>
    %cst_152 = arith.constant 0.000000e+00 : bf16
    %428 = vector.broadcast %cst_152 : bf16 to vector<32x1xbf16>
    %429 = vector.extract_strided_slice %415 {offsets = [0, 1], sizes = [32, 127], strides = [1, 1]} : vector<32x128xbf16> to vector<32x127xbf16>
    %430 = tpu.concatenate %429, %428 in 1 : vector<32x127xbf16>, vector<32x1xbf16> -> vector<32x128xbf16>
    %cst_153 = arith.constant 0.000000e+00 : bf16
    %431 = vector.broadcast %cst_153 : bf16 to vector<32x5xbf16>
    %432 = vector.extract_strided_slice %415 {offsets = [0, 5], sizes = [32, 123], strides = [1, 1]} : vector<32x128xbf16> to vector<32x123xbf16>
    %433 = tpu.concatenate %432, %431 in 1 : vector<32x123xbf16>, vector<32x5xbf16> -> vector<32x128xbf16>
    %cst_154 = arith.constant 0.000000e+00 : bf16
    %434 = vector.broadcast %cst_154 : bf16 to vector<32x6xbf16>
    %435 = vector.extract_strided_slice %415 {offsets = [0, 6], sizes = [32, 122], strides = [1, 1]} : vector<32x128xbf16> to vector<32x122xbf16>
    %436 = tpu.concatenate %435, %434 in 1 : vector<32x122xbf16>, vector<32x6xbf16> -> vector<32x128xbf16>
    %cst_155 = arith.constant 0.000000e+00 : bf16
    %437 = vector.broadcast %cst_155 : bf16 to vector<32x7xbf16>
    %438 = vector.extract_strided_slice %415 {offsets = [0, 7], sizes = [32, 121], strides = [1, 1]} : vector<32x128xbf16> to vector<32x121xbf16>
    %439 = tpu.concatenate %438, %437 in 1 : vector<32x121xbf16>, vector<32x7xbf16> -> vector<32x128xbf16>
    %440 = tpu.concatenate %418, %421, %424, %427, %415, %430, %433, %436, %439 in 0 : vector<32x128xbf16>, vector<32x128xbf16>, vector<32x128xbf16>, vector<32x128xbf16>, vector<32x128xbf16>, vector<32x128xbf16>, vector<32x128xbf16>, vector<32x128xbf16>, vector<32x128xbf16> -> vector<288x128xbf16>
    %441 = tpu.concatenate %414, %440 in 1 : vector<288x128xbf16>, vector<288x128xbf16> -> vector<288x256xbf16>
    %c0_156 = arith.constant 0 : index
    %c0_157 = arith.constant 0 : index
    %442 = vector.load %arg16[%c0_156, %c0_157] : memref<32x288xbf16, #tpu.memory_space<vmem>>, vector<32x288xbf16>
    %cst_158 = arith.constant dense<0.000000e+00> : vector<32x256xf32>
    %443 = tpu.matmul %442, %441, %cst_158 {dimension_numbers = #tpu.dot_dimension_numbers<[1], [0], [0], [1], [0, 0, 1, 1], [], []>} : vector<32x288xbf16>, vector<288x256xbf16>, vector<32x256xf32> -> vector<32x256xf32>
    %c0_159 = arith.constant 0 : index
    %c0_160 = arith.constant 0 : index
    %444 = vector.load %arg17[%c0_159, %c0_160] : memref<32x1xf32, #tpu.memory_space<vmem>>, vector<32x1xf32>
    %445 = vector.broadcast %444 : vector<32x1xf32> to vector<32x256xf32>
    %446 = arith.addf %443, %445 : vector<32x256xf32>
    %cst_161 = arith.constant 0.000000e+00 : f32
    %447 = vector.broadcast %cst_161 : f32 to vector<32x256xf32>
    %448 = arith.maximumf %446, %447 : vector<32x256xf32>
    %449 = vector.broadcast %0 : vector<1x256xf32> to vector<32x256xf32>
    %450 = arith.mulf %448, %449 : vector<32x256xf32>
    %451 = arith.truncf %450 : vector<32x256xf32> to vector<32x256xbf16>
    %452 = vector.extract_strided_slice %451 {offsets = [0, 0], sizes = [32, 128], strides = [1, 1]} : vector<32x256xbf16> to vector<32x128xbf16>
    %cst_162 = arith.constant 0.000000e+00 : bf16
    %453 = vector.broadcast %cst_162 : bf16 to vector<32x11xbf16>
    %454 = vector.extract_strided_slice %452 {offsets = [0, 0], sizes = [32, 117], strides = [1, 1]} : vector<32x128xbf16> to vector<32x117xbf16>
    %455 = tpu.concatenate %453, %454 in 1 : vector<32x11xbf16>, vector<32x117xbf16> -> vector<32x128xbf16>
    %cst_163 = arith.constant 0.000000e+00 : bf16
    %456 = vector.broadcast %cst_163 : bf16 to vector<32x10xbf16>
    %457 = vector.extract_strided_slice %452 {offsets = [0, 0], sizes = [32, 118], strides = [1, 1]} : vector<32x128xbf16> to vector<32x118xbf16>
    %458 = tpu.concatenate %456, %457 in 1 : vector<32x10xbf16>, vector<32x118xbf16> -> vector<32x128xbf16>
    %cst_164 = arith.constant 0.000000e+00 : bf16
    %459 = vector.broadcast %cst_164 : bf16 to vector<32x9xbf16>
    %460 = vector.extract_strided_slice %452 {offsets = [0, 0], sizes = [32, 119], strides = [1, 1]} : vector<32x128xbf16> to vector<32x119xbf16>
    %461 = tpu.concatenate %459, %460 in 1 : vector<32x9xbf16>, vector<32x119xbf16> -> vector<32x128xbf16>
    %cst_165 = arith.constant 0.000000e+00 : bf16
    %462 = vector.broadcast %cst_165 : bf16 to vector<32x1xbf16>
    %463 = vector.extract_strided_slice %452 {offsets = [0, 0], sizes = [32, 127], strides = [1, 1]} : vector<32x128xbf16> to vector<32x127xbf16>
    %464 = tpu.concatenate %462, %463 in 1 : vector<32x1xbf16>, vector<32x127xbf16> -> vector<32x128xbf16>
    %cst_166 = arith.constant 0.000000e+00 : bf16
    %465 = vector.broadcast %cst_166 : bf16 to vector<32x1xbf16>
    %466 = vector.extract_strided_slice %452 {offsets = [0, 1], sizes = [32, 127], strides = [1, 1]} : vector<32x128xbf16> to vector<32x127xbf16>
    %467 = tpu.concatenate %466, %465 in 1 : vector<32x127xbf16>, vector<32x1xbf16> -> vector<32x128xbf16>
    %cst_167 = arith.constant 0.000000e+00 : bf16
    %468 = vector.broadcast %cst_167 : bf16 to vector<32x9xbf16>
    %469 = vector.extract_strided_slice %452 {offsets = [0, 9], sizes = [32, 119], strides = [1, 1]} : vector<32x128xbf16> to vector<32x119xbf16>
    %470 = tpu.concatenate %469, %468 in 1 : vector<32x119xbf16>, vector<32x9xbf16> -> vector<32x128xbf16>
    %cst_168 = arith.constant 0.000000e+00 : bf16
    %471 = vector.broadcast %cst_168 : bf16 to vector<32x10xbf16>
    %472 = vector.extract_strided_slice %452 {offsets = [0, 10], sizes = [32, 118], strides = [1, 1]} : vector<32x128xbf16> to vector<32x118xbf16>
    %473 = tpu.concatenate %472, %471 in 1 : vector<32x118xbf16>, vector<32x10xbf16> -> vector<32x128xbf16>
    %cst_169 = arith.constant 0.000000e+00 : bf16
    %474 = vector.broadcast %cst_169 : bf16 to vector<32x11xbf16>
    %475 = vector.extract_strided_slice %452 {offsets = [0, 11], sizes = [32, 117], strides = [1, 1]} : vector<32x128xbf16> to vector<32x117xbf16>
    %476 = tpu.concatenate %475, %474 in 1 : vector<32x117xbf16>, vector<32x11xbf16> -> vector<32x128xbf16>
    %477 = tpu.concatenate %455, %458, %461, %464, %452, %467, %470, %473, %476 in 0 : vector<32x128xbf16>, vector<32x128xbf16>, vector<32x128xbf16>, vector<32x128xbf16>, vector<32x128xbf16>, vector<32x128xbf16>, vector<32x128xbf16>, vector<32x128xbf16>, vector<32x128xbf16> -> vector<288x128xbf16>
    %478 = vector.extract_strided_slice %451 {offsets = [0, 128], sizes = [32, 128], strides = [1, 1]} : vector<32x256xbf16> to vector<32x128xbf16>
    %cst_170 = arith.constant 0.000000e+00 : bf16
    %479 = vector.broadcast %cst_170 : bf16 to vector<32x7xbf16>
    %480 = vector.extract_strided_slice %478 {offsets = [0, 0], sizes = [32, 121], strides = [1, 1]} : vector<32x128xbf16> to vector<32x121xbf16>
    %481 = tpu.concatenate %479, %480 in 1 : vector<32x7xbf16>, vector<32x121xbf16> -> vector<32x128xbf16>
    %cst_171 = arith.constant 0.000000e+00 : bf16
    %482 = vector.broadcast %cst_171 : bf16 to vector<32x6xbf16>
    %483 = vector.extract_strided_slice %478 {offsets = [0, 0], sizes = [32, 122], strides = [1, 1]} : vector<32x128xbf16> to vector<32x122xbf16>
    %484 = tpu.concatenate %482, %483 in 1 : vector<32x6xbf16>, vector<32x122xbf16> -> vector<32x128xbf16>
    %cst_172 = arith.constant 0.000000e+00 : bf16
    %485 = vector.broadcast %cst_172 : bf16 to vector<32x5xbf16>
    %486 = vector.extract_strided_slice %478 {offsets = [0, 0], sizes = [32, 123], strides = [1, 1]} : vector<32x128xbf16> to vector<32x123xbf16>
    %487 = tpu.concatenate %485, %486 in 1 : vector<32x5xbf16>, vector<32x123xbf16> -> vector<32x128xbf16>
    %cst_173 = arith.constant 0.000000e+00 : bf16
    %488 = vector.broadcast %cst_173 : bf16 to vector<32x1xbf16>
    %489 = vector.extract_strided_slice %478 {offsets = [0, 0], sizes = [32, 127], strides = [1, 1]} : vector<32x128xbf16> to vector<32x127xbf16>
    %490 = tpu.concatenate %488, %489 in 1 : vector<32x1xbf16>, vector<32x127xbf16> -> vector<32x128xbf16>
    %cst_174 = arith.constant 0.000000e+00 : bf16
    %491 = vector.broadcast %cst_174 : bf16 to vector<32x1xbf16>
    %492 = vector.extract_strided_slice %478 {offsets = [0, 1], sizes = [32, 127], strides = [1, 1]} : vector<32x128xbf16> to vector<32x127xbf16>
    %493 = tpu.concatenate %492, %491 in 1 : vector<32x127xbf16>, vector<32x1xbf16> -> vector<32x128xbf16>
    %cst_175 = arith.constant 0.000000e+00 : bf16
    %494 = vector.broadcast %cst_175 : bf16 to vector<32x5xbf16>
    %495 = vector.extract_strided_slice %478 {offsets = [0, 5], sizes = [32, 123], strides = [1, 1]} : vector<32x128xbf16> to vector<32x123xbf16>
    %496 = tpu.concatenate %495, %494 in 1 : vector<32x123xbf16>, vector<32x5xbf16> -> vector<32x128xbf16>
    %cst_176 = arith.constant 0.000000e+00 : bf16
    %497 = vector.broadcast %cst_176 : bf16 to vector<32x6xbf16>
    %498 = vector.extract_strided_slice %478 {offsets = [0, 6], sizes = [32, 122], strides = [1, 1]} : vector<32x128xbf16> to vector<32x122xbf16>
    %499 = tpu.concatenate %498, %497 in 1 : vector<32x122xbf16>, vector<32x6xbf16> -> vector<32x128xbf16>
    %cst_177 = arith.constant 0.000000e+00 : bf16
    %500 = vector.broadcast %cst_177 : bf16 to vector<32x7xbf16>
    %501 = vector.extract_strided_slice %478 {offsets = [0, 7], sizes = [32, 121], strides = [1, 1]} : vector<32x128xbf16> to vector<32x121xbf16>
    %502 = tpu.concatenate %501, %500 in 1 : vector<32x121xbf16>, vector<32x7xbf16> -> vector<32x128xbf16>
    %503 = tpu.concatenate %481, %484, %487, %490, %478, %493, %496, %499, %502 in 0 : vector<32x128xbf16>, vector<32x128xbf16>, vector<32x128xbf16>, vector<32x128xbf16>, vector<32x128xbf16>, vector<32x128xbf16>, vector<32x128xbf16>, vector<32x128xbf16>, vector<32x128xbf16> -> vector<288x128xbf16>
    %504 = tpu.concatenate %477, %503 in 1 : vector<288x128xbf16>, vector<288x128xbf16> -> vector<288x256xbf16>
    %c0_178 = arith.constant 0 : index
    %c0_179 = arith.constant 0 : index
    %505 = vector.load %arg18[%c0_178, %c0_179] : memref<32x288xbf16, #tpu.memory_space<vmem>>, vector<32x288xbf16>
    %cst_180 = arith.constant dense<0.000000e+00> : vector<32x256xf32>
    %506 = tpu.matmul %505, %504, %cst_180 {dimension_numbers = #tpu.dot_dimension_numbers<[1], [0], [0], [1], [0, 0, 1, 1], [], []>} : vector<32x288xbf16>, vector<288x256xbf16>, vector<32x256xf32> -> vector<32x256xf32>
    %c0_181 = arith.constant 0 : index
    %c0_182 = arith.constant 0 : index
    %507 = vector.load %arg19[%c0_181, %c0_182] : memref<32x1xf32, #tpu.memory_space<vmem>>, vector<32x1xf32>
    %508 = vector.broadcast %507 : vector<32x1xf32> to vector<32x256xf32>
    %509 = arith.addf %506, %508 : vector<32x256xf32>
    %cst_183 = arith.constant 0.000000e+00 : f32
    %510 = vector.broadcast %cst_183 : f32 to vector<32x256xf32>
    %511 = arith.maximumf %509, %510 : vector<32x256xf32>
    %512 = vector.broadcast %0 : vector<1x256xf32> to vector<32x256xf32>
    %513 = arith.mulf %511, %512 : vector<32x256xf32>
    %514 = arith.truncf %513 : vector<32x256xf32> to vector<32x256xbf16>
    %515 = vector.extract_strided_slice %514 {offsets = [0, 0], sizes = [32, 128], strides = [1, 1]} : vector<32x256xbf16> to vector<32x128xbf16>
    %cst_184 = arith.constant 0.000000e+00 : bf16
    %516 = vector.broadcast %cst_184 : bf16 to vector<32x11xbf16>
    %517 = vector.extract_strided_slice %515 {offsets = [0, 0], sizes = [32, 117], strides = [1, 1]} : vector<32x128xbf16> to vector<32x117xbf16>
    %518 = tpu.concatenate %516, %517 in 1 : vector<32x11xbf16>, vector<32x117xbf16> -> vector<32x128xbf16>
    %cst_185 = arith.constant 0.000000e+00 : bf16
    %519 = vector.broadcast %cst_185 : bf16 to vector<32x10xbf16>
    %520 = vector.extract_strided_slice %515 {offsets = [0, 0], sizes = [32, 118], strides = [1, 1]} : vector<32x128xbf16> to vector<32x118xbf16>
    %521 = tpu.concatenate %519, %520 in 1 : vector<32x10xbf16>, vector<32x118xbf16> -> vector<32x128xbf16>
    %cst_186 = arith.constant 0.000000e+00 : bf16
    %522 = vector.broadcast %cst_186 : bf16 to vector<32x9xbf16>
    %523 = vector.extract_strided_slice %515 {offsets = [0, 0], sizes = [32, 119], strides = [1, 1]} : vector<32x128xbf16> to vector<32x119xbf16>
    %524 = tpu.concatenate %522, %523 in 1 : vector<32x9xbf16>, vector<32x119xbf16> -> vector<32x128xbf16>
    %cst_187 = arith.constant 0.000000e+00 : bf16
    %525 = vector.broadcast %cst_187 : bf16 to vector<32x1xbf16>
    %526 = vector.extract_strided_slice %515 {offsets = [0, 0], sizes = [32, 127], strides = [1, 1]} : vector<32x128xbf16> to vector<32x127xbf16>
    %527 = tpu.concatenate %525, %526 in 1 : vector<32x1xbf16>, vector<32x127xbf16> -> vector<32x128xbf16>
    %cst_188 = arith.constant 0.000000e+00 : bf16
    %528 = vector.broadcast %cst_188 : bf16 to vector<32x1xbf16>
    %529 = vector.extract_strided_slice %515 {offsets = [0, 1], sizes = [32, 127], strides = [1, 1]} : vector<32x128xbf16> to vector<32x127xbf16>
    %530 = tpu.concatenate %529, %528 in 1 : vector<32x127xbf16>, vector<32x1xbf16> -> vector<32x128xbf16>
    %cst_189 = arith.constant 0.000000e+00 : bf16
    %531 = vector.broadcast %cst_189 : bf16 to vector<32x9xbf16>
    %532 = vector.extract_strided_slice %515 {offsets = [0, 9], sizes = [32, 119], strides = [1, 1]} : vector<32x128xbf16> to vector<32x119xbf16>
    %533 = tpu.concatenate %532, %531 in 1 : vector<32x119xbf16>, vector<32x9xbf16> -> vector<32x128xbf16>
    %cst_190 = arith.constant 0.000000e+00 : bf16
    %534 = vector.broadcast %cst_190 : bf16 to vector<32x10xbf16>
    %535 = vector.extract_strided_slice %515 {offsets = [0, 10], sizes = [32, 118], strides = [1, 1]} : vector<32x128xbf16> to vector<32x118xbf16>
    %536 = tpu.concatenate %535, %534 in 1 : vector<32x118xbf16>, vector<32x10xbf16> -> vector<32x128xbf16>
    %cst_191 = arith.constant 0.000000e+00 : bf16
    %537 = vector.broadcast %cst_191 : bf16 to vector<32x11xbf16>
    %538 = vector.extract_strided_slice %515 {offsets = [0, 11], sizes = [32, 117], strides = [1, 1]} : vector<32x128xbf16> to vector<32x117xbf16>
    %539 = tpu.concatenate %538, %537 in 1 : vector<32x117xbf16>, vector<32x11xbf16> -> vector<32x128xbf16>
    %540 = tpu.concatenate %518, %521, %524, %527, %515, %530, %533, %536, %539 in 0 : vector<32x128xbf16>, vector<32x128xbf16>, vector<32x128xbf16>, vector<32x128xbf16>, vector<32x128xbf16>, vector<32x128xbf16>, vector<32x128xbf16>, vector<32x128xbf16>, vector<32x128xbf16> -> vector<288x128xbf16>
    %541 = vector.extract_strided_slice %514 {offsets = [0, 128], sizes = [32, 128], strides = [1, 1]} : vector<32x256xbf16> to vector<32x128xbf16>
    %cst_192 = arith.constant 0.000000e+00 : bf16
    %542 = vector.broadcast %cst_192 : bf16 to vector<32x7xbf16>
    %543 = vector.extract_strided_slice %541 {offsets = [0, 0], sizes = [32, 121], strides = [1, 1]} : vector<32x128xbf16> to vector<32x121xbf16>
    %544 = tpu.concatenate %542, %543 in 1 : vector<32x7xbf16>, vector<32x121xbf16> -> vector<32x128xbf16>
    %cst_193 = arith.constant 0.000000e+00 : bf16
    %545 = vector.broadcast %cst_193 : bf16 to vector<32x6xbf16>
    %546 = vector.extract_strided_slice %541 {offsets = [0, 0], sizes = [32, 122], strides = [1, 1]} : vector<32x128xbf16> to vector<32x122xbf16>
    %547 = tpu.concatenate %545, %546 in 1 : vector<32x6xbf16>, vector<32x122xbf16> -> vector<32x128xbf16>
    %cst_194 = arith.constant 0.000000e+00 : bf16
    %548 = vector.broadcast %cst_194 : bf16 to vector<32x5xbf16>
    %549 = vector.extract_strided_slice %541 {offsets = [0, 0], sizes = [32, 123], strides = [1, 1]} : vector<32x128xbf16> to vector<32x123xbf16>
    %550 = tpu.concatenate %548, %549 in 1 : vector<32x5xbf16>, vector<32x123xbf16> -> vector<32x128xbf16>
    %cst_195 = arith.constant 0.000000e+00 : bf16
    %551 = vector.broadcast %cst_195 : bf16 to vector<32x1xbf16>
    %552 = vector.extract_strided_slice %541 {offsets = [0, 0], sizes = [32, 127], strides = [1, 1]} : vector<32x128xbf16> to vector<32x127xbf16>
    %553 = tpu.concatenate %551, %552 in 1 : vector<32x1xbf16>, vector<32x127xbf16> -> vector<32x128xbf16>
    %cst_196 = arith.constant 0.000000e+00 : bf16
    %554 = vector.broadcast %cst_196 : bf16 to vector<32x1xbf16>
    %555 = vector.extract_strided_slice %541 {offsets = [0, 1], sizes = [32, 127], strides = [1, 1]} : vector<32x128xbf16> to vector<32x127xbf16>
    %556 = tpu.concatenate %555, %554 in 1 : vector<32x127xbf16>, vector<32x1xbf16> -> vector<32x128xbf16>
    %cst_197 = arith.constant 0.000000e+00 : bf16
    %557 = vector.broadcast %cst_197 : bf16 to vector<32x5xbf16>
    %558 = vector.extract_strided_slice %541 {offsets = [0, 5], sizes = [32, 123], strides = [1, 1]} : vector<32x128xbf16> to vector<32x123xbf16>
    %559 = tpu.concatenate %558, %557 in 1 : vector<32x123xbf16>, vector<32x5xbf16> -> vector<32x128xbf16>
    %cst_198 = arith.constant 0.000000e+00 : bf16
    %560 = vector.broadcast %cst_198 : bf16 to vector<32x6xbf16>
    %561 = vector.extract_strided_slice %541 {offsets = [0, 6], sizes = [32, 122], strides = [1, 1]} : vector<32x128xbf16> to vector<32x122xbf16>
    %562 = tpu.concatenate %561, %560 in 1 : vector<32x122xbf16>, vector<32x6xbf16> -> vector<32x128xbf16>
    %cst_199 = arith.constant 0.000000e+00 : bf16
    %563 = vector.broadcast %cst_199 : bf16 to vector<32x7xbf16>
    %564 = vector.extract_strided_slice %541 {offsets = [0, 7], sizes = [32, 121], strides = [1, 1]} : vector<32x128xbf16> to vector<32x121xbf16>
    %565 = tpu.concatenate %564, %563 in 1 : vector<32x121xbf16>, vector<32x7xbf16> -> vector<32x128xbf16>
    %566 = tpu.concatenate %544, %547, %550, %553, %541, %556, %559, %562, %565 in 0 : vector<32x128xbf16>, vector<32x128xbf16>, vector<32x128xbf16>, vector<32x128xbf16>, vector<32x128xbf16>, vector<32x128xbf16>, vector<32x128xbf16>, vector<32x128xbf16>, vector<32x128xbf16> -> vector<288x128xbf16>
    %567 = tpu.concatenate %540, %566 in 1 : vector<288x128xbf16>, vector<288x128xbf16> -> vector<288x256xbf16>
    %c0_200 = arith.constant 0 : index
    %c0_201 = arith.constant 0 : index
    %568 = vector.load %arg20[%c0_200, %c0_201] : memref<12x288xbf16, #tpu.memory_space<vmem>>, vector<12x288xbf16>
    %cst_202 = arith.constant dense<0.000000e+00> : vector<12x256xf32>
    %569 = tpu.matmul %568, %567, %cst_202 {dimension_numbers = #tpu.dot_dimension_numbers<[1], [0], [0], [1], [0, 0, 1, 1], [], []>} : vector<12x288xbf16>, vector<288x256xbf16>, vector<12x256xf32> -> vector<12x256xf32>
    %c0_203 = arith.constant 0 : index
    %c0_204 = arith.constant 0 : index
    %570 = vector.load %arg21[%c0_203, %c0_204] : memref<12x1xf32, #tpu.memory_space<vmem>>, vector<12x1xf32>
    %571 = vector.broadcast %570 : vector<12x1xf32> to vector<12x256xf32>
    %572 = arith.addf %569, %571 : vector<12x256xf32>
    %573 = vector.broadcast %0 : vector<1x256xf32> to vector<12x256xf32>
    %574 = arith.mulf %572, %573 : vector<12x256xf32>
    %575 = arith.negf %315 : vector<12x256xf32>
    %576 = math.exp %575 : vector<12x256xf32>
    %cst_205 = arith.constant 1.000000e+00 : f32
    %577 = vector.broadcast %cst_205 : f32 to vector<12x256xf32>
    %578 = arith.addf %577, %576 : vector<12x256xf32>
    %579 = arith.divf %577, %578 : vector<12x256xf32>
    %c0_206 = arith.constant 0 : index
    %c0_207 = arith.constant 0 : index
    %c0_208 = arith.constant 0 : index
    %580 = vector.load %arg26[%c0_206, %c0_207, %c0_208] : memref<1x12x256xf32, #tpu.memory_space<vmem>>, vector<1x12x256xf32>
    %581 = vector.shape_cast %580 : vector<1x12x256xf32> to vector<12x256xf32>
    %582 = vector.shape_cast %579 : vector<12x256xf32> to vector<1x12x256xf32>
    tpu.vector_store %arg26[%c0_206, %c0_207, %c0_208], %582 {strides = array<i32>} : memref<1x12x256xf32, #tpu.memory_space<vmem>>, vector<1x12x256xf32>,
    %c0_209 = arith.constant 0 : index
    %c0_210 = arith.constant 0 : index
    %583 = vector.load %arg22[%c0_209, %c0_210] : memref<12x256xf32, #tpu.memory_space<vmem>>, vector<12x256xf32>
    %c0_211 = arith.constant 0 : index
    %c0_212 = arith.constant 0 : index
    %c0_213 = arith.constant 0 : index
    %584 = vector.load %arg24[%c0_211, %c0_212, %c0_213] : memref<4x12x12xf32, #tpu.memory_space<vmem>>, vector<1x12x12xf32>
    %585 = vector.shape_cast %584 : vector<1x12x12xf32> to vector<12x12xf32>
    %c1 = arith.constant 1 : index
    %c0_214 = arith.constant 0 : index
    %c0_215 = arith.constant 0 : index
    %586 = vector.load %arg24[%c1, %c0_214, %c0_215] : memref<4x12x12xf32, #tpu.memory_space<vmem>>, vector<1x12x12xf32>
    %587 = vector.shape_cast %586 : vector<1x12x12xf32> to vector<12x12xf32>
    %c2 = arith.constant 2 : index
    %c0_216 = arith.constant 0 : index
    %c0_217 = arith.constant 0 : index
    %588 = vector.load %arg24[%c2, %c0_216, %c0_217] : memref<4x12x12xf32, #tpu.memory_space<vmem>>, vector<1x12x12xf32>
    %589 = vector.shape_cast %588 : vector<1x12x12xf32> to vector<12x12xf32>
    %c3 = arith.constant 3 : index
    %c0_218 = arith.constant 0 : index
    %c0_219 = arith.constant 0 : index
    %590 = vector.load %arg24[%c3, %c0_218, %c0_219] : memref<4x12x12xf32, #tpu.memory_space<vmem>>, vector<1x12x12xf32>
    %591 = vector.shape_cast %590 : vector<1x12x12xf32> to vector<12x12xf32>
    %c0_220 = arith.constant 0 : index
    %c0_221 = arith.constant 0 : index
    %c0_222 = arith.constant 0 : index
    %592 = vector.load %arg25[%c0_220, %c0_221, %c0_222] : memref<2x12x1xf32, #tpu.memory_space<vmem>>, vector<1x12x1xf32>
    %593 = vector.shape_cast %592 : vector<1x12x1xf32> to vector<12x1xf32>
    %c1_223 = arith.constant 1 : index
    %c0_224 = arith.constant 0 : index
    %c0_225 = arith.constant 0 : index
    %594 = vector.load %arg25[%c1_223, %c0_224, %c0_225] : memref<2x12x1xf32, #tpu.memory_space<vmem>>, vector<1x12x1xf32>
    %595 = vector.shape_cast %594 : vector<1x12x1xf32> to vector<12x1xf32>
    %cst_226 = arith.constant dense<0.000000e+00> : vector<12x256xf32>
    %596 = tpu.matmul %585, %583, %cst_226 {dimension_numbers = #tpu.dot_dimension_numbers<[1], [0], [0], [1], [0, 0, 1, 1], [], []>} : vector<12x12xf32>, vector<12x256xf32>, vector<12x256xf32> -> vector<12x256xf32>
    %cst_227 = arith.constant dense<0.000000e+00> : vector<12x256xf32>
    %597 = tpu.matmul %587, %583, %cst_227 {dimension_numbers = #tpu.dot_dimension_numbers<[1], [0], [0], [1], [0, 0, 1, 1], [], []>} : vector<12x12xf32>, vector<12x256xf32>, vector<12x256xf32> -> vector<12x256xf32>
    %cst_228 = arith.constant dense<0.000000e+00> : vector<12x256xf32>
    %598 = tpu.matmul %589, %574, %cst_228 {dimension_numbers = #tpu.dot_dimension_numbers<[1], [0], [0], [1], [0, 0, 1, 1], [], []>} : vector<12x12xf32>, vector<12x256xf32>, vector<12x256xf32> -> vector<12x256xf32>
    %cst_229 = arith.constant dense<0.000000e+00> : vector<12x256xf32>
    %599 = tpu.matmul %591, %574, %cst_229 {dimension_numbers = #tpu.dot_dimension_numbers<[1], [0], [0], [1], [0, 0, 1, 1], [], []>} : vector<12x12xf32>, vector<12x256xf32>, vector<12x256xf32> -> vector<12x256xf32>
    %600 = arith.mulf %598, %597 : vector<12x256xf32>
    %601 = arith.addf %600, %596 : vector<12x256xf32>
    %cst_230 = arith.constant 4.13516665 : f32
    %602 = vector.broadcast %cst_230 : f32 to vector<12x256xf32>
    %603 = arith.minimumf %599, %602 : vector<12x256xf32>
    %604 = math.exp %603 : vector<12x256xf32>
    %605 = arith.mulf %604, %597 : vector<12x256xf32>
    %606 = vector.broadcast %593 : vector<12x1xf32> to vector<12x256xf32>
    %607 = arith.mulf %606, %605 : vector<12x256xf32>
    %608 = arith.addf %601, %607 : vector<12x256xf32>
    %cst_231 = arith.constant 0.000000e+00 : f32
    %609 = vector.broadcast %cst_231 : f32 to vector<12x256xf32>
    %610 = arith.maximumf %609, %608 : vector<12x256xf32>
    %611 = vector.broadcast %595 : vector<12x1xf32> to vector<12x256xf32>
    %612 = arith.minimumf %611, %610 : vector<12x256xf32>
    %c0_232 = arith.constant 0 : index
    %c0_233 = arith.constant 0 : index
    %c0_234 = arith.constant 0 : index
    %613 = vector.load %arg27[%c0_232, %c0_233, %c0_234] : memref<1x12x256xf32, #tpu.memory_space<vmem>>, vector<1x12x256xf32>
    %614 = vector.shape_cast %613 : vector<1x12x256xf32> to vector<12x256xf32>
    %615 = vector.shape_cast %612 : vector<12x256xf32> to vector<1x12x256xf32>
    tpu.vector_store %arg27[%c0_232, %c0_233, %c0_234], %615 {strides = array<i32>} : memref<1x12x256xf32, #tpu.memory_space<vmem>>, vector<1x12x256xf32>,
    return
  }
  func.func @transform_0(%arg0: i32) -> (i32, i32, i32) {
    %c0_i32 = arith.constant 0 : i32
    %c0_i32_0 = arith.constant 0 : i32
    %c0_i32_1 = arith.constant 0 : i32
    return %arg0, %c0_i32, %c0_i32_0 : i32, i32, i32
  }
  func.func @transform_1(%arg0: i32) -> (i32, i32) {
    %c0_i32 = arith.constant 0 : i32
    %c0_i32_0 = arith.constant 0 : i32
    %c0_i32_1 = arith.constant 0 : i32
    return %c0_i32, %c0_i32_0 : i32, i32
  }
  func.func @transform_2(%arg0: i32) -> (i32, i32) {
    %c0_i32 = arith.constant 0 : i32
    %c0_i32_0 = arith.constant 0 : i32
    %c0_i32_1 = arith.constant 0 : i32
    return %c0_i32, %c0_i32_0 : i32, i32
  }
  func.func @transform_3(%arg0: i32) -> (i32, i32) {
    %c0_i32 = arith.constant 0 : i32
    %c0_i32_0 = arith.constant 0 : i32
    %c0_i32_1 = arith.constant 0 : i32
    return %c0_i32, %c0_i32_0 : i32, i32
  }
  func.func @transform_4(%arg0: i32) -> (i32, i32) {
    %c0_i32 = arith.constant 0 : i32
    %c0_i32_0 = arith.constant 0 : i32
    %c0_i32_1 = arith.constant 0 : i32
    return %c0_i32, %c0_i32_0 : i32, i32
  }
  func.func @transform_5(%arg0: i32) -> (i32, i32) {
    %c0_i32 = arith.constant 0 : i32
    %c0_i32_0 = arith.constant 0 : i32
    %c0_i32_1 = arith.constant 0 : i32
    return %c0_i32, %c0_i32_0 : i32, i32
  }
  func.func @transform_6(%arg0: i32) -> (i32, i32) {
    %c0_i32 = arith.constant 0 : i32
    %c0_i32_0 = arith.constant 0 : i32
    %c0_i32_1 = arith.constant 0 : i32
    return %c0_i32, %c0_i32_0 : i32, i32
  }
  func.func @transform_7(%arg0: i32) -> (i32, i32) {
    %c0_i32 = arith.constant 0 : i32
    %c0_i32_0 = arith.constant 0 : i32
    %c0_i32_1 = arith.constant 0 : i32
    return %c0_i32, %c0_i32_0 : i32, i32
  }
  func.func @transform_8(%arg0: i32) -> (i32, i32) {
    %c0_i32 = arith.constant 0 : i32
    %c0_i32_0 = arith.constant 0 : i32
    %c0_i32_1 = arith.constant 0 : i32
    return %c0_i32, %c0_i32_0 : i32, i32
  }
  func.func @transform_9(%arg0: i32) -> (i32, i32) {
    %c0_i32 = arith.constant 0 : i32
    %c0_i32_0 = arith.constant 0 : i32
    %c0_i32_1 = arith.constant 0 : i32
    return %c0_i32, %c0_i32_0 : i32, i32
  }
  func.func @transform_10(%arg0: i32) -> (i32, i32) {
    %c0_i32 = arith.constant 0 : i32
    %c0_i32_0 = arith.constant 0 : i32
    %c0_i32_1 = arith.constant 0 : i32
    return %c0_i32, %c0_i32_0 : i32, i32
  }
  func.func @transform_11(%arg0: i32) -> (i32, i32) {
    %c0_i32 = arith.constant 0 : i32
    %c0_i32_0 = arith.constant 0 : i32
    %c0_i32_1 = arith.constant 0 : i32
    return %c0_i32, %c0_i32_0 : i32, i32
  }
  func.func @transform_12(%arg0: i32) -> (i32, i32) {
    %c0_i32 = arith.constant 0 : i32
    %c0_i32_0 = arith.constant 0 : i32
    %c0_i32_1 = arith.constant 0 : i32
    return %c0_i32, %c0_i32_0 : i32, i32
  }
  func.func @transform_13(%arg0: i32) -> (i32, i32) {
    %c0_i32 = arith.constant 0 : i32
    %c0_i32_0 = arith.constant 0 : i32
    %c0_i32_1 = arith.constant 0 : i32
    return %c0_i32, %c0_i32_0 : i32, i32
  }
  func.func @transform_14(%arg0: i32) -> (i32, i32) {
    %c0_i32 = arith.constant 0 : i32
    %c0_i32_0 = arith.constant 0 : i32
    %c0_i32_1 = arith.constant 0 : i32
    return %c0_i32, %c0_i32_0 : i32, i32
  }
  func.func @transform_15(%arg0: i32) -> (i32, i32) {
    %c0_i32 = arith.constant 0 : i32
    %c0_i32_0 = arith.constant 0 : i32
    %c0_i32_1 = arith.constant 0 : i32
    return %c0_i32, %c0_i32_0 : i32, i32
  }
  func.func @transform_16(%arg0: i32) -> (i32, i32) {
    %c0_i32 = arith.constant 0 : i32
    %c0_i32_0 = arith.constant 0 : i32
    %c0_i32_1 = arith.constant 0 : i32
    return %c0_i32, %c0_i32_0 : i32, i32
  }
  func.func @transform_17(%arg0: i32) -> (i32, i32) {
    %c0_i32 = arith.constant 0 : i32
    %c0_i32_0 = arith.constant 0 : i32
    %c0_i32_1 = arith.constant 0 : i32
    return %c0_i32, %c0_i32_0 : i32, i32
  }
  func.func @transform_18(%arg0: i32) -> (i32, i32) {
    %c0_i32 = arith.constant 0 : i32
    %c0_i32_0 = arith.constant 0 : i32
    %c0_i32_1 = arith.constant 0 : i32
    return %c0_i32, %c0_i32_0 : i32, i32
  }
  func.func @transform_19(%arg0: i32) -> (i32, i32) {
    %c0_i32 = arith.constant 0 : i32
    %c0_i32_0 = arith.constant 0 : i32
    %c0_i32_1 = arith.constant 0 : i32
    return %c0_i32, %c0_i32_0 : i32, i32
  }
  func.func @transform_20(%arg0: i32) -> (i32, i32) {
    %c0_i32 = arith.constant 0 : i32
    %c0_i32_0 = arith.constant 0 : i32
    %c0_i32_1 = arith.constant 0 : i32
    return %c0_i32, %c0_i32_0 : i32, i32
  }
  func.func @transform_21(%arg0: i32) -> (i32, i32) {
    %c0_i32 = arith.constant 0 : i32
    %c0_i32_0 = arith.constant 0 : i32
    %c0_i32_1 = arith.constant 0 : i32
    return %c0_i32, %c0_i32_0 : i32, i32
  }
  func.func @transform_22(%arg0: i32) -> (i32, i32) {
    %c0_i32 = arith.constant 0 : i32
    %c0_i32_0 = arith.constant 0 : i32
    %c0_i32_1 = arith.constant 0 : i32
    return %c0_i32, %c0_i32_0 : i32, i32
  }
  func.func @transform_23(%arg0: i32) -> (i32, i32, i32) {
    %c0_i32 = arith.constant 0 : i32
    %c0_i32_0 = arith.constant 0 : i32
    %c0_i32_1 = arith.constant 0 : i32
    %c0_i32_2 = arith.constant 0 : i32
    return %c0_i32, %c0_i32_0, %c0_i32_1 : i32, i32, i32
  }
  func.func @transform_24(%arg0: i32) -> (i32, i32, i32) {
    %c0_i32 = arith.constant 0 : i32
    %c0_i32_0 = arith.constant 0 : i32
    %c0_i32_1 = arith.constant 0 : i32
    %c0_i32_2 = arith.constant 0 : i32
    return %c0_i32, %c0_i32_0, %c0_i32_1 : i32, i32, i32
  }
  func.func @transform_25(%arg0: i32) -> (i32, i32, i32) {
    %c0_i32 = arith.constant 0 : i32
    %c0_i32_0 = arith.constant 0 : i32
    %c0_i32_1 = arith.constant 0 : i32
    return %arg0, %c0_i32, %c0_i32_0 : i32, i32, i32
  }
  func.func @transform_26(%arg0: i32) -> (i32, i32, i32) {
    %c0_i32 = arith.constant 0 : i32
    %c0_i32_0 = arith.constant 0 : i32
    %c0_i32_1 = arith.constant 0 : i32
    return %arg0, %c0_i32, %c0_i32_0 : i32, i32, i32
  }
}

</mosaic_0001>

<bundles_post_ra>
// kernel: tpu_custom_call.1
= control target key start
LH: loop header
LB: loop body
LE: loop exit
PB: predicated region body
PF: predicated region fallthrough
CT: control target
= control target key end

     0   :  { %s7607_s0 = inlined_call_operand.vmem [shape: f32[2,32,256], index: 0, kind: input, shape index: {}]   ;;  %s7608_s1 = inlined_call_operand.vmem [shape: bf16[32,288], index: 1, kind: input, shape index: {}]   ;;  %s7609_s2 = inlined_call_operand.vmem [shape: f32[32,1], index: 2, kind: input, shape index: {}]   ;;  %s7610_s3 = inlined_call_operand.vmem [shape: bf16[32,288], index: 3, kind: input, shape index: {}]   ;;  %s7611_s4 = inlined_call_operand.vmem [shape: f32[32,1], index: 4, kind: input, shape index: {}]   ;;  %s7612_s5 = inlined_call_operand.vmem [shape: bf16[32,288], index: 5, kind: input, shape index: {}]   ;;  %s7613_s6 = inlined_call_operand.vmem [shape: f32[32,1], index: 6, kind: input, shape index: {}]   ;;  %s7614_s7 = inlined_call_operand.vmem [shape: bf16[32,288], index: 7, kind: input, shape index: {}]   ;;  %s7615_s8 = inlined_call_operand.vmem [shape: f32[32,1], index: 8, kind: input, shape index: {}]   ;;  %s7616_s9 = inlined_call_operand.hbm [shape: bf16[12,288], index: 9, kind: input, shape index: {}]   ;;  %s7617_s10 = inlined_call_operand.vmem [shape: f32[12,1], index: 10, kind: input, shape index: {}]   ;;  %s7618_s11 = inlined_call_operand.vmem [shape: bf16[32,288], index: 11, kind: input, shape index: {}]   ;;  %s7619_s12 = inlined_call_operand.vmem [shape: f32[32,1], index: 12, kind: input, shape index: {}]   ;;  %s7620_s13 = inlined_call_operand.vmem [shape: bf16[32,288], index: 13, kind: input, shape index: {}]   ;;  %s7621_s14 = inlined_call_operand.vmem [shape: f32[32,1], index: 14, kind: input, shape index: {}]   ;;  %s7622_s15 = inlined_call_operand.vmem [shape: bf16[32,288], index: 15, kind: input, shape index: {}]   ;;  %s7623_s16 = inlined_call_operand.vmem [shape: f32[32,1], index: 16, kind: input, shape index: {}]   ;;  %s7624_s17 = inlined_call_operand.hbm [shape: bf16[32,288], index: 17, kind: input, shape index: {}]   ;;  %s7625_s18 = inlined_call_operand.vmem [shape: f32[32,1], index: 18, kind: input, shape index: {}]   ;;  %s7626_s19 = inlined_call_operand.hbm [shape: bf16[12,288], index: 19, kind: input, shape index: {}]   ;;  %s7627_s20 = inlined_call_operand.vmem [shape: f32[12,1], index: 20, kind: input, shape index: {}]   ;;  %s7628_s21 = inlined_call_operand.hbm [shape: f32[12,256], index: 21, kind: input, shape index: {}]   ;;  %s7629_s22 = inlined_call_operand.vmem [shape: f32[1,256], index: 22, kind: input, shape index: {}]   ;;  %s7630_s23 = inlined_call_operand.vmem [shape: f32[4,12,12], index: 23, kind: input, shape index: {}]   ;;  %s7631_s24 = inlined_call_operand.vmem [shape: f32[2,12,1], index: 24, kind: input, shape index: {}]   ;;  %s7632_s25 = inlined_call_operand.vmem [shape: f32[2,12,256], index: 25, kind: output, shape index: {0}]   ;;  %s7633_s26 = inlined_call_operand.vmem [shape: f32[2,12,256], index: 26, kind: output, shape index: {1}]  }
   0x1   :  { %7703 = sst [smem:[#allocation32_spill]] %s7607_s0 }
   0x2   :  { %7704 = sst [smem:[#allocation33_spill]] %s7608_s1 }
   0x3   :  { %7705 = sst [smem:[#allocation34_spill]] %s7609_s2 }
   0x4   :  { %7706 = sst [smem:[#allocation35_spill]] %s7610_s3 }
   0x5   :  { %7707 = sst [smem:[#allocation36_spill]] %s7611_s4 }
   0x6   :  { %7708 = sst [smem:[#allocation37_spill]] %s7612_s5 }
   0x7   :  { %7709 = sst [smem:[#allocation38_spill]] %s7613_s6 }
   0x8   :  { %7710 = sst [smem:[#allocation39_spill]] %s7614_s7 }
   0x9   :  { %7711 = sst [smem:[#allocation40_spill]] %s7615_s8 }
   0xa   :  { %7712 = sst [smem:[#allocation41_spill]] %s7616_s9 }
   0xb   :  { %7713 = sst [smem:[#allocation42_spill]] %s7617_s10 }
   0xc   :  { %7714 = sst [smem:[#allocation43_spill]] %s7624_s17 }
   0xd   :  { %7715 = sst [smem:[#allocation44_spill]] %s7626_s19 }
   0xe   :  { %7716 = sst [smem:[#allocation45_spill]] %s7627_s20 }
   0xf   :  { %7717 = sst [smem:[#allocation46_spill]] %s7628_s21 }
  0x10   :  { %7718 = sst [smem:[#allocation47_spill]] %s7629_s22 }
  0x11   :  { %7719 = sst [smem:[#allocation48_spill]] %s7630_s23 }
  0x12   :  { %7720 = sst [smem:[#allocation49_spill]] %s7631_s24 }
  0x13   :  { %7721 = sst [smem:[#allocation50_spill]] %s7632_s25 }
  0x14   :  { %7722 = sst [smem:[#allocation51_spill]] %s7633_s26 }
  0x15   :  { %32 = vsyncpa [#allocation3], 0 }
  0x16   :  { %33 = vsyncpa [#allocation5], 0 }
  0x17   :  { %34 = vsyncpa [#allocation8], 0  ;;  %s5742_s27 = smov 0  }
  0x18 LB: > { %7723 = sst [smem:[#allocation12_spill]] %s5581_s27  ;;  %s5748_s3 = sadd.s32 4294967295, %s5581_s27   ;;  %s5581_s27 = sphi %s5742_s27, %s40_s27  }
  0x19   : > { %p4770_p0 = scmp.ge.s32.totalorder %s5581_s27, 1  ;;  %p627_p1 = scmp.lt.s32.totalorder %s5581_s27, 3 }
  0x1a   : > { %p5321_p2 = scmp.eq.s32.totalorder %s5748_s3, 0  ;;  %s5583_s28 = smov [#allocation4]  }
  0x1b   : > { %p5753_p3 = pnand %p4770_p0, %p627_p1  ;;  %s697_s8 = sshll.u32 %s5583_s28, 4  ;;  %s698_s8 = int_to_ptr.vmem [resolvable:$true] %s697_s8 }
  0x1c   : > { %s5584_s4 = smov [#allocation2]   ;;  %s5585_s9 = smov [#allocation6]  }
  0x1d   : > { %p5308_p4 = pneg %p5753_p3  ;;  %s663_s29 = sshll.u32 %s5584_s4, 4  ;;  %s5759_s29 = int_to_ptr.vmem [resolvable:$true] %s663_s29 }
  0x1e   : > { %s713_s30 = sshll.u32 %s5585_s9, 4  ;;  %s5586_s2 = smov [#allocation7]   ;;  %s5767_s30 = int_to_ptr.vmem [resolvable:$true] %s713_s30 }
  0x1f   : > { %p5763_p5 = pnand %p5321_p2, %p5308_p4  ;;  %s5769_s5 = sshll.u32 %s5586_s2, 4  ;;  %s730_s5 = int_to_ptr.vmem [resolvable:$true] %s5769_s5 }
  0x20   : > { %s5470_s10 = scalar_lea.vmem %s698_s8, 768  ;;  %p5478_p10 = scmp.lt.s32.totalorder %s698_s8, %s698_s8 }
  0x21   : > { %p5461_p6 = pneg %p5763_p5  ;;  %p5471_p7 = scmp.ne.s32.totalorder %s698_s8, %s5470_s10 }
  0x22   : > { %p5479_p11 = scmp.lt.s32.totalorder %s5470_s10, %s5470_s10 }
  0x23   : > { %p5473_p8 = pnand %p5471_p7, %p5461_p6 }
  0x24   : > { %p5480_p12 = por %p5479_p11, %p5478_p10 }
  0x25   : > { %p5474_p9 = pneg %p5473_p8 }
  0x27   : > { %p5481_p13 = pnand %p5480_p12, %p5474_p9 }
  0x29   : > { %5484 = shalt.err (!%p5481_p13)
}
  0x2a   : > { %s5587_s6 = smov 192   ;;  %s5588_s1 = smov 12  }
  0x2b   : > { %s7726_s17 = sld [smem:[#allocation43_spill]]  ;;  %s5496_s9 = scalar_lea.vmem %s5759_s29, 384 }
  0x2c   : > { %p5497_p0 = scmp.ne.s32.totalorder %s5759_s29, %s5496_s9  ;;  %p5504_p7 = scmp.lt.s32.totalorder %s5759_s29, %s5759_s29 }
  0x2d   : > { %p5505_p8 = scmp.lt.s32.totalorder %s5496_s9, %s5496_s9 }
  0x2e   : > { %p5499_p1 = pnand %p5497_p0, %p5461_p6 }
  0x2f   : > { %p5506_p9 = por %p5505_p8, %p5504_p7 }
  0x30   : > { %p5500_p4 = pneg %p5499_p1 }
  0x31   : > { %5314 = dma.hbm_to_vmem [thread:$0]  (!%p5763_p5), %s7726_s17, 768, %s698_s8, [#allocation5], %s5587_s6, %s5587_s6, %s5588_s1  }
  0x32   : > { %p5507_p10 = pnand %p5506_p9, %p5500_p4 }
  0x34   : > { %5510 = shalt.err (!%p5507_p10)
}
  0x35   : > { %s7727_s27 = sld [smem:[#allocation41_spill]]  ;;  %s5522_s8 = scalar_lea.vmem %s5767_s30, 384 }
  0x36   : > { %p5523_p11 = scmp.ne.s32.totalorder %s5767_s30, %s5522_s8  ;;  %p5530_p0 = scmp.lt.s32.totalorder %s5767_s30, %s5767_s30 }
  0x37   : > { %p5531_p1 = scmp.lt.s32.totalorder %s5522_s8, %s5522_s8 }
  0x38   : > { %p5525_p12 = pnand %p5523_p11, %p5461_p6 }
  0x39   : > { %p5532_p4 = por %p5531_p1, %p5530_p0 }
  0x3a   : > { %p5526_p13 = pneg %p5525_p12 }
  0x3b   : > { %5311 = dma.hbm_to_vmem [thread:$0]  (!%p5763_p5), %s7727_s27, 384, %s5759_s29, [#allocation3], %s5587_s6, %s5587_s6, %s5588_s1  }
  0x3c   : > { %p5533_p7 = pnand %p5532_p4, %p5526_p13 }
  0x3e   : > { %5536 = shalt.err (!%p5533_p7)
}
  0x3f   : > { %s7728_s19 = sld [smem:[#allocation44_spill]]  ;;  %s5548_s27 = scalar_lea.vmem %s730_s5, 512 }
  0x40   : > { %p5549_p8 = scmp.ne.s32.totalorder %s730_s5, %s5548_s27  ;;  %p5556_p11 = scmp.lt.s32.totalorder %s730_s5, %s730_s5 }
  0x41   : > { %p5557_p12 = scmp.lt.s32.totalorder %s5548_s27, %s5548_s27 }
  0x42   : > { %p5551_p9 = pnand %p5549_p8, %p5461_p6 }
  0x43   : > { %p5558_p13 = por %p5557_p12, %p5556_p11 }
  0x44   : > { %p5552_p10 = pneg %p5551_p9 }
  0x45   : > { %5317 = dma.hbm_to_vmem [thread:$0]  (!%p5763_p5), %s7728_s19, 384, %s5767_s30, [#allocation5], %s5587_s6, %s5587_s6, %s5588_s1  }
  0x46   : > { %p5559_p0 = pnand %p5558_p13, %p5552_p10 }
  0x48   : > { %5562 = shalt.err (!%p5559_p0)
}
  0x49   : > { %s5589_s29 = smov 256   ;;  %s5590_s9 = smov 16  }
  0x4a   : > { %s7729_s21 = sld [smem:[#allocation46_spill]] }
  0x4c   : > { %762 = sbr.rel (%p5753_p3) target bundleno = 3895 (0xf37), region = 120 }
  0x50   : > { %5320 = dma.hbm_to_vmem [thread:$0]  (!%p5763_p5), %s7729_s21, 512, %s730_s5, [#allocation8], %s5589_s29, %s5589_s29, %s5590_s9  }
  0x51   : > { %5568 = dma.done.wait (%p5321_p2), [#allocation3], 384  }
  0x52   : > { %5570 = vsyncadd (%p5321_p2), [#allocation3], 4294966912 }
  0x53   : > { %5572 = dma.done.wait (%p5321_p2), [#allocation5], 1152  }
  0x54   : > { %5574 = vsyncadd (%p5321_p2), [#allocation5], 4294966144 }
  0x55   : > { %5576 = dma.done.wait (%p5321_p2), [#allocation8], 512  }
  0x56   : > { %5578 = vsyncadd (%p5321_p2), [#allocation8], 4294966784  ;;  %p849_p3 = scmp.lt.s32.totalorder %s5748_s3, 1  ;;  %s7731_s5 = sld [smem:[#allocation32_spill]]  ;;  %v7664_v12 = vmov 0   ;;  %vm918_vm0 = vcmask 7168  }
  0x57   : > { %s7681_s1 = smov 1   ;;  %s7662_s8 = smov 5   ;;  %1211 = vmatprep.mubr.bf16.mxu1 %v7664_v12  ;;  %5362 = vset.pattern.permute.xlu1 %v7664_v12  ;;  %vm5928_vm1 = vmneg %vm918_vm0  ;;  %vm997_vm2 = vcmask 39936   ;;  %vm907_vm4 = vcmask 72704   ;;  %vm986_vm6 = vcmask 48128   ;;  %vm896_vm8 = vcmask 80896  }
  0x58   : > { %s7815_s3 = smov (!%p849_p3, %s5748_s3), 1  ;;  %s7679_s28 = smov 9   ;;  %5361 = vset.pattern.permute.xlu0 %v7664_v12  ;;  %vm5949_vm3 = vmneg %vm997_vm2  ;;  %vm975_vm10 = vcmask 56320   ;;  %vm884_vm12 = vcmask 89088   ;;  %vm1039_vm14 = vcmask 998400   ;;  %vm951_vm15 = vcmask 965632  }
  0x59   : > { %7730 = sst [smem:[#allocation13_spill]] %s7815_s3  ;;  %s5289_s7 = sshll.u32 %s7815_s3, 6  ;;  %vm5963_vm5 = vmneg %vm907_vm4  ;;  %vm1028_vm0 = vcmask 1006592   ;;  %vm940_vm2 = vcmask 973824   ;;  %vm929_vm4 = vcmask 1039360  }
  0x5a   : > { %s7658_s4 = smov 6   ;;  %s7660_s27 = smov 10   ;;  %vm5977_vm7 = vmneg %vm986_vm6  ;;  %vm962_vm6 = vcmask 957440  }
  0x5b   : > { %s7654_s29 = smov 7   ;;  %s7656_s9 = smov 11   ;;  %vm5991_vm9 = vmneg %vm896_vm8  ;;  %vm1050_vm8 = vcmask 990208  }
  0x5c   : > { %s853_s6 = scalar_lea.vmem %s7731_s5, %s5289_s7  ;;  %s7648_s2 = smov 118   ;;  %vm6005_vm11 = vmneg %vm975_vm10  ;;  %vm1119_vm10 = vcmask 261120  }
  0x5d   : > { %v871_v0 = vld [vmem:[%s853_s6 + $0x28] sm:$0xff]  ;;  %v873_v1 = vld [vmem:[%s853_s6 + $0x38] sm:$0xff]  ;;  %v870_v5 = vld [vmem:[%s853_s6 + $0x20] sm:$0xff]  ;;  %s7650_s10 = smov 122   ;;  %s7644_s7 = smov 119  }
  0x5e   : > { %v867_v2 = vld [vmem:[%s853_s6 + $0x8] sm:$0xff]  ;;  %v5838_v3 = vpack.c.bf16 %v873_v1, %v871_v0  ;;  %v869_v4 = vld [vmem:[%s853_s6 + $0x18] sm:$0xff]  ;;  %v872_v6 = vld [vmem:[%s853_s6 + $0x30] sm:$0xff]  ;;  %s7646_s0 = smov 123   ;;  %s7652_s30 = smov 127  }
  0x5f   : > { %v5840_v7 = vpack.c.bf16 %v869_v4, %v867_v2  ;;  %v866_v8 = vld [vmem:[%s853_s6] sm:$0xff]  ;;  %v868_v9 = vld [vmem:[%s853_s6 + $0x10] sm:$0xff]  ;;  %v5844_v10 = vpack.c.bf16 %v872_v6, %v870_v5  ;;  %vm6019_vm13 = vmneg %vm884_vm12  ;;  %s7766_s22 = sld [smem:[#allocation47_spill]]  ;;  %s7769_s5 = smov 6  }
  0x60   : > { %7732 = vst [vmem:[#allocation14_spill] sm:$0xff] %v5838_v3  ;;  %1006 = vrot.lane.b32.xlu0 %v5838_v3, %s7681_s1  ;;  %v5848_v11 = vpack.c.bf16 %v868_v9, %v866_v8  ;;  %s7770_s6 = smov 11   ;;  %s7779_s17 = smov 117  }
  0x61   : > { %7733 = vst [vmem:[#allocation15_spill] sm:$0xff] %v5840_v7  ;;  %7734 = vst [vmem:[#allocation16_spill] sm:$0xff] %v5844_v10  ;;  %1004 = vrot.lane.b32.xlu1 %v5840_v7, %s7681_s1  ;;  %s7780_s19 = sld [smem:[#allocation36_spill]]  ;;  %s7782_s23 = smov 1  }
  0x62   : > { %7735 = vst [vmem:[#allocation17_spill] sm:$0xff] %v5848_v11  ;;  %s7783_s25 = smov 9   ;;  %s7787_s3 = sld [smem:[#allocation40_spill]] }
  0x63   : > { %s7809_s26 = sld [smem:[#allocation13_spill]] }
  0x64   : > { %916 = vrot.lane.b32.xlu0 %v5844_v10, %s7681_s1 }
  0x65   : > { %914 = vrot.lane.b32.xlu1 %v5848_v11, %s7681_s1 }
  0x68   : > { %995 = vrot.lane.b32.xlu0 %v5838_v3, %s7662_s8 }
  0x69   : > { %905 = vrot.lane.b32.xlu1 %v5844_v10, %s7679_s28 }
  0x6c   : > { %993 = vrot.lane.b32.xlu0 %v5840_v7, %s7662_s8  ;;  %s7771_s8 = smov 7  }
  0x6d   : > { %903 = vrot.lane.b32.xlu1 %v5848_v11, %s7679_s28 }
  0x70   : > { %984 = vrot.lane.b32.xlu0 %v5838_v3, %s7658_s4 }
  0x71   : > { %894 = vrot.lane.b32.xlu1 %v5844_v10, %s7660_s27 }
  0x74   : > { %982 = vrot.lane.b32.xlu0 %v5840_v7, %s7658_s4  ;;  %s7772_s4 = smov 122  }
  0x75   : > { %892 = vrot.lane.b32.xlu1 %v5848_v11, %s7660_s27  ;;  %s7773_s27 = smov 118  }
  0x78   : > { %973 = vrot.lane.b32.xlu0 %v5838_v3, %s7654_s29 }
  0x79   : > { %882 = vrot.lane.b32.xlu1 %v5844_v10, %s7656_s9 }
  0x7c   : > { %971 = vrot.lane.b32.xlu0 %v5840_v7, %s7654_s29  ;;  %s7774_s29 = smov 123  }
  0x7d   : > { %880 = vrot.lane.b32.xlu1 %v5848_v11, %s7656_s9  ;;  %s7767_s9 = smov 5  }
  0x80   : > { %949 = vrot.lane.b32.xlu0 %v5844_v10, %s7648_s2 }
  0x81   : > { %1037 = vrot.lane.b32.xlu1 %v5838_v3, %s7650_s10 }
  0x84   : > { %947 = vrot.lane.b32.xlu0 %v5848_v11, %s7648_s2  ;;  %s7685_s2 = smov 121  }
  0x85   : > { %1035 = vrot.lane.b32.xlu1 %v5840_v7, %s7650_s10  ;;  %s7737_s10 = sld [smem:[#allocation34_spill]] }
  0x88   : > { %938 = vrot.lane.b32.xlu0 %v5844_v10, %s7644_s7 }
  0x89   : > { %1026 = vrot.lane.b32.xlu1 %v5838_v3, %s7646_s0 }
  0x8b   : > { %v1068_v14 = vld [vmem:[%s7737_s10 + $0x18] sm:$0xff]  ;;  %v1067_v15 = vld [vmem:[%s7737_s10 + $0x10] sm:$0xff]  ;;  %v1066_v16 = vld [vmem:[%s7737_s10 + $0x8] sm:$0xff] }
  0x8c   : > { %936 = vrot.lane.b32.xlu0 %v5848_v11, %s7644_s7  ;;  %s7736_s7 = sld [smem:[#allocation33_spill]]  ;;  %v1065_v17 = vld [vmem:[%s7737_s10] sm:$0xff]  ;;  %s7778_s10 = smov 121  }
  0x8d   : > { %1024 = vrot.lane.b32.xlu1 %v5840_v7, %s7646_s0  ;;  %s7683_s0 = smov 117  }
  0x90   : > { %927 = vrot.lane.b32.xlu0 %v5844_v10, %s7652_s30 }
  0x91   : > { %1016 = vrot.lane.b32.xlu1 %v5838_v3, %s7652_s30 }
  0x92   : > { %v5366_v13 = vld [vmem:[%s7736_s7 + $0x4] ss:$12 sps:$4 sm:$0xff]   ;;  %v5363_v1 = vld [vmem:[%s7736_s7 + $0x8] ss:$12 sps:$4 sm:$0xff]   ;;  %v5364_v2 = vld [vmem:[%s7736_s7] ss:$12 sps:$4 sm:$0xff]  }
  0x93   : > { %1158 = vmatprep.mubr.bf16.mxu0 %v5366_v13  ;;  %v5368_v4 = vld [vmem:[%s7736_s7 + $0x1c] ss:$12 sps:$4 sm:$0xff]   ;;  %v5367_v5 = vld [vmem:[%s7736_s7 + $0x20] ss:$12 sps:$4 sm:$0xff]   ;;  %v5370_v6 = vld [vmem:[%s7736_s7 + $0x18] ss:$12 sps:$4 sm:$0xff]  }
  0x94   : > { %925 = vrot.lane.b32.xlu0 %v5848_v11, %s7652_s30  ;;  %s7777_s7 = sld [smem:[#allocation35_spill]] }
  0x95   : > { %1014 = vrot.lane.b32.xlu1 %v5840_v7, %s7652_s30  ;;  %s7768_s30 = smov 10  }
  0x98   : > { %960 = vrot.lane.b32.xlu0 %v5844_v10, %s7683_s0 }
  0x99   : > { %1048 = vrot.lane.b32.xlu1 %v5838_v3, %s7685_s2 }
  0x9c   : > { %958 = vrot.lane.b32.xlu0 %v5848_v11, %s7683_s0  ;;  %s7786_s0 = sld [smem:[#allocation39_spill]] }
  0x9d   : > { %1046 = vrot.lane.b32.xlu1 %v5840_v7, %s7685_s2  ;;  %s7784_s2 = sld [smem:[#allocation37_spill]] }
  0xa0   : > { %1081 = vperm.xlu0 %5361, %v1067_v15  }
  0xa1   : > { %1086 = vperm.xlu1 %5362, %v1068_v14  }
  0xa4   : > { %1076 = vperm.xlu0 %5361, %v1066_v16  }
  0xa5   : > { %1071 = vperm.xlu1 %5362, %v1065_v17  }
  0xd2   : > { %v5932_v19 = vpop.permute.xlu0 %1006 }
  0xd3   : > { %v5934_v20 = vpop.permute.xlu1 %1004  ;;  %4794 = vmatprep.subr.msk.bf16.mxu0 %vm5928_vm1, %v5932_v19 }
  0xd6   : > { %v5939_v21 = vpop.permute.xlu0 %916 }
  0xd7   : > { %v5941_v22 = vpop.permute.xlu1 %914  ;;  %4796 = vmatpush1.bf16.msk.msra.mxu0 %vm5928_vm1, %v5939_v21 }
  0xd8   : > { %4798 = vmatprep.subr.msk.bf16.mxu0 %vm5928_vm1, %v5934_v20 }
  0xda   : > { %v5953_v24 = vpop.permute.xlu0 %995 }
  0xdb   : > { %v5955_v25 = vpop.permute.xlu1 %905  ;;  %4800 = vmatpush1.bf16.msk.msra.mxu0 %vm5928_vm1, %v5941_v22 }
  0xdc   : > { %4802 = vmatprep.subr.msk.bf16.mxu0 %vm5949_vm3, %v5953_v24 }
  0xde   : > { %v5967_v27 = vpop.permute.xlu0 %993 }
  0xdf   : > { %v5969_v28 = vpop.permute.xlu1 %903  ;;  %4804 = vmatpush1.bf16.msk.msra.mxu0 %vm5963_vm5, %v5955_v25 }
  0xe0   : > { %4806 = vmatprep.subr.msk.bf16.mxu0 %vm5949_vm3, %v5967_v27 }
  0xe2   : > { %v5981_v30 = vpop.permute.xlu0 %984 }
  0xe3   : > { %v5983_v31 = vpop.permute.xlu1 %894  ;;  %4808 = vmatpush1.bf16.msk.msra.mxu0 %vm5963_vm5, %v5969_v28 }
  0xe4   : > { %4810 = vmatprep.subr.msk.bf16.mxu0 %vm5977_vm7, %v5981_v30 }
  0xe6   : > { %v5995_v33 = vpop.permute.xlu0 %982 }
  0xe7   : > { %v5997_v34 = vpop.permute.xlu1 %892  ;;  %4812 = vmatpush1.bf16.msk.msra.mxu0 %vm5991_vm9, %v5983_v31 }
  0xe8   : > { %4814 = vmatprep.subr.msk.bf16.mxu0 %vm5977_vm7, %v5995_v33 }
  0xea   : > { %v6009_v36 = vpop.permute.xlu0 %973 }
  0xeb   : > { %v6011_v37 = vpop.permute.xlu1 %882  ;;  %4816 = vmatpush1.bf16.msk.msra.mxu0 %vm5991_vm9, %v5997_v34 }
  0xec   : > { %4818 = vmatprep.subr.msk.bf16.mxu0 %vm6005_vm11, %v6009_v36 }
  0xee   : > { %v6023_v39 = vpop.permute.xlu0 %971 }
  0xef   : > { %v6025_v40 = vpop.permute.xlu1 %880  ;;  %4820 = vmatpush1.bf16.msk.msra.mxu0 %vm6019_vm13, %v6011_v37 }
  0xf0   : > { %4822 = vmatprep.subr.msk.bf16.mxu0 %vm6005_vm11, %v6023_v39 }
  0xf2   : > { %v950_v41 = vpop.permute.xlu0 %949 }
  0xf3   : > { %v6033_v42 = vpop.permute.xlu1 %1037  ;;  %4824 = vmatpush1.bf16.msk.msra.mxu0 %vm6019_vm13, %v6025_v40  ;;  %v6041_v43 = vsel %vm951_vm15, %v950_v41, 0 }
  0xf4   : > { %4825 = vmatprep.subr.msk.bf16.mxu0 %vm1039_vm14, %v6033_v42 }
  0xf6   : > { %v948_v44 = vpop.permute.xlu0 %947 }
  0xf7   : > { %v6043_v45 = vpop.permute.xlu1 %1035  ;;  %1143 = vmatpush2.bf16.msra.mxu0 %v6041_v43  ;;  %v6049_v46 = vsel %vm951_vm15, %v948_v44, 0 }
  0xf8   : > { %7752 = vst [vmem:[#allocation18_spill] sm:$0xff] %v6043_v45  ;;  %4826 = vmatprep.subr.msk.bf16.mxu0 %vm1039_vm14, %v6043_v45  ;;  %7753 = vst [vmem:[#allocation19_spill] sm:$0xff] %v6049_v46 }
  0xfa   : > { %v939_v47 = vpop.permute.xlu0 %938 }
  0xfb   : > { %v6051_v48 = vpop.permute.xlu1 %1026  ;;  %1145 = vmatpush2.bf16.msra.mxu0 %v6049_v46  ;;  %v6057_v49 = vsel %vm940_vm2, %v939_v47, 0  ;;  %v1241_v47 = vlaneseq }
  0xfc   : > { %7754 = vst [vmem:[#allocation20_spill] sm:$0xff] %v6051_v48  ;;  %4827 = vmatprep.subr.msk.bf16.mxu0 %vm1028_vm0, %v6051_v48  ;;  %7755 = vst [vmem:[#allocation21_spill] sm:$0xff] %v6057_v49 }
  0xfe   : > { %v937_v50 = vpop.permute.xlu0 %936 }
  0xff   : > { %v6059_v51 = vpop.permute.xlu1 %1024  ;;  %1147 = vmatpush2.bf16.msra.mxu0 %v6057_v49  ;;  %v6065_v52 = vsel %vm940_vm2, %v937_v50, 0 }
 0x100   : > { %7756 = vst [vmem:[#allocation22_spill] sm:$0xff] %v6059_v51  ;;  %4828 = vmatprep.subr.msk.bf16.mxu0 %vm1028_vm0, %v6059_v51  ;;  %7757 = vst [vmem:[#allocation23_spill] sm:$0xff] %v6065_v52 }
 0x102   : > { %v928_v53 = vpop.permute.xlu0 %927 }
 0x103   : > { %v6067_v54 = vpop.permute.xlu1 %1016  ;;  %1149 = vmatpush2.bf16.msra.mxu0 %v6065_v52  ;;  %v6073_v55 = vsel %vm929_vm4, %v928_v53, 0 }
 0x104   : > { %7758 = vst [vmem:[#allocation24_spill] sm:$0xff] %v6067_v54  ;;  %4829 = vmatprep.subr.msk.bf16.mxu0 %vm929_vm4, %v6067_v54  ;;  %7759 = vst [vmem:[#allocation25_spill] sm:$0xff] %v6073_v55  ;;  %v865_v54 = vld [vmem:[%s7766_s22] sm:$0x3]  ;;  %s7785_s22 = sld [smem:[#allocation38_spill]] }
 0x106   : > { %v926_v56 = vpop.permute.xlu0 %925 }
 0x107   : > { %v6075_v57 = vpop.permute.xlu1 %1014  ;;  %1151 = vmatpush2.bf16.msra.mxu0 %v6073_v55  ;;  %v6081_v58 = vsel %vm929_vm4, %v926_v56, 0 }
 0x108   : > { %7760 = vst [vmem:[#allocation26_spill] sm:$0xff] %v6075_v57  ;;  %4830 = vmatprep.subr.msk.bf16.mxu0 %vm929_vm4, %v6075_v57  ;;  %7761 = vst [vmem:[#allocation27_spill] sm:$0xff] %v6081_v58 }
 0x10a   : > { %v961_v59 = vpop.permute.xlu0 %960 }
 0x10b   : > { %v6083_v60 = vpop.permute.xlu1 %1048  ;;  %1153 = vmatpush2.bf16.msra.mxu0 %v6081_v58  ;;  %v6087_v61 = vsel %vm962_vm6, %v961_v59, 0 }
 0x10c   : > { %7762 = vst [vmem:[#allocation28_spill] sm:$0xff] %v6083_v60  ;;  %7763 = vst [vmem:[#allocation29_spill] sm:$0xff] %v6087_v61  ;;  %4831 = vmatprep.subr.msk.bf16.mxu1 %vm1050_vm8, %v6083_v60  ;;  %1154 = vmatprep.subr.bf16.mxu0 %v5838_v3 }
 0x10d   : > { %1192 = vmatpush1.bf16.msra.mxu1 %v6087_v61 }
 0x10e   : > { %v959_v62 = vpop.permute.xlu0 %958 }
 0x10f   : > { %v6093_v63 = vpop.permute.xlu1 %1046  ;;  %1155 = vmatpush2.bf16.msra.mxu0 %v5844_v10  ;;  %v6097_v0 = vsel %vm962_vm6, %v959_v62, 0 }
 0x110   : > { %7764 = vst [vmem:[#allocation30_spill] sm:$0xff] %v6093_v63  ;;  %7765 = vst [vmem:[#allocation31_spill] sm:$0xff] %v6097_v0  ;;  %4832 = vmatprep.subr.msk.bf16.mxu1 %vm1050_vm8, %v6093_v63  ;;  %1156 = vmatprep.subr.bf16.mxu0 %v5840_v7 }
 0x111   : > { %1194 = vmatpush1.bf16.msra.mxu1 %v6097_v0 }
 0x113   : > { %1157 = vmatpush2.bf16.msra.mxu0 %v5848_v11 }
 0x114   : > { %4833 = vmatmul.mubr.msk.bf16.vlgmr.msra.gmra.mxu1 %vm1119_vm10, %v5363_v1 }
 0x115   : > { %1221 = vmatprep.mubr.bf16.mxu1 %v7664_v12 }
 0x116   : > { %1159 = vmatmul.mubr.bf16.vlgmr.msra.gmra.mxu0 %v5364_v2 }
 0x117   : > { %1168 = vmatprep.mubr.bf16.mxu0 %v5368_v4  ;;  %v1242_v4 = vshrl.u32 %v1241_v47, 7 }
 0x119   : > { %v1243_v3 = vsub.s32 0, %v1242_v4 }
 0x11b   : > { %v1082_v14 = vpop.permute.xlu0 %1081 }
 0x11c   : > { %4834 = vmatmul.mubr.msk.bf16.gmra.mxu1 %vm1119_vm10, %v5367_v5  ;;  %v1087_v17 = vpop.permute.xlu1 %1086 }
 0x11e   : > { %1169 = vmatmul.mubr.bf16.gmra.mxu0 %v5370_v6 }
 0x11f   : > { %1580 = vmatprep.mubr.bf16.mxu0 %v7664_v12  ;;  %v1077_v56 = vpop.permute.xlu0 %1076 }
 0x120   : > { %v1072_v1 = vpop.permute.xlu1 %1071 }
 0x1d4   : > { %v1213_v8 = vpop.f32.mrf.mxu1 }
 0x1d6   : > { %v1215_v9 = vpop.f32.mrf.mxu1  ;;  %v1160_v13 = vpop.f32.mrf.mxu0 }
 0x1d7   : > { %v1161_v63 = vadd.f32 %v1160_v13, %v1072_v1 }
 0x1d8   : > { %v1217_v15 = vpop.f32.mrf.mxu1  ;;  %v1162_v16 = vpop.f32.mrf.mxu0 }
 0x1d9   : > { %v1163_v60 = vadd.f32 %v1162_v16, %v1072_v1  ;;  %v1214_v52 = vadd.f32 %v1213_v8, %v1161_v63  ;;  %v6126_v16 = vrot.slane %v865_v54, %v1243_v3  ;;  %v5373_v8 = vld [vmem:[%s7777_s7 + $0x4] ss:$12 sps:$4 sm:$0xff]  }
 0x1da   : > { %v1219_v41 = vpop.f32.mrf.mxu1  ;;  %v1164_v44 = vpop.f32.mrf.mxu0  ;;  %1527 = vmatprep.mubr.bf16.mxu1 %v5373_v8 }
 0x1db   : > { %v1165_v5 = vadd.f32 %v1164_v44, %v1077_v56 }
 0x1dc   : > { %v1223_v50 = vpop.f32.mrf.mxu1  ;;  %v1166_v53 = vpop.f32.mrf.mxu0 }
 0x1dd   : > { %v1167_v12 = vadd.f32 %v1166_v53, %v1077_v56  ;;  %v1218_v58 = vadd.f32 %v1217_v15, %v1165_v5  ;;  %v1232_v5 = vmax.f32 %v1214_v52, 0.0 }
 0x1de   : > { %v1225_v59 = vpop.f32.mrf.mxu1  ;;  %v1170_v62 = vpop.f32.mrf.mxu0 }
 0x1df   : > { %v1171_v2 = vadd.f32 %v1170_v62, %v1082_v14  ;;  %v1247_v62 = vsub.s32 1, %v1242_v4  ;;  %v1220_v47 = vadd.f32 %v1219_v41, %v1167_v12  ;;  %v1436_v41 = vld [vmem:[%s7780_s19 + $0x8] sm:$0xff] }
 0x1e0   : > { %v1172_v6 = vpop.f32.mrf.mxu0  ;;  %v1227_v11 = vpop.f32.mrf.mxu1 }
 0x1e1   : > { %v1173_v0 = vadd.f32 %v1172_v6, %v1082_v14  ;;  %v1224_v61 = vadd.f32 %v1223_v50, %v1171_v2  ;;  %v1216_v50 = vadd.f32 %v1215_v9, %v1163_v60  ;;  %v1438_v9 = vld [vmem:[%s7780_s19 + $0x18] sm:$0xff]  ;;  %v1435_v6 = vld [vmem:[%s7780_s19] sm:$0xff] }
 0x1e2   : > { %v1174_v7 = vpop.f32.mrf.mxu0  ;;  %v1229_v14 = vpop.f32.mrf.mxu1 }
 0x1e3   : > { %v1226_v10 = vadd.f32 %v1225_v59, %v1173_v0  ;;  %v1175_v57 = vadd.f32 %v1174_v7, %v1087_v17  ;;  %v1236_v53 = vmax.f32 %v1224_v61, 0.0  ;;  %v1234_v0 = vmax.f32 %v1218_v58, 0.0 }
 0x1e4   : > { %v1176_v55 = vpop.f32.mrf.mxu0  ;;  %v6128_v7 = vrot.slane %v865_v54, %v1247_v62  ;;  %v1235_v59 = vmax.f32 %v1220_v47, 0.0  ;;  %v1251_v58 = vmul.f32 %v6126_v16, %v1232_v5 }
 0x1e5   : > { %v1177_v44 = vadd.f32 %v1176_v55, %v1087_v17  ;;  %v1228_v13 = vadd.f32 %v1227_v11, %v1175_v57  ;;  %v1237_v56 = vmax.f32 %v1226_v10, 0.0  ;;  %v1255_v4 = vmul.f32 %v6126_v16, %v1236_v53  ;;  %v1437_v17 = vld [vmem:[%s7780_s19 + $0x10] sm:$0xff]  ;;  %s5290_s19 = sshll.u32 %s7809_s26, 5 }
 0x1e6   : > { %v1233_v55 = vmax.f32 %v1216_v50, 0.0  ;;  %v1253_v10 = vmul.f32 %v6126_v16, %v1234_v0  ;;  %v1254_v57 = vmul.f32 %v6128_v7, %v1235_v59 }
 0x1e7   : > { %v1230_v2 = vadd.f32 %v1229_v14, %v1177_v44  ;;  %v1238_v15 = vmax.f32 %v1228_v13, 0.0  ;;  %v1256_v61 = vmul.f32 %v6128_v7, %v1237_v56 }
 0x1e8   : > { %v1252_v52 = vmul.f32 %v6128_v7, %v1233_v55  ;;  %v6146_v60 = vpack.c.bf16 %v1253_v10, %v1251_v58 }
 0x1e9   : > { %v1239_v1 = vmax.f32 %v1230_v2, 0.0  ;;  %v1257_v12 = vmul.f32 %v6126_v16, %v1238_v15 }
 0x1ea   : > { %v6148_v63 = vpack.c.bf16 %v1254_v57, %v1252_v52 }
 0x1eb   : > { %v1258_v11 = vmul.f32 %v6128_v7, %v1239_v1  ;;  %v6135_v3 = vpack.c.bf16 %v1257_v12, %v1255_v4 }
 0x1ed   : > { %v6138_v54 = vpack.c.bf16 %v1258_v11, %v1256_v61  ;;  %1297 = vrot.lane.b32.xlu0 %v6135_v3, %s7681_s1 }
 0x1ef   : > { %1379 = vrot.lane.b32.xlu1 %v6138_v54, %s7681_s1 }
 0x1f1   : > { %1295 = vrot.lane.b32.xlu0 %v6146_v60, %s7681_s1 }
 0x1f3   : > { %1377 = vrot.lane.b32.xlu1 %v6148_v63, %s7681_s1  ;;  %s7776_s1 = smov 127  }
 0x1f5   : > { %1287 = vrot.lane.b32.xlu0 %v6135_v3, %s7679_s28 }
 0x1f7   : > { %1369 = vrot.lane.b32.xlu1 %v6138_v54, %s7767_s9 }
 0x1f9   : > { %1285 = vrot.lane.b32.xlu0 %v6146_v60, %s7679_s28  ;;  %s7775_s28 = smov 119  }
 0x1fb   : > { %1367 = vrot.lane.b32.xlu1 %v6148_v63, %s7767_s9 }
 0x1fd   : > { %1277 = vrot.lane.b32.xlu0 %v6135_v3, %s7768_s30 }
 0x1ff   : > { %1359 = vrot.lane.b32.xlu1 %v6138_v54, %s7769_s5 }
 0x201   : > { %1275 = vrot.lane.b32.xlu0 %v6146_v60, %s7768_s30 }
 0x203   : > { %1357 = vrot.lane.b32.xlu1 %v6148_v63, %s7769_s5 }
 0x205   : > { %1267 = vrot.lane.b32.xlu0 %v6135_v3, %s7770_s6 }
 0x207   : > { %1349 = vrot.lane.b32.xlu1 %v6138_v54, %s7771_s8 }
 0x209   : > { %1265 = vrot.lane.b32.xlu0 %v6146_v60, %s7770_s6 }
 0x20b   : > { %1347 = vrot.lane.b32.xlu1 %v6148_v63, %s7771_s8 }
 0x20d   : > { %1409 = vrot.lane.b32.xlu0 %v6138_v54, %s7772_s4 }
 0x20f   : > { %1327 = vrot.lane.b32.xlu1 %v6135_v3, %s7773_s27 }
 0x211   : > { %1407 = vrot.lane.b32.xlu0 %v6148_v63, %s7772_s4 }
 0x213   : > { %1325 = vrot.lane.b32.xlu1 %v6146_v60, %s7773_s27 }
 0x215   : > { %1399 = vrot.lane.b32.xlu0 %v6138_v54, %s7774_s29 }
 0x217   : > { %1317 = vrot.lane.b32.xlu1 %v6135_v3, %s7775_s28 }
 0x219   : > { %1397 = vrot.lane.b32.xlu0 %v6148_v63, %s7774_s29 }
 0x21b   : > { %1315 = vrot.lane.b32.xlu1 %v6146_v60, %s7775_s28 }
 0x21d   : > { %1389 = vrot.lane.b32.xlu0 %v6138_v54, %s7776_s1 }
 0x21f   : > { %1307 = vrot.lane.b32.xlu1 %v6135_v3, %s7776_s1 }
 0x221   : > { %1387 = vrot.lane.b32.xlu0 %v6148_v63, %s7776_s1 }
 0x223   : > { %1305 = vrot.lane.b32.xlu1 %v6146_v60, %s7776_s1 }
 0x225   : > { %1419 = vrot.lane.b32.xlu0 %v6138_v54, %s7778_s10 }
 0x227   : > { %1337 = vrot.lane.b32.xlu1 %v6135_v3, %s7779_s17 }
 0x229   : > { %1417 = vrot.lane.b32.xlu0 %v6148_v63, %s7778_s10 }
 0x22b   : > { %1335 = vrot.lane.b32.xlu1 %v6146_v60, %s7779_s17 }
 0x22d   : > { %1456 = vperm.xlu0 %5361, %v1438_v9  }
 0x22f   : > { %1451 = vperm.xlu1 %5362, %v1437_v17  }
 0x231   : > { %1446 = vperm.xlu0 %5361, %v1436_v41  }
 0x233   : > { %1441 = vperm.xlu1 %5362, %v1435_v6  }
 0x25f   : > { %v1298_v62 = vpop.permute.xlu0 %1297 }
 0x261   : > { %v1380_v47 = vpop.permute.xlu1 %1379 }
 0x262   : > { %4842 = vmatprep.subr.msk.bf16.mxu1 %vm5928_vm1, %v1380_v47 }
 0x263   : > { %4844 = vmatpush1.bf16.msk.msra.mxu1 %vm5928_vm1, %v1298_v62  ;;  %v1296_v44 = vpop.permute.xlu0 %1295 }
 0x265   : > { %v1378_v53 = vpop.permute.xlu1 %1377 }
 0x266   : > { %4846 = vmatprep.subr.msk.bf16.mxu1 %vm5928_vm1, %v1378_v53 }
 0x267   : > { %4848 = vmatpush1.bf16.msk.msra.mxu1 %vm5928_vm1, %v1296_v44  ;;  %v1288_v14 = vpop.permute.xlu0 %1287 }
 0x269   : > { %v1370_v13 = vpop.permute.xlu1 %1369 }
 0x26a   : > { %4850 = vmatprep.subr.msk.bf16.mxu1 %vm5949_vm3, %v1370_v13 }
 0x26b   : > { %4852 = vmatpush1.bf16.msk.msra.mxu1 %vm5963_vm5, %v1288_v14  ;;  %v1286_v50 = vpop.permute.xlu0 %1285 }
 0x26d   : > { %v1368_v56 = vpop.permute.xlu1 %1367 }
 0x26e   : > { %4854 = vmatprep.subr.msk.bf16.mxu1 %vm5949_vm3, %v1368_v56 }
 0x26f   : > { %4856 = vmatpush1.bf16.msk.msra.mxu1 %vm5963_vm5, %v1286_v50  ;;  %v1278_v2 = vpop.permute.xlu0 %1277 }
 0x271   : > { %v1360_v0 = vpop.permute.xlu1 %1359 }
 0x272   : > { %4858 = vmatprep.subr.msk.bf16.mxu1 %vm5977_vm7, %v1360_v0 }
 0x273   : > { %4860 = vmatpush1.bf16.msk.msra.mxu1 %vm5991_vm9, %v1278_v2  ;;  %v1276_v15 = vpop.permute.xlu0 %1275 }
 0x275   : > { %v1358_v59 = vpop.permute.xlu1 %1357 }
 0x276   : > { %4862 = vmatprep.subr.msk.bf16.mxu1 %vm5977_vm7, %v1358_v59 }
 0x277   : > { %4864 = vmatpush1.bf16.msk.msra.mxu1 %vm5991_vm9, %v1276_v15  ;;  %v1268_v1 = vpop.permute.xlu0 %1267 }
 0x279   : > { %v1350_v5 = vpop.permute.xlu1 %1349 }
 0x27a   : > { %4866 = vmatprep.subr.msk.bf16.mxu1 %vm6005_vm11, %v1350_v5  ;;  %v5377_v5 = vld [vmem:[%s7777_s7 + $0x18] ss:$12 sps:$4 sm:$0xff]  }
 0x27b   : > { %4868 = vmatpush1.bf16.msk.msra.mxu1 %vm6019_vm13, %v1268_v1  ;;  %v1266_v4 = vpop.permute.xlu0 %1265  ;;  %v5374_v1 = vld [vmem:[%s7777_s7 + $0x8] ss:$12 sps:$4 sm:$0xff]  }
 0x27d   : > { %v1348_v12 = vpop.permute.xlu1 %1347 }
 0x27e   : > { %4870 = vmatprep.subr.msk.bf16.mxu1 %vm6005_vm11, %v1348_v12 }
 0x27f   : > { %4872 = vmatpush1.bf16.msk.msra.mxu1 %vm6019_vm13, %v1266_v4  ;;  %v1410_v55 = vpop.permute.xlu0 %1409  ;;  %v5378_v4 = vld [vmem:[%s7777_s7 + $0x20] ss:$12 sps:$4 sm:$0xff]  }
 0x280   : > { %4873 = vmatprep.subr.msk.bf16.mxu1 %vm1039_vm14, %v1410_v55 }
 0x281   : > { %v1328_v61 = vpop.permute.xlu1 %1327 }
 0x282   : > { %v1333_v11 = vsel %vm951_vm15, %v1328_v61, 0 }
 0x283   : > { %1512 = vmatpush2.bf16.msra.mxu1 %v1333_v11  ;;  %v1408_v10 = vpop.permute.xlu0 %1407 }
 0x284   : > { %4874 = vmatprep.subr.msk.bf16.mxu1 %vm1039_vm14, %v1408_v10 }
 0x285   : > { %v1326_v57 = vpop.permute.xlu1 %1325 }
 0x286   : > { %v1330_v58 = vsel %vm951_vm15, %v1326_v57, 0 }
 0x287   : > { %1514 = vmatpush2.bf16.msra.mxu1 %v1330_v58  ;;  %v1400_v52 = vpop.permute.xlu0 %1399 }
 0x288   : > { %4875 = vmatprep.subr.msk.bf16.mxu1 %vm1028_vm0, %v1400_v52 }
 0x289   : > { %v1318_v8 = vpop.permute.xlu1 %1317 }
 0x28a   : > { %v1323_v9 = vsel %vm940_vm2, %v1318_v8, 0 }
 0x28b   : > { %1516 = vmatpush2.bf16.msra.mxu1 %v1323_v9  ;;  %v1398_v17 = vpop.permute.xlu0 %1397 }
 0x28c   : > { %4876 = vmatprep.subr.msk.bf16.mxu1 %vm1028_vm0, %v1398_v17 }
 0x28d   : > { %v1316_v41 = vpop.permute.xlu1 %1315 }
 0x28e   : > { %v1320_v6 = vsel %vm940_vm2, %v1316_v41, 0 }
 0x28f   : > { %1518 = vmatpush2.bf16.msra.mxu1 %v1320_v6  ;;  %v1390_v62 = vpop.permute.xlu0 %1389 }
 0x290   : > { %4877 = vmatprep.subr.msk.bf16.mxu1 %vm929_vm4, %v1390_v62 }
 0x291   : > { %v1308_v47 = vpop.permute.xlu1 %1307 }
 0x292   : > { %v1313_v44 = vsel %vm929_vm4, %v1308_v47, 0 }
 0x293   : > { %1520 = vmatpush2.bf16.msra.mxu1 %v1313_v44  ;;  %v1388_v53 = vpop.permute.xlu0 %1387 }
 0x294   : > { %4878 = vmatprep.subr.msk.bf16.mxu1 %vm929_vm4, %v1388_v53 }
 0x295   : > { %v1306_v14 = vpop.permute.xlu1 %1305 }
 0x296   : > { %v1310_v13 = vsel %vm929_vm4, %v1306_v14, 0 }
 0x297   : > { %1522 = vmatpush2.bf16.msra.mxu1 %v1310_v13  ;;  %v1420_v50 = vpop.permute.xlu0 %1419 }
 0x298   : > { %1523 = vmatprep.subr.bf16.mxu1 %v6138_v54  ;;  %4879 = vmatprep.subr.msk.bf16.mxu0 %vm1050_vm8, %v1420_v50  ;;  %v5371_v54 = vld [vmem:[%s7777_s7] ss:$12 sps:$4 sm:$0xff]  }
 0x299   : > { %v1338_v56 = vpop.permute.xlu1 %1337 }
 0x29a   : > { %v1343_v2 = vsel %vm962_vm6, %v1338_v56, 0 }
 0x29b   : > { %1524 = vmatpush2.bf16.msra.mxu1 %v6135_v3  ;;  %1561 = vmatpush1.bf16.msra.mxu0 %v1343_v2  ;;  %v1418_v0 = vpop.permute.xlu0 %1417  ;;  %v5375_v3 = vld [vmem:[%s7777_s7 + $0x1c] ss:$12 sps:$4 sm:$0xff]  }
 0x29c   : > { %1525 = vmatprep.subr.bf16.mxu1 %v6148_v63  ;;  %4880 = vmatprep.subr.msk.bf16.mxu0 %vm1050_vm8, %v1418_v0  ;;  %v7781_v63 = vmov 0  }
 0x29d   : > { %v1336_v15 = vpop.permute.xlu1 %1335 }
 0x29e   : > { %v1340_v59 = vsel %vm962_vm6, %v1336_v15, 0 }
 0x29f   : > { %1526 = vmatpush2.bf16.msra.mxu1 %v6146_v60  ;;  %1563 = vmatpush1.bf16.msra.mxu0 %v1340_v59 }
 0x2a2   : > { %1528 = vmatmul.mubr.bf16.vlgmr.msra.gmra.mxu1 %v5371_v54  ;;  %4881 = vmatmul.mubr.msk.bf16.vlgmr.msra.gmra.mxu0 %vm1119_vm10, %v5374_v1 }
 0x2a3   : > { %1537 = vmatprep.mubr.bf16.mxu1 %v5375_v3  ;;  %1590 = vmatprep.mubr.bf16.mxu0 %v7781_v63 }
 0x2a8   : > { %v1457_v11 = vpop.permute.xlu0 %1456 }
 0x2aa   : > { %1538 = vmatmul.mubr.bf16.gmra.mxu1 %v5377_v5  ;;  %4882 = vmatmul.mubr.msk.bf16.gmra.mxu0 %vm1119_vm10, %v5378_v4  ;;  %v1452_v58 = vpop.permute.xlu1 %1451 }
 0x2ab   : > { %1938 = vmatprep.mubr.bf16.mxu0 %v7781_v63 }
 0x2ac   : > { %v1447_v41 = vpop.permute.xlu0 %1446 }
 0x2ae   : > { %v1442_v53 = vpop.permute.xlu1 %1441 }
 0x362   : > { %v1529_v60 = vpop.f32.mrf.mxu1  ;;  %v1582_v12 = vpop.f32.mrf.mxu0 }
 0x363   : > { %v1530_v50 = vadd.f32 %v1529_v60, %v1442_v53 }
 0x364   : > { %v1531_v55 = vpop.f32.mrf.mxu1  ;;  %v1584_v61 = vpop.f32.mrf.mxu0 }
 0x365   : > { %v1532_v15 = vadd.f32 %v1531_v55, %v1442_v53  ;;  %v1583_v51 = vadd.f32 %v1582_v12, %v1530_v50  ;;  %v1795_v53 = vld [vmem:[%s7785_s22 + $0x10] sm:$0xff] }
 0x366   : > { %v1533_v10 = vpop.f32.mrf.mxu1  ;;  %v1586_v57 = vpop.f32.mrf.mxu0 }
 0x367   : > { %v1534_v62 = vadd.f32 %v1533_v10, %v1447_v41  ;;  %v1585_v48 = vadd.f32 %v1584_v61, %v1532_v15 }
 0x368   : > { %v1535_v52 = vpop.f32.mrf.mxu1  ;;  %v1588_v8 = vpop.f32.mrf.mxu0 }
 0x369   : > { %v1536_v14 = vadd.f32 %v1535_v52, %v1447_v41  ;;  %v1587_v54 = vadd.f32 %v1586_v57, %v1534_v62  ;;  %v1601_v41 = vmax.f32 %v1583_v51, 0.0  ;;  %v5381_v51 = vld [vmem:[%s7784_s2 + $0x4] ss:$12 sps:$4 sm:$0xff]  }
 0x36a   : > { %v1539_v9 = vpop.f32.mrf.mxu1  ;;  %v1592_v17 = vpop.f32.mrf.mxu0  ;;  %1885 = vmatprep.mubr.bf16.mxu1 %v5381_v51 }
 0x36b   : > { %v1540_v6 = vadd.f32 %v1539_v9, %v1452_v58  ;;  %v1589_v5 = vadd.f32 %v1588_v8, %v1536_v14  ;;  %v1603_v52 = vmax.f32 %v1587_v54, 0.0  ;;  %v1794_v14 = vld [vmem:[%s7785_s22 + $0x8] sm:$0xff] }
 0x36c   : > { %v1541_v47 = vpop.f32.mrf.mxu1  ;;  %v1594_v44 = vpop.f32.mrf.mxu0 }
 0x36d   : > { %v1542_v13 = vadd.f32 %v1541_v47, %v1452_v58  ;;  %v1593_v56 = vadd.f32 %v1592_v17, %v1540_v6  ;;  %v1604_v60 = vmax.f32 %v1589_v5, 0.0  ;;  %v1602_v6 = vmax.f32 %v1585_v48, 0.0 }
 0x36e   : > { %v1543_v2 = vpop.f32.mrf.mxu1  ;;  %v1596_v0 = vpop.f32.mrf.mxu0 }
 0x36f   : > { %v1595_v59 = vadd.f32 %v1594_v44, %v1542_v13  ;;  %v1544_v1 = vadd.f32 %v1543_v2, %v1457_v11  ;;  %v1605_v49 = vmax.f32 %v1593_v56, 0.0  ;;  %v1612_v61 = vmul.f32 %v1604_v60, %v6128_v7  ;;  %v1796_v44 = vld [vmem:[%s7785_s22 + $0x18] sm:$0xff]  ;;  %v1793_v13 = vld [vmem:[%s7785_s22] sm:$0xff] }
 0x370   : > { %v1545_v3 = vpop.f32.mrf.mxu1  ;;  %v1598_v10 = vpop.f32.mrf.mxu0 }
 0x371   : > { %v1546_v4 = vadd.f32 %v1545_v3, %v1457_v11  ;;  %v1597_v9 = vadd.f32 %v1596_v0, %v1544_v1  ;;  %v1606_v46 = vmax.f32 %v1595_v59, 0.0  ;;  %v1613_v55 = vmul.f32 %v1605_v49, %v6126_v16 }
 0x372   : > { %v1611_v11 = vmul.f32 %v1603_v52, %v6126_v16  ;;  %v1610_v49 = vmul.f32 %v1602_v6, %v6128_v7 }
 0x373   : > { %v1599_v45 = vadd.f32 %v1598_v10, %v1546_v4  ;;  %v1607_v58 = vmax.f32 %v1597_v9, 0.0  ;;  %v1614_v8 = vmul.f32 %v1606_v46, %v6128_v7 }
 0x374   : > { %v6314_v48 = vpack.c.bf16 %v1612_v61, %v1610_v49 }
 0x375   : > { %v1608_v17 = vmax.f32 %v1599_v45, 0.0  ;;  %v1615_v57 = vmul.f32 %v1607_v58, %v6126_v16  ;;  %v1609_v45 = vmul.f32 %v1601_v41, %v6126_v16 }
 0x377   : > { %v1616_v12 = vmul.f32 %v1608_v17, %v6128_v7  ;;  %v6301_v62 = vpack.c.bf16 %v1615_v57, %v1613_v55  ;;  %v6312_v46 = vpack.c.bf16 %v1611_v11, %v1609_v45 }
 0x379   : > { %v6304_v47 = vpack.c.bf16 %v1616_v12, %v1614_v8  ;;  %1655 = vrot.lane.b32.xlu0 %v6301_v62, %s7782_s23 }
 0x37b   : > { %1737 = vrot.lane.b32.xlu1 %v6304_v47, %s7782_s23 }
 0x37d   : > { %1653 = vrot.lane.b32.xlu0 %v6312_v46, %s7782_s23 }
 0x37f   : > { %1735 = vrot.lane.b32.xlu1 %v6314_v48, %s7782_s23 }
 0x381   : > { %1645 = vrot.lane.b32.xlu0 %v6301_v62, %s7783_s25 }
 0x383   : > { %1727 = vrot.lane.b32.xlu1 %v6304_v47, %s7767_s9 }
 0x385   : > { %1643 = vrot.lane.b32.xlu0 %v6312_v46, %s7783_s25 }
 0x387   : > { %1725 = vrot.lane.b32.xlu1 %v6314_v48, %s7767_s9 }
 0x389   : > { %1635 = vrot.lane.b32.xlu0 %v6301_v62, %s7768_s30 }
 0x38b   : > { %1717 = vrot.lane.b32.xlu1 %v6304_v47, %s7769_s5 }
 0x38d   : > { %1633 = vrot.lane.b32.xlu0 %v6312_v46, %s7768_s30 }
 0x38f   : > { %1715 = vrot.lane.b32.xlu1 %v6314_v48, %s7769_s5 }
 0x391   : > { %1625 = vrot.lane.b32.xlu0 %v6301_v62, %s7770_s6 }
 0x393   : > { %1707 = vrot.lane.b32.xlu1 %v6304_v47, %s7771_s8 }
 0x395   : > { %1623 = vrot.lane.b32.xlu0 %v6312_v46, %s7770_s6 }
 0x397   : > { %1705 = vrot.lane.b32.xlu1 %v6314_v48, %s7771_s8 }
 0x399   : > { %1767 = vrot.lane.b32.xlu0 %v6304_v47, %s7772_s4 }
 0x39b   : > { %1685 = vrot.lane.b32.xlu1 %v6301_v62, %s7773_s27 }
 0x39d   : > { %1765 = vrot.lane.b32.xlu0 %v6314_v48, %s7772_s4 }
 0x39f   : > { %1683 = vrot.lane.b32.xlu1 %v6312_v46, %s7773_s27 }
 0x3a1   : > { %1757 = vrot.lane.b32.xlu0 %v6304_v47, %s7774_s29 }
 0x3a3   : > { %1675 = vrot.lane.b32.xlu1 %v6301_v62, %s7775_s28 }
 0x3a5   : > { %1755 = vrot.lane.b32.xlu0 %v6314_v48, %s7774_s29 }
 0x3a7   : > { %1673 = vrot.lane.b32.xlu1 %v6312_v46, %s7775_s28 }
 0x3a9   : > { %1747 = vrot.lane.b32.xlu0 %v6304_v47, %s7776_s1 }
 0x3ab   : > { %1665 = vrot.lane.b32.xlu1 %v6301_v62, %s7776_s1 }
 0x3ad   : > { %1745 = vrot.lane.b32.xlu0 %v6314_v48, %s7776_s1 }
 0x3af   : > { %1663 = vrot.lane.b32.xlu1 %v6312_v46, %s7776_s1 }
 0x3b1   : > { %1777 = vrot.lane.b32.xlu0 %v6304_v47, %s7778_s10 }
 0x3b3   : > { %1695 = vrot.lane.b32.xlu1 %v6301_v62, %s7779_s17 }
 0x3b5   : > { %1775 = vrot.lane.b32.xlu0 %v6314_v48, %s7778_s10 }
 0x3b7   : > { %1693 = vrot.lane.b32.xlu1 %v6312_v46, %s7779_s17 }
 0x3b9   : > { %1814 = vperm.xlu0 %5361, %v1796_v44  }
 0x3bb   : > { %1809 = vperm.xlu1 %5362, %v1795_v53  }
 0x3bd   : > { %1804 = vperm.xlu0 %5361, %v1794_v14  }
 0x3bf   : > { %1799 = vperm.xlu1 %5362, %v1793_v13  }
 0x3eb   : > { %v1656_v50 = vpop.permute.xlu0 %1655 }
 0x3ed   : > { %v1738_v56 = vpop.permute.xlu1 %1737 }
 0x3ee   : > { %4890 = vmatprep.subr.msk.bf16.mxu1 %vm5928_vm1, %v1738_v56 }
 0x3ef   : > { %4892 = vmatpush1.bf16.msk.msra.mxu1 %vm5928_vm1, %v1656_v50  ;;  %v1654_v2 = vpop.permute.xlu0 %1653 }
 0x3f1   : > { %v1736_v0 = vpop.permute.xlu1 %1735 }
 0x3f2   : > { %4894 = vmatprep.subr.msk.bf16.mxu1 %vm5928_vm1, %v1736_v0 }
 0x3f3   : > { %4896 = vmatpush1.bf16.msk.msra.mxu1 %vm5928_vm1, %v1654_v2  ;;  %v1646_v15 = vpop.permute.xlu0 %1645 }
 0x3f5   : > { %v1728_v59 = vpop.permute.xlu1 %1727 }
 0x3f6   : > { %4898 = vmatprep.subr.msk.bf16.mxu1 %vm5949_vm3, %v1728_v59 }
 0x3f7   : > { %4900 = vmatpush1.bf16.msk.msra.mxu1 %vm5963_vm5, %v1646_v15  ;;  %v1644_v54 = vpop.permute.xlu0 %1643 }
 0x3f9   : > { %v1726_v1 = vpop.permute.xlu1 %1725 }
 0x3fa   : > { %4902 = vmatprep.subr.msk.bf16.mxu1 %vm5949_vm3, %v1726_v1 }
 0x3fb   : > { %4904 = vmatpush1.bf16.msk.msra.mxu1 %vm5963_vm5, %v1644_v54  ;;  %v1636_v3 = vpop.permute.xlu0 %1635 }
 0x3fd   : > { %v1718_v5 = vpop.permute.xlu1 %1717 }
 0x3fe   : > { %4906 = vmatprep.subr.msk.bf16.mxu1 %vm5977_vm7, %v1718_v5  ;;  %v5386_v5 = vld [vmem:[%s7784_s2 + $0x20] ss:$12 sps:$4 sm:$0xff]  }
 0x3ff   : > { %4908 = vmatpush1.bf16.msk.msra.mxu1 %vm5991_vm9, %v1636_v3  ;;  %v1634_v4 = vpop.permute.xlu0 %1633  ;;  %v5382_v3 = vld [vmem:[%s7784_s2 + $0x8] ss:$12 sps:$4 sm:$0xff]  }
 0x401   : > { %v1716_v9 = vpop.permute.xlu1 %1715 }
 0x402   : > { %4910 = vmatprep.subr.msk.bf16.mxu1 %vm5977_vm7, %v1716_v9 }
 0x403   : > { %4912 = vmatpush1.bf16.msk.msra.mxu1 %vm5991_vm9, %v1634_v4  ;;  %v1626_v10 = vpop.permute.xlu0 %1625 }
 0x405   : > { %v1708_v52 = vpop.permute.xlu1 %1707 }
 0x406   : > { %4914 = vmatprep.subr.msk.bf16.mxu1 %vm6005_vm11, %v1708_v52 }
 0x407   : > { %4916 = vmatpush1.bf16.msk.msra.mxu1 %vm6019_vm13, %v1626_v10  ;;  %v1624_v58 = vpop.permute.xlu0 %1623 }
 0x409   : > { %v1706_v60 = vpop.permute.xlu1 %1705 }
 0x40a   : > { %4918 = vmatprep.subr.msk.bf16.mxu1 %vm6005_vm11, %v1706_v60 }
 0x40b   : > { %4920 = vmatpush1.bf16.msk.msra.mxu1 %vm6019_vm13, %v1624_v58  ;;  %v1768_v17 = vpop.permute.xlu0 %1767 }
 0x40c   : > { %4921 = vmatprep.subr.msk.bf16.mxu1 %vm1039_vm14, %v1768_v17 }
 0x40d   : > { %v1686_v41 = vpop.permute.xlu1 %1685 }
 0x40e   : > { %v1691_v55 = vsel %vm951_vm15, %v1686_v41, 0 }
 0x40f   : > { %1870 = vmatpush2.bf16.msra.mxu1 %v1691_v55  ;;  %v1766_v57 = vpop.permute.xlu0 %1765 }
 0x410   : > { %4922 = vmatprep.subr.msk.bf16.mxu1 %vm1039_vm14, %v1766_v57 }
 0x411   : > { %v1684_v6 = vpop.permute.xlu1 %1683 }
 0x412   : > { %v1688_v8 = vsel %vm951_vm15, %v1684_v6, 0 }
 0x413   : > { %1872 = vmatpush2.bf16.msra.mxu1 %v1688_v8  ;;  %v1758_v12 = vpop.permute.xlu0 %1757 }
 0x414   : > { %4923 = vmatprep.subr.msk.bf16.mxu1 %vm1028_vm0, %v1758_v12 }
 0x415   : > { %v1676_v11 = vpop.permute.xlu1 %1675 }
 0x416   : > { %v1681_v61 = vsel %vm940_vm2, %v1676_v11, 0 }
 0x417   : > { %1874 = vmatpush2.bf16.msra.mxu1 %v1681_v61  ;;  %v1756_v45 = vpop.permute.xlu0 %1755 }
 0x418   : > { %4924 = vmatprep.subr.msk.bf16.mxu1 %vm1028_vm0, %v1756_v45 }
 0x419   : > { %v1674_v49 = vpop.permute.xlu1 %1673 }
 0x41a   : > { %v1678_v51 = vsel %vm940_vm2, %v1674_v49, 0 }
 0x41b   : > { %1876 = vmatpush2.bf16.msra.mxu1 %v1678_v51  ;;  %v1748_v44 = vpop.permute.xlu0 %1747 }
 0x41c   : > { %4925 = vmatprep.subr.msk.bf16.mxu1 %vm929_vm4, %v1748_v44 }
 0x41d   : > { %v1666_v53 = vpop.permute.xlu1 %1665 }
 0x41e   : > { %v1671_v14 = vsel %vm929_vm4, %v1666_v53, 0 }
 0x41f   : > { %1878 = vmatpush2.bf16.msra.mxu1 %v1671_v14  ;;  %v1746_v13 = vpop.permute.xlu0 %1745 }
 0x420   : > { %4926 = vmatprep.subr.msk.bf16.mxu1 %vm929_vm4, %v1746_v13 }
 0x421   : > { %v1664_v50 = vpop.permute.xlu1 %1663 }
 0x422   : > { %v1668_v56 = vsel %vm929_vm4, %v1664_v50, 0 }
 0x423   : > { %1880 = vmatpush2.bf16.msra.mxu1 %v1668_v56  ;;  %v1778_v2 = vpop.permute.xlu0 %1777 }
 0x424   : > { %1881 = vmatprep.subr.bf16.mxu1 %v6304_v47  ;;  %4927 = vmatprep.subr.msk.bf16.mxu0 %vm1050_vm8, %v1778_v2  ;;  %v5379_v47 = vld [vmem:[%s7784_s2] ss:$12 sps:$4 sm:$0xff]  }
 0x425   : > { %v1696_v0 = vpop.permute.xlu1 %1695 }
 0x426   : > { %v1701_v15 = vsel %vm962_vm6, %v1696_v0, 0 }
 0x427   : > { %1882 = vmatpush2.bf16.msra.mxu1 %v6301_v62  ;;  %1919 = vmatpush1.bf16.msra.mxu0 %v1701_v15  ;;  %v1776_v59 = vpop.permute.xlu0 %1775  ;;  %v5383_v62 = vld [vmem:[%s7784_s2 + $0x1c] ss:$12 sps:$4 sm:$0xff]  }
 0x428   : > { %1883 = vmatprep.subr.bf16.mxu1 %v6314_v48  ;;  %4928 = vmatprep.subr.msk.bf16.mxu0 %vm1050_vm8, %v1776_v59  ;;  %v5385_v48 = vld [vmem:[%s7784_s2 + $0x18] ss:$12 sps:$4 sm:$0xff]  }
 0x429   : > { %v1694_v54 = vpop.permute.xlu1 %1693 }
 0x42a   : > { %v1698_v1 = vsel %vm962_vm6, %v1694_v54, 0 }
 0x42b   : > { %1884 = vmatpush2.bf16.msra.mxu1 %v6312_v46  ;;  %1921 = vmatpush1.bf16.msra.mxu0 %v1698_v1 }
 0x42e   : > { %1886 = vmatmul.mubr.bf16.vlgmr.msra.gmra.mxu1 %v5379_v47  ;;  %4929 = vmatmul.mubr.msk.bf16.vlgmr.msra.gmra.mxu0 %vm1119_vm10, %v5382_v3 }
 0x42f   : > { %1895 = vmatprep.mubr.bf16.mxu1 %v5383_v62  ;;  %1948 = vmatprep.mubr.bf16.mxu0 %v7781_v63 }
 0x434   : > { %v1815_v52 = vpop.permute.xlu0 %1814 }
 0x436   : > { %1896 = vmatmul.mubr.bf16.gmra.mxu1 %v5385_v48  ;;  %4930 = vmatmul.mubr.msk.bf16.gmra.mxu0 %vm1119_vm10, %v5386_v5  ;;  %v1810_v17 = vpop.permute.xlu1 %1809 }
 0x437   : > { %2296 = vmatprep.mubr.bf16.mxu1 %v7781_v63 }
 0x438   : > { %v1805_v8 = vpop.permute.xlu0 %1804 }
 0x43a   : > { %v1800_v49 = vpop.permute.xlu1 %1799 }
 0x4ee   : > { %v1887_v46 = vpop.f32.mrf.mxu1  ;;  %v1940_v4 = vpop.f32.mrf.mxu0 }
 0x4ef   : > { %v1888_v53 = vadd.f32 %v1887_v46, %v1800_v49 }
 0x4f0   : > { %v1889_v9 = vpop.f32.mrf.mxu1  ;;  %v1942_v10 = vpop.f32.mrf.mxu0 }
 0x4f1   : > { %v1890_v56 = vadd.f32 %v1889_v9, %v1800_v49  ;;  %v1941_v47 = vadd.f32 %v1940_v4, %v1888_v53  ;;  %v5389_v53 = vld [vmem:[%s7786_s0 + $0x4] ss:$12 sps:$4 sm:$0xff]  }
 0x4f2   : > { %v1891_v58 = vpop.f32.mrf.mxu1  ;;  %v1944_v60 = vpop.f32.mrf.mxu0  ;;  %2243 = vmatprep.mubr.bf16.mxu0 %v5389_v53 }
 0x4f3   : > { %v1892_v11 = vadd.f32 %v1891_v58, %v1805_v8  ;;  %v1943_v5 = vadd.f32 %v1942_v10, %v1890_v56  ;;  %v2151_v56 = vld [vmem:[%s7787_s3] sm:$0xff] }
 0x4f4   : > { %v1893_v41 = vpop.f32.mrf.mxu1  ;;  %v1946_v55 = vpop.f32.mrf.mxu0 }
 0x4f5   : > { %v1894_v51 = vadd.f32 %v1893_v41, %v1805_v8  ;;  %v1945_v0 = vadd.f32 %v1944_v60, %v1892_v11  ;;  %v1959_v8 = vmax.f32 %v1941_v47, 0.0 }
 0x4f6   : > { %v1897_v57 = vpop.f32.mrf.mxu1  ;;  %v1950_v6 = vpop.f32.mrf.mxu0 }
 0x4f7   : > { %v1898_v12 = vadd.f32 %v1897_v57, %v1810_v17  ;;  %v1947_v54 = vadd.f32 %v1946_v55, %v1894_v51  ;;  %v1961_v41 = vmax.f32 %v1945_v0, 0.0 }
 0x4f8   : > { %v1899_v61 = vpop.f32.mrf.mxu1  ;;  %v1952_v45 = vpop.f32.mrf.mxu0 }
 0x4f9   : > { %v1900_v44 = vadd.f32 %v1899_v61, %v1810_v17  ;;  %v1951_v14 = vadd.f32 %v1950_v6, %v1898_v12  ;;  %v1962_v46 = vmax.f32 %v1947_v54, 0.0  ;;  %v1960_v12 = vmax.f32 %v1943_v5, 0.0 }
 0x4fa   : > { %v1901_v13 = vpop.f32.mrf.mxu1  ;;  %v1954_v50 = vpop.f32.mrf.mxu0 }
 0x4fb   : > { %v1953_v2 = vadd.f32 %v1952_v45, %v1900_v44  ;;  %v1902_v15 = vadd.f32 %v1901_v13, %v1815_v52  ;;  %v1963_v3 = vmax.f32 %v1951_v14, 0.0  ;;  %v1970_v10 = vmul.f32 %v1962_v46, %v6128_v7  ;;  %v2154_v14 = vld [vmem:[%s7787_s3 + $0x18] sm:$0xff]  ;;  %v2153_v13 = vld [vmem:[%s7787_s3 + $0x10] sm:$0xff] }
 0x4fc   : > { %v1903_v59 = vpop.f32.mrf.mxu1  ;;  %v1956_v48 = vpop.f32.mrf.mxu0  ;;  %v1967_v45 = vmul.f32 %v1959_v8, %v6126_v16  ;;  %v1968_v49 = vmul.f32 %v1960_v12, %v6128_v7 }
 0x4fd   : > { %v1904_v1 = vadd.f32 %v1903_v59, %v1815_v52  ;;  %v1955_v62 = vadd.f32 %v1954_v50, %v1902_v15  ;;  %v1964_v58 = vmax.f32 %v1953_v2, 0.0  ;;  %v1971_v9 = vmul.f32 %v1963_v3, %v6126_v16  ;;  %v2152_v50 = vld [vmem:[%s7787_s3 + $0x8] sm:$0xff] }
 0x4fe   : > { %v1969_v52 = vmul.f32 %v1961_v41, %v6126_v16  ;;  %v6480_v44 = vpack.c.bf16 %v1970_v10, %v1968_v49 }
 0x4ff   : > { %v1957_v57 = vadd.f32 %v1956_v48, %v1904_v1  ;;  %v1965_v17 = vmax.f32 %v1955_v62, 0.0  ;;  %v1972_v55 = vmul.f32 %v1964_v58, %v6128_v7 }
 0x500   : > { %v6478_v51 = vpack.c.bf16 %v1969_v52, %v1967_v45 }
 0x501   : > { %v1966_v6 = vmax.f32 %v1957_v57, 0.0  ;;  %v1973_v60 = vmul.f32 %v1965_v17, %v6126_v16 }
 0x503   : > { %v1974_v4 = vmul.f32 %v1966_v6, %v6128_v7  ;;  %v6467_v11 = vpack.c.bf16 %v1973_v60, %v1971_v9 }
 0x505   : > { %v6470_v61 = vpack.c.bf16 %v1974_v4, %v1972_v55  ;;  %2013 = vrot.lane.b32.xlu0 %v6467_v11, %s7782_s23 }
 0x507   : > { %2095 = vrot.lane.b32.xlu1 %v6470_v61, %s7782_s23 }
 0x509   : > { %2011 = vrot.lane.b32.xlu0 %v6478_v51, %s7782_s23 }
 0x50b   : > { %2093 = vrot.lane.b32.xlu1 %v6480_v44, %s7782_s23 }
 0x50d   : > { %2003 = vrot.lane.b32.xlu0 %v6467_v11, %s7783_s25 }
 0x50f   : > { %2085 = vrot.lane.b32.xlu1 %v6470_v61, %s7767_s9 }
 0x511   : > { %2001 = vrot.lane.b32.xlu0 %v6478_v51, %s7783_s25 }
 0x513   : > { %2083 = vrot.lane.b32.xlu1 %v6480_v44, %s7767_s9 }
 0x515   : > { %1993 = vrot.lane.b32.xlu0 %v6467_v11, %s7768_s30 }
 0x517   : > { %2075 = vrot.lane.b32.xlu1 %v6470_v61, %s7769_s5 }
 0x519   : > { %1991 = vrot.lane.b32.xlu0 %v6478_v51, %s7768_s30 }
 0x51b   : > { %2073 = vrot.lane.b32.xlu1 %v6480_v44, %s7769_s5 }
 0x51d   : > { %1983 = vrot.lane.b32.xlu0 %v6467_v11, %s7770_s6 }
 0x51f   : > { %2065 = vrot.lane.b32.xlu1 %v6470_v61, %s7771_s8 }
 0x521   : > { %1981 = vrot.lane.b32.xlu0 %v6478_v51, %s7770_s6 }
 0x523   : > { %2063 = vrot.lane.b32.xlu1 %v6480_v44, %s7771_s8 }
 0x525   : > { %2125 = vrot.lane.b32.xlu0 %v6470_v61, %s7772_s4 }
 0x527   : > { %2043 = vrot.lane.b32.xlu1 %v6467_v11, %s7773_s27 }
 0x529   : > { %2123 = vrot.lane.b32.xlu0 %v6480_v44, %s7772_s4 }
 0x52b   : > { %2041 = vrot.lane.b32.xlu1 %v6478_v51, %s7773_s27 }
 0x52d   : > { %2115 = vrot.lane.b32.xlu0 %v6470_v61, %s7774_s29 }
 0x52f   : > { %2033 = vrot.lane.b32.xlu1 %v6467_v11, %s7775_s28 }
 0x531   : > { %2113 = vrot.lane.b32.xlu0 %v6480_v44, %s7774_s29 }
 0x533   : > { %2031 = vrot.lane.b32.xlu1 %v6478_v51, %s7775_s28 }
 0x535   : > { %2105 = vrot.lane.b32.xlu0 %v6470_v61, %s7776_s1 }
 0x537   : > { %2023 = vrot.lane.b32.xlu1 %v6467_v11, %s7776_s1 }
 0x539   : > { %2103 = vrot.lane.b32.xlu0 %v6480_v44, %s7776_s1 }
 0x53b   : > { %2021 = vrot.lane.b32.xlu1 %v6478_v51, %s7776_s1 }
 0x53d   : > { %2135 = vrot.lane.b32.xlu0 %v6470_v61, %s7778_s10 }
 0x53f   : > { %2053 = vrot.lane.b32.xlu1 %v6467_v11, %s7779_s17 }
 0x541   : > { %2133 = vrot.lane.b32.xlu0 %v6480_v44, %s7778_s10 }
 0x543   : > { %2051 = vrot.lane.b32.xlu1 %v6478_v51, %s7779_s17 }
 0x545   : > { %2172 = vperm.xlu0 %5361, %v2154_v14  }
 0x547   : > { %2167 = vperm.xlu1 %5362, %v2153_v13  }
 0x549   : > { %2162 = vperm.xlu0 %5361, %v2152_v50  }
 0x54b   : > { %2157 = vperm.xlu1 %5362, %v2151_v56  }
 0x577   : > { %v2014_v2 = vpop.permute.xlu0 %2013 }
 0x579   : > { %v2096_v0 = vpop.permute.xlu1 %2095 }
 0x57a   : > { %4938 = vmatprep.subr.msk.bf16.mxu0 %vm5928_vm1, %v2096_v0 }
 0x57b   : > { %4940 = vmatpush1.bf16.msk.msra.mxu0 %vm5928_vm1, %v2014_v2  ;;  %v2012_v15 = vpop.permute.xlu0 %2011 }
 0x57d   : > { %v2094_v59 = vpop.permute.xlu1 %2093 }
 0x57e   : > { %4942 = vmatprep.subr.msk.bf16.mxu0 %vm5928_vm1, %v2094_v59 }
 0x57f   : > { %4944 = vmatpush1.bf16.msk.msra.mxu0 %vm5928_vm1, %v2012_v15  ;;  %v2004_v54 = vpop.permute.xlu0 %2003 }
 0x581   : > { %v2086_v1 = vpop.permute.xlu1 %2085 }
 0x582   : > { %4946 = vmatprep.subr.msk.bf16.mxu0 %vm5949_vm3, %v2086_v1 }
 0x583   : > { %4948 = vmatpush1.bf16.msk.msra.mxu0 %vm5963_vm5, %v2004_v54  ;;  %v2002_v47 = vpop.permute.xlu0 %2001 }
 0x585   : > { %v2084_v3 = vpop.permute.xlu1 %2083 }
 0x586   : > { %4950 = vmatprep.subr.msk.bf16.mxu0 %vm5949_vm3, %v2084_v3 }
 0x587   : > { %4952 = vmatpush1.bf16.msk.msra.mxu0 %vm5963_vm5, %v2002_v47  ;;  %v1994_v62 = vpop.permute.xlu0 %1993 }
 0x589   : > { %v2076_v48 = vpop.permute.xlu1 %2075 }
 0x58a   : > { %4954 = vmatprep.subr.msk.bf16.mxu0 %vm5977_vm7, %v2076_v48  ;;  %v5394_v48 = vld [vmem:[%s7786_s0 + $0x20] ss:$12 sps:$4 sm:$0xff]  }
 0x58b   : > { %4956 = vmatpush1.bf16.msk.msra.mxu0 %vm5991_vm9, %v1994_v62  ;;  %v1992_v5 = vpop.permute.xlu0 %1991  ;;  %v5390_v62 = vld [vmem:[%s7786_s0 + $0x8] ss:$12 sps:$4 sm:$0xff]  }
 0x58d   : > { %v2074_v58 = vpop.permute.xlu1 %2073 }
 0x58e   : > { %4958 = vmatprep.subr.msk.bf16.mxu0 %vm5977_vm7, %v2074_v58 }
 0x58f   : > { %4960 = vmatpush1.bf16.msk.msra.mxu0 %vm5991_vm9, %v1992_v5  ;;  %v1984_v57 = vpop.permute.xlu0 %1983 }
 0x591   : > { %v2066_v41 = vpop.permute.xlu1 %2065 }
 0x592   : > { %4962 = vmatprep.subr.msk.bf16.mxu0 %vm6005_vm11, %v2066_v41 }
 0x593   : > { %4964 = vmatpush1.bf16.msk.msra.mxu0 %vm6019_vm13, %v1984_v57  ;;  %v1982_v17 = vpop.permute.xlu0 %1981 }
 0x595   : > { %v2064_v46 = vpop.permute.xlu1 %2063 }
 0x596   : > { %4966 = vmatprep.subr.msk.bf16.mxu0 %vm6005_vm11, %v2064_v46 }
 0x597   : > { %4968 = vmatpush1.bf16.msk.msra.mxu0 %vm6019_vm13, %v1982_v17  ;;  %v2126_v6 = vpop.permute.xlu0 %2125 }
 0x598   : > { %4969 = vmatprep.subr.msk.bf16.mxu0 %vm1039_vm14, %v2126_v6 }
 0x599   : > { %v2044_v8 = vpop.permute.xlu1 %2043 }
 0x59a   : > { %v2049_v9 = vsel %vm951_vm15, %v2044_v8, 0 }
 0x59b   : > { %2228 = vmatpush2.bf16.msra.mxu0 %v2049_v9  ;;  %v2124_v60 = vpop.permute.xlu0 %2123 }
 0x59c   : > { %4970 = vmatprep.subr.msk.bf16.mxu0 %vm1039_vm14, %v2124_v60 }
 0x59d   : > { %v2042_v12 = vpop.permute.xlu1 %2041 }
 0x59e   : > { %v2046_v55 = vsel %vm951_vm15, %v2042_v12, 0 }
 0x59f   : > { %2230 = vmatpush2.bf16.msra.mxu0 %v2046_v55  ;;  %v2116_v4 = vpop.permute.xlu0 %2115 }
 0x5a0   : > { %4971 = vmatprep.subr.msk.bf16.mxu0 %vm1028_vm0, %v2116_v4 }
 0x5a1   : > { %v2034_v52 = vpop.permute.xlu1 %2033 }
 0x5a2   : > { %v2039_v10 = vsel %vm940_vm2, %v2034_v52, 0 }
 0x5a3   : > { %2232 = vmatpush2.bf16.msra.mxu0 %v2039_v10  ;;  %v2114_v45 = vpop.permute.xlu0 %2113 }
 0x5a4   : > { %4972 = vmatprep.subr.msk.bf16.mxu0 %vm1028_vm0, %v2114_v45 }
 0x5a5   : > { %v2032_v49 = vpop.permute.xlu1 %2031 }
 0x5a6   : > { %v2036_v53 = vsel %vm940_vm2, %v2032_v49, 0 }
 0x5a7   : > { %2234 = vmatpush2.bf16.msra.mxu0 %v2036_v53  ;;  %v2106_v14 = vpop.permute.xlu0 %2105 }
 0x5a8   : > { %4973 = vmatprep.subr.msk.bf16.mxu0 %vm929_vm4, %v2106_v14 }
 0x5a9   : > { %v2024_v13 = vpop.permute.xlu1 %2023 }
 0x5aa   : > { %v2029_v50 = vsel %vm929_vm4, %v2024_v13, 0 }
 0x5ab   : > { %2236 = vmatpush2.bf16.msra.mxu0 %v2029_v50  ;;  %v2104_v56 = vpop.permute.xlu0 %2103 }
 0x5ac   : > { %4974 = vmatprep.subr.msk.bf16.mxu0 %vm929_vm4, %v2104_v56 }
 0x5ad   : > { %v2022_v2 = vpop.permute.xlu1 %2021 }
 0x5ae   : > { %v2026_v0 = vsel %vm929_vm4, %v2022_v2, 0 }
 0x5af   : > { %2238 = vmatpush2.bf16.msra.mxu0 %v2026_v0  ;;  %v2136_v15 = vpop.permute.xlu0 %2135 }
 0x5b0   : > { %2239 = vmatprep.subr.bf16.mxu0 %v6470_v61  ;;  %4975 = vmatprep.subr.msk.bf16.mxu1 %vm1050_vm8, %v2136_v15  ;;  %v5387_v61 = vld [vmem:[%s7786_s0] ss:$12 sps:$4 sm:$0xff]  }
 0x5b1   : > { %v2054_v59 = vpop.permute.xlu1 %2053 }
 0x5b2   : > { %v2059_v54 = vsel %vm962_vm6, %v2054_v59, 0 }
 0x5b3   : > { %2240 = vmatpush2.bf16.msra.mxu0 %v6467_v11  ;;  %2277 = vmatpush1.bf16.msra.mxu1 %v2059_v54  ;;  %v2134_v1 = vpop.permute.xlu0 %2133  ;;  %v5391_v11 = vld [vmem:[%s7786_s0 + $0x1c] ss:$12 sps:$4 sm:$0xff]  }
 0x5b4   : > { %2241 = vmatprep.subr.bf16.mxu0 %v6480_v44  ;;  %4976 = vmatprep.subr.msk.bf16.mxu1 %vm1050_vm8, %v2134_v1  ;;  %v5393_v44 = vld [vmem:[%s7786_s0 + $0x18] ss:$12 sps:$4 sm:$0xff]  }
 0x5b5   : > { %v2052_v47 = vpop.permute.xlu1 %2051 }
 0x5b6   : > { %v2056_v3 = vsel %vm962_vm6, %v2052_v47, 0 }
 0x5b7   : > { %2242 = vmatpush2.bf16.msra.mxu0 %v6478_v51  ;;  %2279 = vmatpush1.bf16.msra.mxu1 %v2056_v3 }
 0x5ba   : > { %2244 = vmatmul.mubr.bf16.vlgmr.msra.gmra.mxu0 %v5387_v61  ;;  %4977 = vmatmul.mubr.msk.bf16.vlgmr.msra.gmra.mxu1 %vm1119_vm10, %v5390_v62 }
 0x5bb   : > { %2253 = vmatprep.mubr.bf16.mxu0 %v5391_v11  ;;  %2306 = vmatprep.mubr.bf16.mxu1 %v7781_v63 }
 0x5c0   : > { %v2173_v5 = vpop.permute.xlu0 %2172 }
 0x5c2   : > { %2254 = vmatmul.mubr.bf16.gmra.mxu0 %v5393_v44  ;;  %4978 = vmatmul.mubr.msk.bf16.gmra.mxu1 %vm1119_vm10, %v5394_v48  ;;  %v2168_v51 = vpop.permute.xlu1 %2167 }
 0x5c3   : > { %2610 = vmatprep.mubr.bf16.mxu0 %v7781_v63 }
 0x5c4   : > { %v2163_v8 = vpop.permute.xlu0 %2162 }
 0x5c6   : > { %v2158_v58 = vpop.permute.xlu1 %2157 }
 0x67a   : > { %v2245_v57 = vpop.f32.mrf.mxu0  ;;  %v2298_v41 = vpop.f32.mrf.mxu1 }
 0x67b   : > { %v2246_v17 = vadd.f32 %v2245_v57, %v2158_v58 }
 0x67c   : > { %v2247_v46 = vpop.f32.mrf.mxu0  ;;  %v2300_v6 = vpop.f32.mrf.mxu1 }
 0x67d   : > { %v2299_v9 = vadd.f32 %v2298_v41, %v2246_v17  ;;  %v2248_v44 = vadd.f32 %v2247_v46, %v2158_v58 }
 0x67e   : > { %v2249_v60 = vpop.f32.mrf.mxu0  ;;  %v2302_v12 = vpop.f32.mrf.mxu1 }
 0x67f   : > { %v2250_v55 = vadd.f32 %v2249_v60, %v2163_v8  ;;  %v2317_v10 = vmax.f32 %v2299_v9, 0.0 }
 0x680   : > { %v2251_v4 = vpop.f32.mrf.mxu0  ;;  %v2304_v52 = vpop.f32.mrf.mxu1 }
 0x681   : > { %v2303_v45 = vadd.f32 %v2302_v12, %v2250_v55  ;;  %v2325_v2 = vmul.f32 %v2317_v10, %v6126_v16  ;;  %v2252_v3 = vadd.f32 %v2251_v4, %v2163_v8  ;;  %v2301_v55 = vadd.f32 %v2300_v6, %v2248_v44 }
 0x682   : > { %v2255_v49 = vpop.f32.mrf.mxu0  ;;  %v2308_v53 = vpop.f32.mrf.mxu1 }
 0x683   : > { %v2319_v14 = vmax.f32 %v2303_v45, 0.0  ;;  %v2256_v13 = vadd.f32 %v2255_v49, %v2168_v51  ;;  %v2305_v60 = vadd.f32 %v2304_v52, %v2252_v3  ;;  %v2318_v58 = vmax.f32 %v2301_v55, 0.0 }
 0x684   : > { %v2257_v50 = vpop.f32.mrf.mxu0  ;;  %v2310_v56 = vpop.f32.mrf.mxu1 }
 0x685   : > { %v2327_v0 = vmul.f32 %v2319_v14, %v6126_v16  ;;  %v2309_v15 = vadd.f32 %v2308_v53, %v2256_v13  ;;  %v2258_v59 = vadd.f32 %v2257_v50, %v2168_v51  ;;  %v2320_v4 = vmax.f32 %v2305_v60, 0.0  ;;  %v5398_v13 = vld [vmem:[#allocation2 + $0x4] ss:$12 sps:$4 sm:$0x3f]  }
 0x686   : > { %v2259_v54 = vpop.f32.mrf.mxu0  ;;  %v2312_v1 = vpop.f32.mrf.mxu1  ;;  %v2326_v53 = vmul.f32 %v2318_v58, %v6128_v7  ;;  %v2635_v50 = vld [vmem:[%s7619_s12 + $0x10] sm:$0xff]  ;;  %2567 = vmatprep.mubr.bf16.mxu1 %v5398_v13  ;;  %v7792_v58 = vld [vmem:[#allocation22_spill] sm:$0xff]  ;;  %v7793_v13 = vld [vmem:[#allocation23_spill] sm:$0xff] }
 0x687   : > { %v6630_v47 = vpack.c.bf16 %v2327_v0, %v2325_v2  ;;  %v2260_v61 = vadd.f32 %v2259_v54, %v2173_v5  ;;  %v2321_v48 = vmax.f32 %v2309_v15, 0.0  ;;  %v2311_v57 = vadd.f32 %v2310_v56, %v2258_v59  ;;  %v2636_v56 = vld [vmem:[%s7619_s12 + $0x18] sm:$0xff]  ;;  %v2633_v2 = vld [vmem:[%s7619_s12] sm:$0xff]  ;;  %v2634_v0 = vld [vmem:[%s7619_s12 + $0x8] sm:$0xff] }
 0x688   : > { %v2261_v62 = vpop.f32.mrf.mxu0  ;;  %v2314_v17 = vpop.f32.mrf.mxu1  ;;  %v2328_v6 = vmul.f32 %v2320_v4, %v6128_v7 }
 0x689   : > { %v2262_v11 = vadd.f32 %v2261_v62, %v2173_v5  ;;  %2409 = vrot.lane.b32.xlu1 %v6630_v47, %s7779_s17  ;;  %v2313_v41 = vadd.f32 %v2312_v1, %v2260_v61  ;;  %v2329_v10 = vmul.f32 %v2321_v48, %v6126_v16  ;;  %v2322_v45 = vmax.f32 %v2311_v57, 0.0  ;;  %v5395_v48 = vld [vmem:[#allocation2 + $0x8] ss:$12 sps:$4 sm:$0x3f]   ;;  %v5401_v57 = vld [vmem:[%s7618_s11 + $0x4] ss:$12 sps:$4 sm:$0xff]  }
 0x68a   : > { %v6652_v14 = vpack.c.bf16 %v2328_v6, %v2326_v53 }
 0x68b   : > { %v2315_v9 = vadd.f32 %v2314_v17, %v2262_v11  ;;  %v2323_v12 = vmax.f32 %v2313_v41, 0.0  ;;  %v2330_v46 = vmul.f32 %v2322_v45, %v6128_v7 }
 0x68d   : > { %v2324_v51 = vmax.f32 %v2315_v9, 0.0  ;;  %v2331_v8 = vmul.f32 %v2323_v12, %v6126_v16 }
 0x68f   : > { %v6636_v5 = vpack.c.bf16 %v2331_v8, %v2329_v10  ;;  %v2332_v49 = vmul.f32 %v2324_v51, %v6128_v7 }
 0x691   : > { %2371 = vrot.lane.b32.xlu0 %v6636_v5, %s7782_s23  ;;  %2411 = vrot.lane.b32.xlu1 %v6636_v5, %s7779_s17  ;;  %v6645_v52 = vpack.c.bf16 %v2332_v49, %v2330_v46 }
 0x695   : > { %2493 = vrot.lane.b32.xlu0 %v6645_v52, %s7778_s10  ;;  %2453 = vrot.lane.b32.xlu1 %v6645_v52, %s7782_s23 }
 0x699   : > { %2491 = vrot.lane.b32.xlu0 %v6652_v14, %s7778_s10  ;;  %2451 = vrot.lane.b32.xlu1 %v6652_v14, %s7782_s23 }
 0x69d   : > { %2369 = vrot.lane.b32.xlu0 %v6630_v47, %s7782_s23  ;;  %2443 = vrot.lane.b32.xlu1 %v6645_v52, %s7767_s9 }
 0x6a1   : > { %2361 = vrot.lane.b32.xlu0 %v6636_v5, %s7783_s25  ;;  %2441 = vrot.lane.b32.xlu1 %v6652_v14, %s7767_s9 }
 0x6a5   : > { %2359 = vrot.lane.b32.xlu0 %v6630_v47, %s7783_s25  ;;  %2433 = vrot.lane.b32.xlu1 %v6645_v52, %s7769_s5 }
 0x6a9   : > { %2351 = vrot.lane.b32.xlu0 %v6636_v5, %s7768_s30  ;;  %2431 = vrot.lane.b32.xlu1 %v6652_v14, %s7769_s5 }
 0x6ad   : > { %2349 = vrot.lane.b32.xlu0 %v6630_v47, %s7768_s30  ;;  %2423 = vrot.lane.b32.xlu1 %v6645_v52, %s7771_s8 }
 0x6b1   : > { %2341 = vrot.lane.b32.xlu0 %v6636_v5, %s7770_s6  ;;  %2421 = vrot.lane.b32.xlu1 %v6652_v14, %s7771_s8 }
 0x6b5   : > { %2339 = vrot.lane.b32.xlu0 %v6630_v47, %s7770_s6  ;;  %2401 = vrot.lane.b32.xlu1 %v6636_v5, %s7773_s27 }
 0x6b9   : > { %2483 = vrot.lane.b32.xlu0 %v6645_v52, %s7772_s4  ;;  %2399 = vrot.lane.b32.xlu1 %v6630_v47, %s7773_s27 }
 0x6bd   : > { %2481 = vrot.lane.b32.xlu0 %v6652_v14, %s7772_s4  ;;  %2391 = vrot.lane.b32.xlu1 %v6636_v5, %s7775_s28 }
 0x6c1   : > { %2473 = vrot.lane.b32.xlu0 %v6645_v52, %s7774_s29  ;;  %2389 = vrot.lane.b32.xlu1 %v6630_v47, %s7775_s28 }
 0x6c5   : > { %2471 = vrot.lane.b32.xlu0 %v6652_v14, %s7774_s29  ;;  %2381 = vrot.lane.b32.xlu1 %v6636_v5, %s7776_s1 }
 0x6c9   : > { %2463 = vrot.lane.b32.xlu0 %v6645_v52, %s7776_s1  ;;  %2379 = vrot.lane.b32.xlu1 %v6630_v47, %s7776_s1 }
 0x6cd   : > { %2461 = vrot.lane.b32.xlu0 %v6652_v14, %s7776_s1  ;;  %2649 = vperm.xlu1 %5362, %v2635_v50   ;;  %v7794_v50 = vld [vmem:[#allocation24_spill] sm:$0xff] }
 0x6d1   : > { %2654 = vperm.xlu0 %5361, %v2636_v56   ;;  %2639 = vperm.xlu1 %5362, %v2633_v2  }
 0x6d5   : > { %2644 = vperm.xlu0 %5361, %v2634_v0   ;;  %v7795_v0 = vld [vmem:[#allocation25_spill] sm:$0xff] }
 0x6fb   : > { %v2410_v15 = vpop.permute.xlu1 %2409 }
 0x6fc   : > { %v2414_v44 = vsel %vm962_vm6, %v2410_v15, 0  ;;  %v7796_v15 = vld [vmem:[#allocation26_spill] sm:$0xff] }
 0x703   : > { %v2412_v59 = vpop.permute.xlu1 %2411  ;;  %v2372_v54 = vpop.permute.xlu0 %2371 }
 0x704   : > { %v2417_v61 = vsel %vm962_vm6, %v2412_v59, 0  ;;  %v7797_v59 = vld [vmem:[#allocation27_spill] sm:$0xff] }
 0x707   : > { %v2454_v1 = vpop.permute.xlu1 %2453  ;;  %v2494_v3 = vpop.permute.xlu0 %2493 }
 0x708   : > { %4983 = vmatprep.subr.msk.bf16.mxu1 %vm5928_vm1, %v2454_v1  ;;  %5020 = vmatprep.subr.msk.bf16.mxu0 %vm1050_vm8, %v2494_v3  ;;  %v5396_v1 = vld [vmem:[#allocation2] ss:$12 sps:$4 sm:$0x3f]   ;;  %v7799_v3 = vld [vmem:[#allocation16_spill] sm:$0xff] }
 0x709   : > { %4985 = vmatpush1.bf16.msk.msra.mxu1 %vm5928_vm1, %v2372_v54  ;;  %2591 = vmatpush1.bf16.msra.mxu0 %v2417_v61  ;;  %v7798_v54 = vld [vmem:[#allocation14_spill] sm:$0xff]  ;;  %v7800_v61 = vld [vmem:[#allocation28_spill] sm:$0xff] }
 0x70b   : > { %v2452_v62 = vpop.permute.xlu1 %2451  ;;  %v2492_v11 = vpop.permute.xlu0 %2491 }
 0x70c   : > { %4987 = vmatprep.subr.msk.bf16.mxu1 %vm5928_vm1, %v2452_v62  ;;  %5021 = vmatprep.subr.msk.bf16.mxu0 %vm1050_vm8, %v2492_v11  ;;  %v7802_v62 = vld [vmem:[#allocation17_spill] sm:$0xff]  ;;  %v7804_v11 = vld [vmem:[#allocation30_spill] sm:$0xff] }
 0x70d   : > { %2593 = vmatpush1.bf16.msra.mxu0 %v2414_v44  ;;  %v5402_v44 = vld [vmem:[%s7618_s11 + $0x8] ss:$12 sps:$4 sm:$0xff]  }
 0x70e   : > { %5030 = vmatprep.subr.msk.bf16.mxu0 %vm5928_vm1, %v5932_v19 }
 0x70f   : > { %v2444_v41 = vpop.permute.xlu1 %2443  ;;  %v2370_v17 = vpop.permute.xlu0 %2369 }
 0x710   : > { %4989 = vmatpush1.bf16.msk.msra.mxu1 %vm5928_vm1, %v2370_v17  ;;  %5022 = vmatmul.mubr.msk.bf16.vlgmr.msra.gmra.mxu0 %vm1119_vm10, %v5395_v48  ;;  %v7805_v48 = vld [vmem:[#allocation31_spill] sm:$0xff] }
 0x711   : > { %4991 = vmatprep.subr.msk.bf16.mxu1 %vm5949_vm3, %v2444_v41  ;;  %5032 = vmatpush1.bf16.msk.msra.mxu0 %vm5928_vm1, %v5939_v21  ;;  %v5406_v41 = vld [vmem:[%s7618_s11 + $0x20] ss:$12 sps:$4 sm:$0xff]  }
 0x712   : > { %5034 = vmatprep.subr.msk.bf16.mxu0 %vm5928_vm1, %v5934_v20  ;;  %2725 = vmatprep.mubr.bf16.mxu0 %v5401_v57  ;;  %v5405_v57 = vld [vmem:[%s7618_s11 + $0x18] ss:$12 sps:$4 sm:$0xff]  }
 0x713   : > { %v2442_v19 = vpop.permute.xlu1 %2441  ;;  %v2362_v9 = vpop.permute.xlu0 %2361 }
 0x714   : > { %4993 = vmatpush1.bf16.msk.msra.mxu1 %vm5963_vm5, %v2362_v9 }
 0x715   : > { %4995 = vmatprep.subr.msk.bf16.mxu1 %vm5949_vm3, %v2442_v19  ;;  %5036 = vmatpush1.bf16.msk.msra.mxu0 %vm5928_vm1, %v5941_v22 }
 0x716   : > { %5038 = vmatprep.subr.msk.bf16.mxu0 %vm5949_vm3, %v5953_v24 }
 0x717   : > { %v2434_v21 = vpop.permute.xlu1 %2433  ;;  %v2360_v60 = vpop.permute.xlu0 %2359 }
 0x718   : > { %4997 = vmatpush1.bf16.msk.msra.mxu1 %vm5963_vm5, %v2360_v60 }
 0x719   : > { %4999 = vmatprep.subr.msk.bf16.mxu1 %vm5977_vm7, %v2434_v21  ;;  %5040 = vmatpush1.bf16.msk.msra.mxu0 %vm5963_vm5, %v5955_v25 }
 0x71a   : > { %5042 = vmatprep.subr.msk.bf16.mxu0 %vm5949_vm3, %v5967_v27 }
 0x71b   : > { %v2432_v20 = vpop.permute.xlu1 %2431  ;;  %v2352_v22 = vpop.permute.xlu0 %2351 }
 0x71c   : > { %5001 = vmatpush1.bf16.msk.msra.mxu1 %vm5991_vm9, %v2352_v22 }
 0x71d   : > { %5003 = vmatprep.subr.msk.bf16.mxu1 %vm5977_vm7, %v2432_v20  ;;  %5044 = vmatpush1.bf16.msk.msra.mxu0 %vm5963_vm5, %v5969_v28 }
 0x71e   : > { %5046 = vmatprep.subr.msk.bf16.mxu0 %vm5977_vm7, %v5981_v30 }
 0x71f   : > { %v2424_v24 = vpop.permute.xlu1 %2423  ;;  %v2350_v25 = vpop.permute.xlu0 %2349 }
 0x720   : > { %5005 = vmatpush1.bf16.msk.msra.mxu1 %vm5991_vm9, %v2350_v25 }
 0x721   : > { %5007 = vmatprep.subr.msk.bf16.mxu1 %vm6005_vm11, %v2424_v24  ;;  %5048 = vmatpush1.bf16.msk.msra.mxu0 %vm5991_vm9, %v5983_v31 }
 0x722   : > { %5050 = vmatprep.subr.msk.bf16.mxu0 %vm5977_vm7, %v5995_v33 }
 0x723   : > { %v2422_v27 = vpop.permute.xlu1 %2421  ;;  %v2342_v28 = vpop.permute.xlu0 %2341 }
 0x724   : > { %5009 = vmatpush1.bf16.msk.msra.mxu1 %vm6019_vm13, %v2342_v28 }
 0x725   : > { %5011 = vmatprep.subr.msk.bf16.mxu1 %vm6005_vm11, %v2422_v27  ;;  %5052 = vmatpush1.bf16.msk.msra.mxu0 %vm5991_vm9, %v5997_v34 }
 0x726   : > { %5054 = vmatprep.subr.msk.bf16.mxu0 %vm6005_vm11, %v6009_v36 }
 0x727   : > { %v2402_v30 = vpop.permute.xlu1 %2401  ;;  %v2340_v31 = vpop.permute.xlu0 %2339 }
 0x728   : > { %5013 = vmatpush1.bf16.msk.msra.mxu1 %vm6019_vm13, %v2340_v31  ;;  %v2407_v34 = vsel %vm951_vm15, %v2402_v30, 0 }
 0x729   : > { %5056 = vmatpush1.bf16.msk.msra.mxu0 %vm6019_vm13, %v6011_v37 }
 0x72a   : > { %5058 = vmatprep.subr.msk.bf16.mxu0 %vm6005_vm11, %v6023_v39  ;;  %v7788_v39 = vld [vmem:[#allocation18_spill] sm:$0xff] }
 0x72b   : > { %v2400_v33 = vpop.permute.xlu1 %2399  ;;  %v2484_v12 = vpop.permute.xlu0 %2483 }
 0x72c   : > { %5014 = vmatprep.subr.msk.bf16.mxu1 %vm1039_vm14, %v2484_v12  ;;  %v2404_v51 = vsel %vm951_vm15, %v2400_v33, 0 }
 0x72d   : > { %2552 = vmatpush2.bf16.msra.mxu1 %v2407_v34  ;;  %5060 = vmatpush1.bf16.msk.msra.mxu0 %vm6019_vm13, %v6025_v40  ;;  %v7789_v40 = vld [vmem:[#allocation19_spill] sm:$0xff] }
 0x72e   : > { %5061 = vmatprep.subr.msk.bf16.mxu0 %vm1039_vm14, %v6033_v42  ;;  %v7790_v42 = vld [vmem:[#allocation20_spill] sm:$0xff] }
 0x72f   : > { %v2392_v36 = vpop.permute.xlu1 %2391  ;;  %v2482_v37 = vpop.permute.xlu0 %2481 }
 0x730   : > { %5015 = vmatprep.subr.msk.bf16.mxu1 %vm1039_vm14, %v2482_v37  ;;  %v2397_v45 = vsel %vm940_vm2, %v2392_v36, 0 }
 0x731   : > { %2554 = vmatpush2.bf16.msra.mxu1 %v2404_v51  ;;  %2710 = vmatpush2.bf16.msra.mxu0 %v6041_v43  ;;  %v7791_v43 = vld [vmem:[#allocation21_spill] sm:$0xff] }
 0x732   : > { %5062 = vmatprep.subr.msk.bf16.mxu0 %vm1039_vm14, %v7788_v39 }
 0x733   : > { %v2390_v55 = vpop.permute.xlu1 %2389  ;;  %v2474_v10 = vpop.permute.xlu0 %2473 }
 0x734   : > { %5016 = vmatprep.subr.msk.bf16.mxu1 %vm1028_vm0, %v2474_v10  ;;  %v2394_v49 = vsel %vm940_vm2, %v2390_v55, 0 }
 0x735   : > { %2556 = vmatpush2.bf16.msra.mxu1 %v2397_v45  ;;  %2712 = vmatpush2.bf16.msra.mxu0 %v7789_v40 }
 0x736   : > { %5063 = vmatprep.subr.msk.bf16.mxu0 %vm1028_vm0, %v7790_v42 }
 0x737   : > { %v2382_v8 = vpop.permute.xlu1 %2381  ;;  %v2472_v4 = vpop.permute.xlu0 %2471 }
 0x738   : > { %5017 = vmatprep.subr.msk.bf16.mxu1 %vm1028_vm0, %v2472_v4  ;;  %v2387_v6 = vsel %vm929_vm4, %v2382_v8, 0 }
 0x739   : > { %2558 = vmatpush2.bf16.msra.mxu1 %v2394_v49  ;;  %2714 = vmatpush2.bf16.msra.mxu0 %v7791_v43 }
 0x73a   : > { %5064 = vmatprep.subr.msk.bf16.mxu0 %vm1028_vm0, %v7792_v58 }
 0x73b   : > { %v2464_v46 = vpop.permute.xlu0 %2463  ;;  %v2380_v53 = vpop.permute.xlu1 %2379 }
 0x73c   : > { %5018 = vmatprep.subr.msk.bf16.mxu1 %vm929_vm4, %v2464_v46  ;;  %v2384_v2 = vsel %vm929_vm4, %v2380_v53, 0 }
 0x73d   : > { %2560 = vmatpush2.bf16.msra.mxu1 %v2387_v6  ;;  %2716 = vmatpush2.bf16.msra.mxu0 %v7793_v13 }
 0x73e   : > { %5065 = vmatprep.subr.msk.bf16.mxu0 %vm929_vm4, %v7794_v50 }
 0x73f   : > { %v2462_v56 = vpop.permute.xlu0 %2461 }
 0x740   : > { %5019 = vmatprep.subr.msk.bf16.mxu1 %vm929_vm4, %v2462_v56 }
 0x741   : > { %2562 = vmatpush2.bf16.msra.mxu1 %v2384_v2  ;;  %2718 = vmatpush2.bf16.msra.mxu0 %v7795_v0 }
 0x742   : > { %2563 = vmatprep.subr.bf16.mxu1 %v6645_v52  ;;  %5066 = vmatprep.subr.msk.bf16.mxu0 %vm929_vm4, %v7796_v15  ;;  %v7801_v52 = vld [vmem:[#allocation15_spill] sm:$0xff] }
 0x745   : > { %2564 = vmatpush2.bf16.msra.mxu1 %v6636_v5  ;;  %2720 = vmatpush2.bf16.msra.mxu0 %v7797_v59  ;;  %v5399_v5 = vld [vmem:[%s7618_s11] ss:$12 sps:$4 sm:$0xff]  }
 0x746   : > { %2565 = vmatprep.subr.bf16.mxu1 %v6652_v14  ;;  %2721 = vmatprep.subr.bf16.mxu0 %v7798_v54  ;;  %v7803_v14 = vld [vmem:[#allocation29_spill] sm:$0xff] }
 0x748   : > { %v2650_v34 = vpop.permute.xlu1 %2649 }
 0x749   : > { %2566 = vmatpush2.bf16.msra.mxu1 %v6630_v47  ;;  %2722 = vmatpush2.bf16.msra.mxu0 %v7799_v3  ;;  %v5403_v47 = vld [vmem:[%s7618_s11 + $0x1c] ss:$12 sps:$4 sm:$0xff]  }
 0x74a   : > { %5067 = vmatprep.subr.msk.bf16.mxu1 %vm1050_vm8, %v7800_v61  ;;  %2723 = vmatprep.subr.bf16.mxu0 %v7801_v52 }
 0x74c   : > { %2568 = vmatmul.mubr.bf16.vlgmr.msra.gmra.mxu1 %v5396_v1  ;;  %v2655_v31 = vpop.permute.xlu0 %2654  ;;  %v2640_v42 = vpop.permute.xlu1 %2639 }
 0x74d   : > { %2724 = vmatpush2.bf16.msra.mxu0 %v7802_v62  ;;  %2759 = vmatpush1.bf16.msra.mxu1 %v7803_v14 }
 0x74e   : > { %5068 = vmatprep.subr.msk.bf16.mxu1 %vm1050_vm8, %v7804_v11  ;;  %2778 = vmatprep.mubr.bf16.mxu1 %v7781_v63 }
 0x750   : > { %2726 = vmatmul.mubr.bf16.vlgmr.msra.gmra.mxu0 %v5399_v5  ;;  %v2645_v55 = vpop.permute.xlu0 %2644 }
 0x751   : > { %2761 = vmatpush1.bf16.msra.mxu1 %v7805_v48  ;;  %2735 = vmatprep.mubr.bf16.mxu0 %v5403_v47 }
 0x754   : > { %5069 = vmatmul.mubr.msk.bf16.vlgmr.msra.gmra.mxu1 %vm1119_vm10, %v5402_v44 }
 0x755   : > { %2788 = vmatprep.mubr.bf16.mxu1 %v7781_v63 }
 0x758   : > { %2736 = vmatmul.mubr.bf16.gmra.mxu0 %v5405_v57 }
 0x759   : > { %3136 = vmatprep.mubr.bf16.mxu0 %v7781_v63 }
 0x75c   : > { %5070 = vmatmul.mubr.msk.bf16.gmra.mxu1 %vm1119_vm10, %v5406_v41 }
 0x7d0   : > { %v6872_v17 = vpop.f32.mrf.mxu0 }
 0x7d2   : > { %v6874_v19 = vpop.f32.mrf.mxu0 }
 0x7d4   : > { %v6876_v9 = vpop.f32.mrf.mxu0 }
 0x7d6   : > { %v6880_v60 = vpop.f32.mrf.mxu0 }
 0x80c   : > { %v6878_v21 = vpop.f32.mrf.mxu1 }
 0x80e   : > { %v6882_v20 = vpop.f32.mrf.mxu1 }
 0x810   : > { %v6884_v22 = vpop.f32.mrf.mxu1  ;;  %v2727_v24 = vpop.f32.mrf.mxu0 }
 0x811   : > { %v2728_v49 = vadd.f32 %v2727_v24, %v2640_v42 }
 0x812   : > { %v6886_v25 = vpop.f32.mrf.mxu1  ;;  %v2729_v27 = vpop.f32.mrf.mxu0 }
 0x813   : > { %v2730_v50 = vadd.f32 %v2729_v27, %v2640_v42 }
 0x814   : > { %v2731_v28 = vpop.f32.mrf.mxu0  ;;  %v2780_v30 = vpop.f32.mrf.mxu1 }
 0x815   : > { %v2732_v8 = vadd.f32 %v2731_v28, %v2645_v55  ;;  %v2781_v56 = vadd.f32 %v2780_v30, %v2728_v49 }
 0x816   : > { %v2733_v33 = vpop.f32.mrf.mxu0  ;;  %v2782_v12 = vpop.f32.mrf.mxu1 }
 0x817   : > { %v2734_v6 = vadd.f32 %v2733_v33, %v2645_v55  ;;  %v2783_v3 = vadd.f32 %v2782_v12, %v2730_v50  ;;  %v2799_v47 = vmax.f32 %v2781_v56, 0.0  ;;  %v2993_v55 = vld [vmem:[%s7621_s14 + $0x10] sm:$0xff] }
 0x818   : > { %v2737_v36 = vpop.f32.mrf.mxu0  ;;  %v2784_v37 = vpop.f32.mrf.mxu1 }
 0x819   : > { %v2738_v10 = vadd.f32 %v2737_v36, %v2650_v34  ;;  %v2785_v53 = vadd.f32 %v2784_v37, %v2732_v8  ;;  %v2800_v41 = vmax.f32 %v2783_v3, 0.0 }
 0x81a   : > { %v2739_v51 = vpop.f32.mrf.mxu0  ;;  %v2786_v39 = vpop.f32.mrf.mxu1 }
 0x81b   : > { %v2740_v43 = vadd.f32 %v2739_v51, %v2650_v34  ;;  %v2787_v15 = vadd.f32 %v2786_v39, %v2734_v6  ;;  %v2801_v52 = vmax.f32 %v2785_v53, 0.0  ;;  %v2808_v34 = vmul.f32 %v2800_v41, %v6128_v7  ;;  %v5409_v51 = vld [vmem:[%s7620_s13 + $0x4] ss:$12 sps:$4 sm:$0xff]   ;;  %v2994_v39 = vld [vmem:[%s7621_s14 + $0x18] sm:$0xff] }
 0x81c   : > { %v2741_v45 = vpop.f32.mrf.mxu0  ;;  %v2790_v40 = vpop.f32.mrf.mxu1  ;;  %3083 = vmatprep.mubr.bf16.mxu1 %v5409_v51 }
 0x81d   : > { %v2791_v4 = vadd.f32 %v2790_v40, %v2738_v10  ;;  %v2742_v13 = vadd.f32 %v2741_v45, %v2655_v31  ;;  %v2802_v11 = vmax.f32 %v2787_v15, 0.0  ;;  %v2809_v24 = vmul.f32 %v2801_v52, %v6126_v16  ;;  %v2992_v10 = vld [vmem:[%s7621_s14 + $0x8] sm:$0xff]  ;;  %v2991_v45 = vld [vmem:[%s7621_s14] sm:$0xff] }
 0x81e   : > { %v2743_v58 = vpop.f32.mrf.mxu0  ;;  %v2792_v46 = vpop.f32.mrf.mxu1 }
 0x81f   : > { %v2793_v2 = vadd.f32 %v2792_v46, %v2740_v43  ;;  %v2803_v59 = vmax.f32 %v2791_v4, 0.0  ;;  %v2744_v54 = vadd.f32 %v2743_v58, %v2655_v31  ;;  %v2807_v31 = vmul.f32 %v2799_v47, %v6126_v16 }
 0x820   : > { %v2794_v0 = vpop.f32.mrf.mxu1  ;;  %v2810_v33 = vmul.f32 %v2802_v11, %v6128_v7 }
 0x821   : > { %v2795_v1 = vadd.f32 %v2794_v0, %v2742_v13  ;;  %v2804_v5 = vmax.f32 %v2793_v2, 0.0  ;;  %v2811_v44 = vmul.f32 %v2803_v59, %v6126_v16  ;;  %v6902_v36 = vpack.c.bf16 %v2809_v24, %v2807_v31 }
 0x822   : > { %v2796_v61 = vpop.f32.mrf.mxu1  ;;  %v6906_v37 = vpack.c.bf16 %v2810_v33, %v2808_v34 }
 0x823   : > { %v2805_v62 = vmax.f32 %v2795_v1, 0.0  ;;  %v2797_v14 = vadd.f32 %v2796_v61, %v2744_v54  ;;  %v2812_v27 = vmul.f32 %v2804_v5, %v6128_v7 }
 0x825   : > { %v2813_v48 = vmul.f32 %v2805_v62, %v6126_v16  ;;  %v2806_v57 = vmax.f32 %v2797_v14, 0.0 }
 0x827   : > { %v6892_v28 = vpack.c.bf16 %v2813_v48, %v2811_v44  ;;  %v2814_v30 = vmul.f32 %v2806_v57, %v6128_v7 }
 0x829   : > { %v6897_v12 = vpack.c.bf16 %v2814_v30, %v2812_v27  ;;  %2853 = vrot.lane.b32.xlu0 %v6892_v28, %s7782_s23 }
 0x82b   : > { %2935 = vrot.lane.b32.xlu1 %v6897_v12, %s7782_s23 }
 0x82d   : > { %2851 = vrot.lane.b32.xlu0 %v6902_v36, %s7782_s23 }
 0x82f   : > { %2933 = vrot.lane.b32.xlu1 %v6906_v37, %s7782_s23 }
 0x831   : > { %2843 = vrot.lane.b32.xlu0 %v6892_v28, %s7783_s25 }
 0x833   : > { %2925 = vrot.lane.b32.xlu1 %v6897_v12, %s7767_s9 }
 0x835   : > { %2841 = vrot.lane.b32.xlu0 %v6902_v36, %s7783_s25 }
 0x837   : > { %2923 = vrot.lane.b32.xlu1 %v6906_v37, %s7767_s9 }
 0x839   : > { %2833 = vrot.lane.b32.xlu0 %v6892_v28, %s7768_s30 }
 0x83b   : > { %2915 = vrot.lane.b32.xlu1 %v6897_v12, %s7769_s5 }
 0x83d   : > { %2831 = vrot.lane.b32.xlu0 %v6902_v36, %s7768_s30 }
 0x83f   : > { %2913 = vrot.lane.b32.xlu1 %v6906_v37, %s7769_s5 }
 0x841   : > { %2823 = vrot.lane.b32.xlu0 %v6892_v28, %s7770_s6 }
 0x843   : > { %2905 = vrot.lane.b32.xlu1 %v6897_v12, %s7771_s8 }
 0x845   : > { %2821 = vrot.lane.b32.xlu0 %v6902_v36, %s7770_s6 }
 0x847   : > { %2903 = vrot.lane.b32.xlu1 %v6906_v37, %s7771_s8 }
 0x849   : > { %2965 = vrot.lane.b32.xlu0 %v6897_v12, %s7772_s4 }
 0x84b   : > { %2883 = vrot.lane.b32.xlu1 %v6892_v28, %s7773_s27 }
 0x84d   : > { %2963 = vrot.lane.b32.xlu0 %v6906_v37, %s7772_s4 }
 0x84f   : > { %2881 = vrot.lane.b32.xlu1 %v6902_v36, %s7773_s27 }
 0x851   : > { %2955 = vrot.lane.b32.xlu0 %v6897_v12, %s7774_s29 }
 0x853   : > { %2873 = vrot.lane.b32.xlu1 %v6892_v28, %s7775_s28 }
 0x855   : > { %2953 = vrot.lane.b32.xlu0 %v6906_v37, %s7774_s29 }
 0x857   : > { %2871 = vrot.lane.b32.xlu1 %v6902_v36, %s7775_s28 }
 0x859   : > { %2945 = vrot.lane.b32.xlu0 %v6897_v12, %s7776_s1 }
 0x85b   : > { %2863 = vrot.lane.b32.xlu1 %v6892_v28, %s7776_s1 }
 0x85d   : > { %2943 = vrot.lane.b32.xlu0 %v6906_v37, %s7776_s1 }
 0x85f   : > { %2861 = vrot.lane.b32.xlu1 %v6902_v36, %s7776_s1 }
 0x861   : > { %2975 = vrot.lane.b32.xlu0 %v6897_v12, %s7778_s10 }
 0x863   : > { %2893 = vrot.lane.b32.xlu1 %v6892_v28, %s7779_s17 }
 0x865   : > { %2973 = vrot.lane.b32.xlu0 %v6906_v37, %s7778_s10 }
 0x867   : > { %2891 = vrot.lane.b32.xlu1 %v6902_v36, %s7779_s17 }
 0x869   : > { %3012 = vperm.xlu0 %5361, %v2994_v39  }
 0x86b   : > { %3007 = vperm.xlu1 %5362, %v2993_v55  }
 0x86d   : > { %3002 = vperm.xlu0 %5361, %v2992_v10   ;;  %v5410_v10 = vld [vmem:[%s7620_s13 + $0x8] ss:$12 sps:$4 sm:$0xff]  }
 0x86f   : > { %2997 = vperm.xlu1 %5362, %v2991_v45   ;;  %v5414_v45 = vld [vmem:[%s7620_s13 + $0x20] ss:$12 sps:$4 sm:$0xff]  }
 0x89b   : > { %v2854_v40 = vpop.permute.xlu0 %2853 }
 0x89d   : > { %v2936_v42 = vpop.permute.xlu1 %2935 }
 0x89e   : > { %5078 = vmatprep.subr.msk.bf16.mxu1 %vm5928_vm1, %v2936_v42 }
 0x89f   : > { %5080 = vmatpush1.bf16.msk.msra.mxu1 %vm5928_vm1, %v2854_v40  ;;  %v2852_v8 = vpop.permute.xlu0 %2851 }
 0x8a1   : > { %v2934_v4 = vpop.permute.xlu1 %2933 }
 0x8a2   : > { %5082 = vmatprep.subr.msk.bf16.mxu1 %vm5928_vm1, %v2934_v4 }
 0x8a3   : > { %5084 = vmatpush1.bf16.msk.msra.mxu1 %vm5928_vm1, %v2852_v8  ;;  %v2844_v49 = vpop.permute.xlu0 %2843 }
 0x8a5   : > { %v2926_v43 = vpop.permute.xlu1 %2925 }
 0x8a6   : > { %5086 = vmatprep.subr.msk.bf16.mxu1 %vm5949_vm3, %v2926_v43 }
 0x8a7   : > { %5088 = vmatpush1.bf16.msk.msra.mxu1 %vm5963_vm5, %v2844_v49  ;;  %v2842_v58 = vpop.permute.xlu0 %2841 }
 0x8a9   : > { %v2924_v46 = vpop.permute.xlu1 %2923 }
 0x8aa   : > { %5090 = vmatprep.subr.msk.bf16.mxu1 %vm5949_vm3, %v2924_v46 }
 0x8ab   : > { %5092 = vmatpush1.bf16.msk.msra.mxu1 %vm5963_vm5, %v2842_v58  ;;  %v2834_v6 = vpop.permute.xlu0 %2833 }
 0x8ad   : > { %v2916_v53 = vpop.permute.xlu1 %2915 }
 0x8ae   : > { %5094 = vmatprep.subr.msk.bf16.mxu1 %vm5977_vm7, %v2916_v53 }
 0x8af   : > { %5096 = vmatpush1.bf16.msk.msra.mxu1 %vm5991_vm9, %v2834_v6  ;;  %v2832_v13 = vpop.permute.xlu0 %2831 }
 0x8b1   : > { %v2914_v50 = vpop.permute.xlu1 %2913 }
 0x8b2   : > { %5098 = vmatprep.subr.msk.bf16.mxu1 %vm5977_vm7, %v2914_v50 }
 0x8b3   : > { %5100 = vmatpush1.bf16.msk.msra.mxu1 %vm5991_vm9, %v2832_v13  ;;  %v2824_v56 = vpop.permute.xlu0 %2823 }
 0x8b5   : > { %v2906_v2 = vpop.permute.xlu1 %2905 }
 0x8b6   : > { %5102 = vmatprep.subr.msk.bf16.mxu1 %vm6005_vm11, %v2906_v2 }
 0x8b7   : > { %5104 = vmatpush1.bf16.msk.msra.mxu1 %vm6019_vm13, %v2824_v56  ;;  %v2822_v0 = vpop.permute.xlu0 %2821 }
 0x8b9   : > { %v2904_v15 = vpop.permute.xlu1 %2903 }
 0x8ba   : > { %5106 = vmatprep.subr.msk.bf16.mxu1 %vm6005_vm11, %v2904_v15 }
 0x8bb   : > { %5108 = vmatpush1.bf16.msk.msra.mxu1 %vm6019_vm13, %v2822_v0  ;;  %v2966_v59 = vpop.permute.xlu0 %2965 }
 0x8bc   : > { %5109 = vmatprep.subr.msk.bf16.mxu1 %vm1039_vm14, %v2966_v59 }
 0x8bd   : > { %v2884_v54 = vpop.permute.xlu1 %2883 }
 0x8be   : > { %v2889_v1 = vsel %vm951_vm15, %v2884_v54, 0 }
 0x8bf   : > { %3068 = vmatpush2.bf16.msra.mxu1 %v2889_v1  ;;  %v2964_v3 = vpop.permute.xlu0 %2963 }
 0x8c0   : > { %5110 = vmatprep.subr.msk.bf16.mxu1 %vm1039_vm14, %v2964_v3 }
 0x8c1   : > { %v2882_v61 = vpop.permute.xlu1 %2881 }
 0x8c2   : > { %v2886_v52 = vsel %vm951_vm15, %v2882_v61, 0 }
 0x8c3   : > { %3070 = vmatpush2.bf16.msra.mxu1 %v2886_v52  ;;  %v2956_v5 = vpop.permute.xlu0 %2955 }
 0x8c4   : > { %5111 = vmatprep.subr.msk.bf16.mxu1 %vm1028_vm0, %v2956_v5 }
 0x8c5   : > { %v2874_v62 = vpop.permute.xlu1 %2873 }
 0x8c6   : > { %v2879_v14 = vsel %vm940_vm2, %v2874_v62, 0 }
 0x8c7   : > { %3072 = vmatpush2.bf16.msra.mxu1 %v2879_v14  ;;  %v2954_v47 = vpop.permute.xlu0 %2953 }
 0x8c8   : > { %5112 = vmatprep.subr.msk.bf16.mxu1 %vm1028_vm0, %v2954_v47 }
 0x8c9   : > { %v2872_v11 = vpop.permute.xlu1 %2871 }
 0x8ca   : > { %v2876_v44 = vsel %vm940_vm2, %v2872_v11, 0 }
 0x8cb   : > { %3074 = vmatpush2.bf16.msra.mxu1 %v2876_v44  ;;  %v2946_v48 = vpop.permute.xlu0 %2945 }
 0x8cc   : > { %5113 = vmatprep.subr.msk.bf16.mxu1 %vm929_vm4, %v2946_v48 }
 0x8cd   : > { %v2864_v57 = vpop.permute.xlu1 %2863 }
 0x8ce   : > { %v2869_v41 = vsel %vm929_vm4, %v2864_v57, 0 }
 0x8cf   : > { %3076 = vmatpush2.bf16.msra.mxu1 %v2869_v41  ;;  %v2944_v24 = vpop.permute.xlu0 %2943 }
 0x8d0   : > { %5114 = vmatprep.subr.msk.bf16.mxu1 %vm929_vm4, %v2944_v24 }
 0x8d1   : > { %v2862_v27 = vpop.permute.xlu1 %2861 }
 0x8d2   : > { %v2866_v30 = vsel %vm929_vm4, %v2862_v27, 0 }
 0x8d3   : > { %3078 = vmatpush2.bf16.msra.mxu1 %v2866_v30  ;;  %v2976_v31 = vpop.permute.xlu0 %2975 }
 0x8d4   : > { %3079 = vmatprep.subr.bf16.mxu1 %v6897_v12  ;;  %5115 = vmatprep.subr.msk.bf16.mxu0 %vm1050_vm8, %v2976_v31  ;;  %v5407_v12 = vld [vmem:[%s7620_s13] ss:$12 sps:$4 sm:$0xff]  }
 0x8d5   : > { %v2894_v33 = vpop.permute.xlu1 %2893 }
 0x8d6   : > { %v2899_v34 = vsel %vm962_vm6, %v2894_v33, 0 }
 0x8d7   : > { %3080 = vmatpush2.bf16.msra.mxu1 %v6892_v28  ;;  %3117 = vmatpush1.bf16.msra.mxu0 %v2899_v34  ;;  %v2974_v51 = vpop.permute.xlu0 %2973  ;;  %v5411_v28 = vld [vmem:[%s7620_s13 + $0x1c] ss:$12 sps:$4 sm:$0xff]  }
 0x8d8   : > { %3081 = vmatprep.subr.bf16.mxu1 %v6906_v37  ;;  %5116 = vmatprep.subr.msk.bf16.mxu0 %vm1050_vm8, %v2974_v51  ;;  %v5413_v37 = vld [vmem:[%s7620_s13 + $0x18] ss:$12 sps:$4 sm:$0xff]  }
 0x8d9   : > { %v2892_v39 = vpop.permute.xlu1 %2891 }
 0x8da   : > { %v2896_v55 = vsel %vm962_vm6, %v2892_v39, 0 }
 0x8db   : > { %3082 = vmatpush2.bf16.msra.mxu1 %v6902_v36  ;;  %3119 = vmatpush1.bf16.msra.mxu0 %v2896_v55 }
 0x8de   : > { %3084 = vmatmul.mubr.bf16.vlgmr.msra.gmra.mxu1 %v5407_v12  ;;  %5117 = vmatmul.mubr.msk.bf16.vlgmr.msra.gmra.mxu0 %vm1119_vm10, %v5410_v10 }
 0x8df   : > { %3093 = vmatprep.mubr.bf16.mxu1 %v5411_v28  ;;  %3146 = vmatprep.mubr.bf16.mxu0 %v7781_v63 }
 0x8e4   : > { %v3013_v4 = vpop.permute.xlu0 %3012 }
 0x8e6   : > { %3094 = vmatmul.mubr.bf16.gmra.mxu1 %v5413_v37  ;;  %5118 = vmatmul.mubr.msk.bf16.gmra.mxu0 %vm1119_vm10, %v5414_v45  ;;  %v3008_v58 = vpop.permute.xlu1 %3007 }
 0x8e7   : > { %3494 = vmatprep.mubr.bf16.mxu1 %v7781_v63 }
 0x8e8   : > { %v3003_v50 = vpop.permute.xlu0 %3002 }
 0x8ea   : > { %v2998_v59 = vpop.permute.xlu1 %2997 }
 0x99e   : > { %v3085_v36 = vpop.f32.mrf.mxu1  ;;  %v3138_v40 = vpop.f32.mrf.mxu0 }
 0x99f   : > { %v3086_v3 = vadd.f32 %v3085_v36, %v2998_v59 }
 0x9a0   : > { %v3087_v42 = vpop.f32.mrf.mxu1  ;;  %v3140_v8 = vpop.f32.mrf.mxu0 }
 0x9a1   : > { %v3088_v62 = vadd.f32 %v3087_v42, %v2998_v59  ;;  %v3139_v41 = vadd.f32 %v3138_v40, %v3086_v3 }
 0x9a2   : > { %v3089_v49 = vpop.f32.mrf.mxu1  ;;  %v3142_v43 = vpop.f32.mrf.mxu0 }
 0x9a3   : > { %v3090_v2 = vadd.f32 %v3089_v49, %v3003_v50  ;;  %v3141_v31 = vadd.f32 %v3140_v8, %v3088_v62  ;;  %v3157_v10 = vmax.f32 %v3139_v41, 0.0 }
 0x9a4   : > { %v3091_v46 = vpop.f32.mrf.mxu1  ;;  %v3144_v6 = vpop.f32.mrf.mxu0 }
 0x9a5   : > { %v3092_v54 = vadd.f32 %v3091_v46, %v3003_v50  ;;  %v3143_v47 = vadd.f32 %v3142_v43, %v3090_v2  ;;  %v3158_v45 = vmax.f32 %v3141_v31, 0.0  ;;  %v3165_v43 = vmul.f32 %v3157_v10, %v6126_v16  ;;  %v3351_v50 = vld [vmem:[%s7623_s16 + $0x10] sm:$0xff]  ;;  %v3349_v2 = vld [vmem:[%s7623_s16] sm:$0xff] }
 0x9a6   : > { %v3095_v53 = vpop.f32.mrf.mxu1  ;;  %v3148_v13 = vpop.f32.mrf.mxu0 }
 0x9a7   : > { %v3096_v56 = vadd.f32 %v3095_v53, %v3008_v58  ;;  %v3145_v48 = vadd.f32 %v3144_v6, %v3092_v54  ;;  %v3159_v51 = vmax.f32 %v3143_v47, 0.0  ;;  %v5417_v53 = vld [vmem:[%s7622_s15 + $0x4] ss:$12 sps:$4 sm:$0xff]  }
 0x9a8   : > { %v3097_v0 = vpop.f32.mrf.mxu1  ;;  %v3150_v15 = vpop.f32.mrf.mxu0  ;;  %3441 = vmatprep.mubr.bf16.mxu0 %v5417_v53 }
 0x9a9   : > { %v3098_v1 = vadd.f32 %v3097_v0, %v3008_v58  ;;  %v3149_v61 = vadd.f32 %v3148_v13, %v3096_v56  ;;  %v3160_v55 = vmax.f32 %v3145_v48, 0.0  ;;  %v3167_v42 = vmul.f32 %v3159_v51, %v6126_v16  ;;  %v3352_v13 = vld [vmem:[%s7623_s16 + $0x18] sm:$0xff]  ;;  %v3350_v56 = vld [vmem:[%s7623_s16 + $0x8] sm:$0xff] }
 0x9aa   : > { %v3099_v52 = vpop.f32.mrf.mxu1  ;;  %v3152_v5 = vpop.f32.mrf.mxu0  ;;  %v3166_v58 = vmul.f32 %v3158_v45, %v6128_v7 }
 0x9ab   : > { %v3151_v14 = vadd.f32 %v3150_v15, %v3098_v1  ;;  %v3100_v11 = vadd.f32 %v3099_v52, %v3013_v4  ;;  %v3161_v24 = vmax.f32 %v3149_v61, 0.0  ;;  %v3168_v8 = vmul.f32 %v3160_v55, %v6128_v7 }
 0x9ac   : > { %v3101_v44 = vpop.f32.mrf.mxu1  ;;  %v3154_v30 = vpop.f32.mrf.mxu0  ;;  %v7070_v46 = vpack.c.bf16 %v3167_v42, %v3165_v43 }
 0x9ad   : > { %v3102_v57 = vadd.f32 %v3101_v44, %v3013_v4  ;;  %v3153_v27 = vadd.f32 %v3152_v5, %v3100_v11  ;;  %v3162_v33 = vmax.f32 %v3151_v14, 0.0  ;;  %v3169_v28 = vmul.f32 %v3161_v24, %v6126_v16 }
 0x9ae   : > { %v7072_v6 = vpack.c.bf16 %v3168_v8, %v3166_v58 }
 0x9af   : > { %v3155_v34 = vadd.f32 %v3154_v30, %v3102_v57  ;;  %v3163_v39 = vmax.f32 %v3153_v27, 0.0  ;;  %v3170_v36 = vmul.f32 %v3162_v33, %v6128_v7 }
 0x9b1   : > { %v3164_v12 = vmax.f32 %v3155_v34, 0.0  ;;  %v3171_v37 = vmul.f32 %v3163_v39, %v6126_v16 }
 0x9b3   : > { %v3172_v40 = vmul.f32 %v3164_v12, %v6128_v7  ;;  %v7059_v4 = vpack.c.bf16 %v3171_v37, %v3169_v28 }
 0x9b5   : > { %v7062_v49 = vpack.c.bf16 %v3172_v40, %v3170_v36  ;;  %3211 = vrot.lane.b32.xlu0 %v7059_v4, %s7782_s23 }
 0x9b7   : > { %3293 = vrot.lane.b32.xlu1 %v7062_v49, %s7782_s23 }
 0x9b9   : > { %3209 = vrot.lane.b32.xlu0 %v7070_v46, %s7782_s23 }
 0x9bb   : > { %3291 = vrot.lane.b32.xlu1 %v7072_v6, %s7782_s23 }
 0x9bd   : > { %3201 = vrot.lane.b32.xlu0 %v7059_v4, %s7783_s25 }
 0x9bf   : > { %3283 = vrot.lane.b32.xlu1 %v7062_v49, %s7767_s9 }
 0x9c1   : > { %3199 = vrot.lane.b32.xlu0 %v7070_v46, %s7783_s25 }
 0x9c3   : > { %3281 = vrot.lane.b32.xlu1 %v7072_v6, %s7767_s9 }
 0x9c5   : > { %3191 = vrot.lane.b32.xlu0 %v7059_v4, %s7768_s30 }
 0x9c7   : > { %3273 = vrot.lane.b32.xlu1 %v7062_v49, %s7769_s5 }
 0x9c9   : > { %3189 = vrot.lane.b32.xlu0 %v7070_v46, %s7768_s30 }
 0x9cb   : > { %3271 = vrot.lane.b32.xlu1 %v7072_v6, %s7769_s5 }
 0x9cd   : > { %3181 = vrot.lane.b32.xlu0 %v7059_v4, %s7770_s6 }
 0x9cf   : > { %3263 = vrot.lane.b32.xlu1 %v7062_v49, %s7771_s8 }
 0x9d1   : > { %3179 = vrot.lane.b32.xlu0 %v7070_v46, %s7770_s6 }
 0x9d3   : > { %3261 = vrot.lane.b32.xlu1 %v7072_v6, %s7771_s8 }
 0x9d5   : > { %3323 = vrot.lane.b32.xlu0 %v7062_v49, %s7772_s4 }
 0x9d7   : > { %3241 = vrot.lane.b32.xlu1 %v7059_v4, %s7773_s27 }
 0x9d9   : > { %3321 = vrot.lane.b32.xlu0 %v7072_v6, %s7772_s4 }
 0x9db   : > { %3239 = vrot.lane.b32.xlu1 %v7070_v46, %s7773_s27 }
 0x9dd   : > { %3313 = vrot.lane.b32.xlu0 %v7062_v49, %s7774_s29 }
 0x9df   : > { %3231 = vrot.lane.b32.xlu1 %v7059_v4, %s7775_s28 }
 0x9e1   : > { %3311 = vrot.lane.b32.xlu0 %v7072_v6, %s7774_s29 }
 0x9e3   : > { %3229 = vrot.lane.b32.xlu1 %v7070_v46, %s7775_s28 }
 0x9e5   : > { %3303 = vrot.lane.b32.xlu0 %v7062_v49, %s7776_s1 }
 0x9e7   : > { %3221 = vrot.lane.b32.xlu1 %v7059_v4, %s7776_s1 }
 0x9e9   : > { %3301 = vrot.lane.b32.xlu0 %v7072_v6, %s7776_s1 }
 0x9eb   : > { %3219 = vrot.lane.b32.xlu1 %v7070_v46, %s7776_s1 }
 0x9ed   : > { %3333 = vrot.lane.b32.xlu0 %v7062_v49, %s7778_s10 }
 0x9ef   : > { %3251 = vrot.lane.b32.xlu1 %v7059_v4, %s7779_s17 }
 0x9f1   : > { %3331 = vrot.lane.b32.xlu0 %v7072_v6, %s7778_s10 }
 0x9f3   : > { %3249 = vrot.lane.b32.xlu1 %v7070_v46, %s7779_s17 }
 0x9f5   : > { %3370 = vperm.xlu0 %5361, %v3352_v13  }
 0x9f7   : > { %3365 = vperm.xlu1 %5362, %v3351_v50  }
 0x9f9   : > { %3360 = vperm.xlu0 %5361, %v3350_v56   ;;  %v5418_v56 = vld [vmem:[%s7622_s15 + $0x8] ss:$12 sps:$4 sm:$0xff]  }
 0x9fb   : > { %3355 = vperm.xlu1 %5362, %v3349_v2   ;;  %v5422_v2 = vld [vmem:[%s7622_s15 + $0x20] ss:$12 sps:$4 sm:$0xff]  }
 0xa27   : > { %v3212_v0 = vpop.permute.xlu0 %3211 }
 0xa29   : > { %v3294_v15 = vpop.permute.xlu1 %3293 }
 0xa2a   : > { %5126 = vmatprep.subr.msk.bf16.mxu0 %vm5928_vm1, %v3294_v15 }
 0xa2b   : > { %5128 = vmatpush1.bf16.msk.msra.mxu0 %vm5928_vm1, %v3212_v0  ;;  %v3210_v59 = vpop.permute.xlu0 %3209 }
 0xa2d   : > { %v3292_v54 = vpop.permute.xlu1 %3291 }
 0xa2e   : > { %5130 = vmatprep.subr.msk.bf16.mxu0 %vm5928_vm1, %v3292_v54 }
 0xa2f   : > { %5132 = vmatpush1.bf16.msk.msra.mxu0 %vm5928_vm1, %v3210_v59  ;;  %v3202_v1 = vpop.permute.xlu0 %3201 }
 0xa31   : > { %v3284_v3 = vpop.permute.xlu1 %3283 }
 0xa32   : > { %5134 = vmatprep.subr.msk.bf16.mxu0 %vm5949_vm3, %v3284_v3 }
 0xa33   : > { %5136 = vmatpush1.bf16.msk.msra.mxu0 %vm5963_vm5, %v3202_v1  ;;  %v3200_v61 = vpop.permute.xlu0 %3199 }
 0xa35   : > { %v3282_v52 = vpop.permute.xlu1 %3281 }
 0xa36   : > { %5138 = vmatprep.subr.msk.bf16.mxu0 %vm5949_vm3, %v3282_v52 }
 0xa37   : > { %5140 = vmatpush1.bf16.msk.msra.mxu0 %vm5963_vm5, %v3200_v61  ;;  %v3192_v5 = vpop.permute.xlu0 %3191 }
 0xa39   : > { %v3274_v62 = vpop.permute.xlu1 %3273 }
 0xa3a   : > { %5142 = vmatprep.subr.msk.bf16.mxu0 %vm5977_vm7, %v3274_v62 }
 0xa3b   : > { %5144 = vmatpush1.bf16.msk.msra.mxu0 %vm5991_vm9, %v3192_v5  ;;  %v3190_v14 = vpop.permute.xlu0 %3189 }
 0xa3d   : > { %v3272_v47 = vpop.permute.xlu1 %3271 }
 0xa3e   : > { %5146 = vmatprep.subr.msk.bf16.mxu0 %vm5977_vm7, %v3272_v47 }
 0xa3f   : > { %5148 = vmatpush1.bf16.msk.msra.mxu0 %vm5991_vm9, %v3190_v14  ;;  %v3182_v11 = vpop.permute.xlu0 %3181 }
 0xa41   : > { %v3264_v44 = vpop.permute.xlu1 %3263 }
 0xa42   : > { %5150 = vmatprep.subr.msk.bf16.mxu0 %vm6005_vm11, %v3264_v44 }
 0xa43   : > { %5152 = vmatpush1.bf16.msk.msra.mxu0 %vm6019_vm13, %v3182_v11  ;;  %v3180_v48 = vpop.permute.xlu0 %3179 }
 0xa45   : > { %v3262_v57 = vpop.permute.xlu1 %3261 }
 0xa46   : > { %5154 = vmatprep.subr.msk.bf16.mxu0 %vm6005_vm11, %v3262_v57 }
 0xa47   : > { %5156 = vmatpush1.bf16.msk.msra.mxu0 %vm6019_vm13, %v3180_v48  ;;  %v3324_v41 = vpop.permute.xlu0 %3323 }
 0xa48   : > { %5157 = vmatprep.subr.msk.bf16.mxu0 %vm1039_vm14, %v3324_v41 }
 0xa49   : > { %v3242_v24 = vpop.permute.xlu1 %3241 }
 0xa4a   : > { %v3247_v27 = vsel %vm951_vm15, %v3242_v24, 0 }
 0xa4b   : > { %3426 = vmatpush2.bf16.msra.mxu0 %v3247_v27  ;;  %v3322_v30 = vpop.permute.xlu0 %3321 }
 0xa4c   : > { %5158 = vmatprep.subr.msk.bf16.mxu0 %vm1039_vm14, %v3322_v30 }
 0xa4d   : > { %v3240_v31 = vpop.permute.xlu1 %3239 }
 0xa4e   : > { %v3244_v33 = vsel %vm951_vm15, %v3240_v31, 0 }
 0xa4f   : > { %3428 = vmatpush2.bf16.msra.mxu0 %v3244_v33  ;;  %v3314_v34 = vpop.permute.xlu0 %3313 }
 0xa50   : > { %5159 = vmatprep.subr.msk.bf16.mxu0 %vm1028_vm0, %v3314_v34 }
 0xa51   : > { %v3232_v51 = vpop.permute.xlu1 %3231 }
 0xa52   : > { %v3237_v39 = vsel %vm940_vm2, %v3232_v51, 0 }
 0xa53   : > { %3430 = vmatpush2.bf16.msra.mxu0 %v3237_v39  ;;  %v3312_v55 = vpop.permute.xlu0 %3311 }
 0xa54   : > { %5160 = vmatprep.subr.msk.bf16.mxu0 %vm1028_vm0, %v3312_v55 }
 0xa55   : > { %v3230_v12 = vpop.permute.xlu1 %3229 }
 0xa56   : > { %v3234_v10 = vsel %vm940_vm2, %v3230_v12, 0 }
 0xa57   : > { %3432 = vmatpush2.bf16.msra.mxu0 %v3234_v10  ;;  %v3304_v28 = vpop.permute.xlu0 %3303 }
 0xa58   : > { %5161 = vmatprep.subr.msk.bf16.mxu0 %vm929_vm4, %v3304_v28 }
 0xa59   : > { %v3222_v37 = vpop.permute.xlu1 %3221 }
 0xa5a   : > { %v3227_v45 = vsel %vm929_vm4, %v3222_v37, 0 }
 0xa5b   : > { %3434 = vmatpush2.bf16.msra.mxu0 %v3227_v45  ;;  %v3302_v36 = vpop.permute.xlu0 %3301 }
 0xa5c   : > { %5162 = vmatprep.subr.msk.bf16.mxu0 %vm929_vm4, %v3302_v36 }
 0xa5d   : > { %v3220_v40 = vpop.permute.xlu1 %3219 }
 0xa5e   : > { %v3224_v42 = vsel %vm929_vm4, %v3220_v40, 0 }
 0xa5f   : > { %3436 = vmatpush2.bf16.msra.mxu0 %v3224_v42  ;;  %v3334_v8 = vpop.permute.xlu0 %3333 }
 0xa60   : > { %3437 = vmatprep.subr.bf16.mxu0 %v7062_v49  ;;  %5163 = vmatprep.subr.msk.bf16.mxu1 %vm1050_vm8, %v3334_v8  ;;  %v5415_v49 = vld [vmem:[%s7622_s15] ss:$12 sps:$4 sm:$0xff]  }
 0xa61   : > { %v3252_v43 = vpop.permute.xlu1 %3251 }
 0xa62   : > { %v3257_v58 = vsel %vm962_vm6, %v3252_v43, 0 }
 0xa63   : > { %3438 = vmatpush2.bf16.msra.mxu0 %v7059_v4  ;;  %3475 = vmatpush1.bf16.msra.mxu1 %v3257_v58  ;;  %v3332_v53 = vpop.permute.xlu0 %3331  ;;  %v5419_v4 = vld [vmem:[%s7622_s15 + $0x1c] ss:$12 sps:$4 sm:$0xff]  }
 0xa64   : > { %3439 = vmatprep.subr.bf16.mxu0 %v7072_v6  ;;  %5164 = vmatprep.subr.msk.bf16.mxu1 %vm1050_vm8, %v3332_v53  ;;  %v5421_v6 = vld [vmem:[%s7622_s15 + $0x18] ss:$12 sps:$4 sm:$0xff]  }
 0xa65   : > { %v3250_v13 = vpop.permute.xlu1 %3249 }
 0xa66   : > { %v3254_v50 = vsel %vm962_vm6, %v3250_v13, 0 }
 0xa67   : > { %3440 = vmatpush2.bf16.msra.mxu0 %v7070_v46  ;;  %3477 = vmatpush1.bf16.msra.mxu1 %v3254_v50 }
 0xa6a   : > { %3442 = vmatmul.mubr.bf16.vlgmr.msra.gmra.mxu0 %v5415_v49  ;;  %5165 = vmatmul.mubr.msk.bf16.vlgmr.msra.gmra.mxu1 %vm1119_vm10, %v5418_v56 }
 0xa6b   : > { %3451 = vmatprep.mubr.bf16.mxu0 %v5419_v4  ;;  %3504 = vmatprep.mubr.bf16.mxu1 %v7781_v63 }
 0xa70   : > { %v3371_v54 = vpop.permute.xlu0 %3370 }
 0xa72   : > { %3452 = vmatmul.mubr.bf16.gmra.mxu0 %v5421_v6  ;;  %5166 = vmatmul.mubr.msk.bf16.gmra.mxu1 %vm1119_vm10, %v5422_v2  ;;  %v3366_v61 = vpop.permute.xlu1 %3365 }
 0xa73   : > { %3852 = vmatprep.mubr.bf16.mxu0 %v7781_v63 }
 0xa74   : > { %v3361_v47 = vpop.permute.xlu0 %3360 }
 0xa76   : > { %v3356_v41 = vpop.permute.xlu1 %3355 }
 0xb2a   : > { %v3443_v46 = vpop.f32.mrf.mxu0  ;;  %v3496_v0 = vpop.f32.mrf.mxu1 }
 0xb2b   : > { %v3444_v30 = vadd.f32 %v3443_v46, %v3356_v41 }
 0xb2c   : > { %v3445_v15 = vpop.f32.mrf.mxu0  ;;  %v3498_v59 = vpop.f32.mrf.mxu1 }
 0xb2d   : > { %v3446_v51 = vadd.f32 %v3445_v15, %v3356_v41  ;;  %v3497_v45 = vadd.f32 %v3496_v0, %v3444_v30 }
 0xb2e   : > { %v3447_v1 = vpop.f32.mrf.mxu0  ;;  %v3500_v3 = vpop.f32.mrf.mxu1 }
 0xb2f   : > { %v3448_v44 = vadd.f32 %v3447_v1, %v3361_v47  ;;  %v3499_v8 = vadd.f32 %v3498_v59, %v3446_v51  ;;  %v3515_v56 = vmax.f32 %v3497_v45, 0.0 }
 0xb30   : > { %v3449_v52 = vpop.f32.mrf.mxu0  ;;  %v3502_v5 = vpop.f32.mrf.mxu1 }
 0xb31   : > { %v3450_v24 = vadd.f32 %v3449_v52, %v3361_v47  ;;  %v3501_v55 = vadd.f32 %v3500_v3, %v3448_v44  ;;  %v3516_v2 = vmax.f32 %v3499_v8, 0.0  ;;  %v3523_v3 = vmul.f32 %v3515_v56, %v6126_v16  ;;  %v3709_v47 = vld [vmem:[%s7625_s18 + $0x10] sm:$0xff]  ;;  %v3707_v44 = vld [vmem:[%s7625_s18] sm:$0xff] }
 0xb32   : > { %v3453_v62 = vpop.f32.mrf.mxu0  ;;  %v3506_v14 = vpop.f32.mrf.mxu1 }
 0xb33   : > { %v3454_v11 = vadd.f32 %v3453_v62, %v3366_v61  ;;  %v3503_v28 = vadd.f32 %v3502_v5, %v3450_v24  ;;  %v3517_v53 = vmax.f32 %v3501_v55, 0.0  ;;  %v5425_v62 = vld [vmem:[#allocation4 + $0x4] ss:$12 sps:$4 sm:$0xff]  }
 0xb34   : > { %v3455_v48 = vpop.f32.mrf.mxu0  ;;  %v3508_v57 = vpop.f32.mrf.mxu1  ;;  %3799 = vmatprep.mubr.bf16.mxu1 %v5425_v62 }
 0xb35   : > { %v3456_v27 = vadd.f32 %v3455_v48, %v3366_v61  ;;  %v3507_v31 = vadd.f32 %v3506_v14, %v3454_v11  ;;  %v3518_v50 = vmax.f32 %v3503_v28, 0.0  ;;  %v3525_v15 = vmul.f32 %v3517_v53, %v6126_v16  ;;  %v3710_v14 = vld [vmem:[%s7625_s18 + $0x18] sm:$0xff]  ;;  %v3708_v11 = vld [vmem:[%s7625_s18 + $0x8] sm:$0xff] }
 0xb36   : > { %v3457_v33 = vpop.f32.mrf.mxu0  ;;  %v3510_v34 = vpop.f32.mrf.mxu1  ;;  %v3524_v61 = vmul.f32 %v3516_v2, %v6128_v7 }
 0xb37   : > { %v3509_v39 = vadd.f32 %v3508_v57, %v3456_v27  ;;  %v3458_v12 = vadd.f32 %v3457_v33, %v3371_v54  ;;  %v3519_v36 = vmax.f32 %v3507_v31, 0.0  ;;  %v3526_v59 = vmul.f32 %v3518_v50, %v6128_v7 }
 0xb38   : > { %v3459_v10 = vpop.f32.mrf.mxu0  ;;  %v3512_v42 = vpop.f32.mrf.mxu1  ;;  %v7236_v52 = vpack.c.bf16 %v3525_v15, %v3523_v3 }
 0xb39   : > { %v3460_v37 = vadd.f32 %v3459_v10, %v3371_v54  ;;  %v3511_v40 = vadd.f32 %v3510_v34, %v3458_v12  ;;  %v3520_v43 = vmax.f32 %v3509_v39, 0.0  ;;  %v3527_v4 = vmul.f32 %v3519_v36, %v6126_v16 }
 0xb3a   : > { %v7238_v5 = vpack.c.bf16 %v3526_v59, %v3524_v61 }
 0xb3b   : > { %v3513_v58 = vadd.f32 %v3512_v42, %v3460_v37  ;;  %v3521_v13 = vmax.f32 %v3511_v40, 0.0  ;;  %v3528_v46 = vmul.f32 %v3520_v43, %v6128_v7 }
 0xb3d   : > { %v3522_v49 = vmax.f32 %v3513_v58, 0.0  ;;  %v3529_v6 = vmul.f32 %v3521_v13, %v6126_v16 }
 0xb3f   : > { %v3530_v0 = vmul.f32 %v3522_v49, %v6128_v7  ;;  %v7225_v54 = vpack.c.bf16 %v3529_v6, %v3527_v4 }
 0xb41   : > { %v7228_v1 = vpack.c.bf16 %v3530_v0, %v3528_v46  ;;  %3569 = vrot.lane.b32.xlu0 %v7225_v54, %s7782_s23 }
 0xb43   : > { %3651 = vrot.lane.b32.xlu1 %v7228_v1, %s7782_s23 }
 0xb45   : > { %3567 = vrot.lane.b32.xlu0 %v7236_v52, %s7782_s23 }
 0xb47   : > { %3649 = vrot.lane.b32.xlu1 %v7238_v5, %s7782_s23 }
 0xb49   : > { %3559 = vrot.lane.b32.xlu0 %v7225_v54, %s7783_s25 }
 0xb4b   : > { %3641 = vrot.lane.b32.xlu1 %v7228_v1, %s7767_s9 }
 0xb4d   : > { %3557 = vrot.lane.b32.xlu0 %v7236_v52, %s7783_s25 }
 0xb4f   : > { %3639 = vrot.lane.b32.xlu1 %v7238_v5, %s7767_s9 }
 0xb51   : > { %3549 = vrot.lane.b32.xlu0 %v7225_v54, %s7768_s30 }
 0xb53   : > { %3631 = vrot.lane.b32.xlu1 %v7228_v1, %s7769_s5 }
 0xb55   : > { %3547 = vrot.lane.b32.xlu0 %v7236_v52, %s7768_s30 }
 0xb57   : > { %3629 = vrot.lane.b32.xlu1 %v7238_v5, %s7769_s5 }
 0xb59   : > { %3539 = vrot.lane.b32.xlu0 %v7225_v54, %s7770_s6 }
 0xb5b   : > { %3621 = vrot.lane.b32.xlu1 %v7228_v1, %s7771_s8 }
 0xb5d   : > { %3537 = vrot.lane.b32.xlu0 %v7236_v52, %s7770_s6 }
 0xb5f   : > { %3619 = vrot.lane.b32.xlu1 %v7238_v5, %s7771_s8 }
 0xb61   : > { %3681 = vrot.lane.b32.xlu0 %v7228_v1, %s7772_s4 }
 0xb63   : > { %3599 = vrot.lane.b32.xlu1 %v7225_v54, %s7773_s27 }
 0xb65   : > { %3679 = vrot.lane.b32.xlu0 %v7238_v5, %s7772_s4 }
 0xb67   : > { %3597 = vrot.lane.b32.xlu1 %v7236_v52, %s7773_s27 }
 0xb69   : > { %3671 = vrot.lane.b32.xlu0 %v7228_v1, %s7774_s29 }
 0xb6b   : > { %3589 = vrot.lane.b32.xlu1 %v7225_v54, %s7775_s28 }
 0xb6d   : > { %3669 = vrot.lane.b32.xlu0 %v7238_v5, %s7774_s29 }
 0xb6f   : > { %3587 = vrot.lane.b32.xlu1 %v7236_v52, %s7775_s28 }
 0xb71   : > { %3661 = vrot.lane.b32.xlu0 %v7228_v1, %s7776_s1 }
 0xb73   : > { %3579 = vrot.lane.b32.xlu1 %v7225_v54, %s7776_s1 }
 0xb75   : > { %3659 = vrot.lane.b32.xlu0 %v7238_v5, %s7776_s1 }
 0xb77   : > { %3577 = vrot.lane.b32.xlu1 %v7236_v52, %s7776_s1 }
 0xb79   : > { %3691 = vrot.lane.b32.xlu0 %v7228_v1, %s7778_s10 }
 0xb7b   : > { %3609 = vrot.lane.b32.xlu1 %v7225_v54, %s7779_s17 }
 0xb7d   : > { %3689 = vrot.lane.b32.xlu0 %v7238_v5, %s7778_s10 }
 0xb7f   : > { %3607 = vrot.lane.b32.xlu1 %v7236_v52, %s7779_s17 }
 0xb81   : > { %3728 = vperm.xlu0 %5361, %v3710_v14  }
 0xb83   : > { %3723 = vperm.xlu1 %5362, %v3709_v47  }
 0xb85   : > { %3718 = vperm.xlu0 %5361, %v3708_v11   ;;  %v5423_v11 = vld [vmem:[#allocation4] ss:$12 sps:$4 sm:$0xff]  }
 0xb87   : > { %3713 = vperm.xlu1 %5362, %v3707_v44   ;;  %v5426_v44 = vld [vmem:[#allocation4 + $0x8] ss:$12 sps:$4 sm:$0xff]  }
 0xbb3   : > { %v3570_v48 = vpop.permute.xlu0 %3569 }
 0xbb5   : > { %v3652_v57 = vpop.permute.xlu1 %3651 }
 0xbb6   : > { %5174 = vmatprep.subr.msk.bf16.mxu1 %vm5928_vm1, %v3652_v57 }
 0xbb7   : > { %5176 = vmatpush1.bf16.msk.msra.mxu1 %vm5928_vm1, %v3570_v48  ;;  %v3568_v41 = vpop.permute.xlu0 %3567  ;;  %v5430_v48 = vld [vmem:[#allocation4 + $0x20] ss:$12 sps:$4 sm:$0xff]  }
 0xbb9   : > { %v3650_v24 = vpop.permute.xlu1 %3649 }
 0xbba   : > { %5178 = vmatprep.subr.msk.bf16.mxu1 %vm5928_vm1, %v3650_v24 }
 0xbbb   : > { %5180 = vmatpush1.bf16.msk.msra.mxu1 %vm5928_vm1, %v3568_v41  ;;  %v3560_v27 = vpop.permute.xlu0 %3559 }
 0xbbd   : > { %v3642_v30 = vpop.permute.xlu1 %3641 }
 0xbbe   : > { %5182 = vmatprep.subr.msk.bf16.mxu1 %vm5949_vm3, %v3642_v30 }
 0xbbf   : > { %5184 = vmatpush1.bf16.msk.msra.mxu1 %vm5963_vm5, %v3560_v27  ;;  %v3558_v31 = vpop.permute.xlu0 %3557 }
 0xbc1   : > { %v3640_v33 = vpop.permute.xlu1 %3639 }
 0xbc2   : > { %5186 = vmatprep.subr.msk.bf16.mxu1 %vm5949_vm3, %v3640_v33 }
 0xbc3   : > { %5188 = vmatpush1.bf16.msk.msra.mxu1 %vm5963_vm5, %v3558_v31  ;;  %v3550_v34 = vpop.permute.xlu0 %3549 }
 0xbc5   : > { %v3632_v51 = vpop.permute.xlu1 %3631 }
 0xbc6   : > { %5190 = vmatprep.subr.msk.bf16.mxu1 %vm5977_vm7, %v3632_v51 }
 0xbc7   : > { %5192 = vmatpush1.bf16.msk.msra.mxu1 %vm5991_vm9, %v3550_v34  ;;  %v3548_v39 = vpop.permute.xlu0 %3547 }
 0xbc9   : > { %v3630_v55 = vpop.permute.xlu1 %3629 }
 0xbca   : > { %5194 = vmatprep.subr.msk.bf16.mxu1 %vm5977_vm7, %v3630_v55 }
 0xbcb   : > { %5196 = vmatpush1.bf16.msk.msra.mxu1 %vm5991_vm9, %v3548_v39  ;;  %v3540_v12 = vpop.permute.xlu0 %3539 }
 0xbcd   : > { %v3622_v10 = vpop.permute.xlu1 %3621 }
 0xbce   : > { %5198 = vmatprep.subr.msk.bf16.mxu1 %vm6005_vm11, %v3622_v10 }
 0xbcf   : > { %5200 = vmatpush1.bf16.msk.msra.mxu1 %vm6019_vm13, %v3540_v12  ;;  %v3538_v28 = vpop.permute.xlu0 %3537 }
 0xbd1   : > { %v3620_v37 = vpop.permute.xlu1 %3619 }
 0xbd2   : > { %5202 = vmatprep.subr.msk.bf16.mxu1 %vm6005_vm11, %v3620_v37 }
 0xbd3   : > { %5204 = vmatpush1.bf16.msk.msra.mxu1 %vm6019_vm13, %v3538_v28  ;;  %v3682_v45 = vpop.permute.xlu0 %3681 }
 0xbd4   : > { %5205 = vmatprep.subr.msk.bf16.mxu1 %vm1039_vm14, %v3682_v45 }
 0xbd5   : > { %v3600_v36 = vpop.permute.xlu1 %3599 }
 0xbd6   : > { %v3605_v40 = vsel %vm951_vm15, %v3600_v36, 0 }
 0xbd7   : > { %3784 = vmatpush2.bf16.msra.mxu1 %v3605_v40  ;;  %v3680_v42 = vpop.permute.xlu0 %3679 }
 0xbd8   : > { %5206 = vmatprep.subr.msk.bf16.mxu1 %vm1039_vm14, %v3680_v42 }
 0xbd9   : > { %v3598_v8 = vpop.permute.xlu1 %3597 }
 0xbda   : > { %v3602_v43 = vsel %vm951_vm15, %v3598_v8, 0 }
 0xbdb   : > { %3786 = vmatpush2.bf16.msra.mxu1 %v3602_v43  ;;  %v3672_v58 = vpop.permute.xlu0 %3671 }
 0xbdc   : > { %5207 = vmatprep.subr.msk.bf16.mxu1 %vm1028_vm0, %v3672_v58 }
 0xbdd   : > { %v3590_v53 = vpop.permute.xlu1 %3589 }
 0xbde   : > { %v3595_v13 = vsel %vm940_vm2, %v3590_v53, 0 }
 0xbdf   : > { %3788 = vmatpush2.bf16.msra.mxu1 %v3595_v13  ;;  %v3670_v50 = vpop.permute.xlu0 %3669 }
 0xbe0   : > { %5208 = vmatprep.subr.msk.bf16.mxu1 %vm1028_vm0, %v3670_v50 }
 0xbe1   : > { %v3588_v49 = vpop.permute.xlu1 %3587 }
 0xbe2   : > { %v3592_v56 = vsel %vm940_vm2, %v3588_v49, 0 }
 0xbe3   : > { %3790 = vmatpush2.bf16.msra.mxu1 %v3592_v56  ;;  %v3662_v4 = vpop.permute.xlu0 %3661 }
 0xbe4   : > { %5209 = vmatprep.subr.msk.bf16.mxu1 %vm929_vm4, %v3662_v4 }
 0xbe5   : > { %v3580_v6 = vpop.permute.xlu1 %3579 }
 0xbe6   : > { %v3585_v2 = vsel %vm929_vm4, %v3580_v6, 0 }
 0xbe7   : > { %3792 = vmatpush2.bf16.msra.mxu1 %v3585_v2  ;;  %v3660_v46 = vpop.permute.xlu0 %3659 }
 0xbe8   : > { %5210 = vmatprep.subr.msk.bf16.mxu1 %vm929_vm4, %v3660_v46 }
 0xbe9   : > { %v3578_v0 = vpop.permute.xlu1 %3577 }
 0xbea   : > { %v3582_v15 = vsel %vm929_vm4, %v3578_v0, 0 }
 0xbeb   : > { %3794 = vmatpush2.bf16.msra.mxu1 %v3582_v15  ;;  %v3692_v59 = vpop.permute.xlu0 %3691 }
 0xbec   : > { %3795 = vmatprep.subr.bf16.mxu1 %v7228_v1  ;;  %5211 = vmatprep.subr.msk.bf16.mxu0 %vm1050_vm8, %v3692_v59  ;;  %v5427_v1 = vld [vmem:[#allocation4 + $0x1c] ss:$12 sps:$4 sm:$0xff]  }
 0xbed   : > { %v3610_v3 = vpop.permute.xlu1 %3609 }
 0xbee   : > { %v3615_v61 = vsel %vm962_vm6, %v3610_v3, 0 }
 0xbef   : > { %3796 = vmatpush2.bf16.msra.mxu1 %v7225_v54  ;;  %3833 = vmatpush1.bf16.msra.mxu0 %v3615_v61  ;;  %v3690_v62 = vpop.permute.xlu0 %3689  ;;  %v5429_v54 = vld [vmem:[#allocation4 + $0x18] ss:$12 sps:$4 sm:$0xff]  }
 0xbf0   : > { %3797 = vmatprep.subr.bf16.mxu1 %v7238_v5  ;;  %5212 = vmatprep.subr.msk.bf16.mxu0 %vm1050_vm8, %v3690_v62 }
 0xbf1   : > { %v3608_v14 = vpop.permute.xlu1 %3607 }
 0xbf2   : > { %v3612_v47 = vsel %vm962_vm6, %v3608_v14, 0 }
 0xbf3   : > { %3798 = vmatpush2.bf16.msra.mxu1 %v7236_v52  ;;  %3835 = vmatpush1.bf16.msra.mxu0 %v3612_v47 }
 0xbf6   : > { %3800 = vmatmul.mubr.bf16.vlgmr.msra.gmra.mxu1 %v5423_v11  ;;  %5213 = vmatmul.mubr.msk.bf16.vlgmr.msra.gmra.mxu0 %vm1119_vm10, %v5426_v44 }
 0xbf7   : > { %3809 = vmatprep.mubr.bf16.mxu1 %v5427_v1  ;;  %3862 = vmatprep.mubr.bf16.mxu0 %v7781_v63 }
 0xbfc   : > { %v3729_v52 = vpop.permute.xlu0 %3728 }
 0xbfe   : > { %3810 = vmatmul.mubr.bf16.gmra.mxu1 %v5429_v54  ;;  %5214 = vmatmul.mubr.msk.bf16.gmra.mxu0 %vm1119_vm10, %v5430_v48  ;;  %v3724_v31 = vpop.permute.xlu1 %3723 }
 0xbff   : > { %4166 = vmatprep.mubr.bf16.mxu1 %v7781_v63 }
 0xc00   : > { %v3719_v55 = vpop.permute.xlu0 %3718 }
 0xc02   : > { %v3714_v45 = vpop.permute.xlu1 %3713 }
 0xcb6   : > { %v3801_v5 = vpop.f32.mrf.mxu1  ;;  %v3854_v57 = vpop.f32.mrf.mxu0 }
 0xcb7   : > { %v3802_v40 = vadd.f32 %v3801_v5, %v3714_v45 }
 0xcb8   : > { %v3803_v41 = vpop.f32.mrf.mxu1  ;;  %v3856_v24 = vpop.f32.mrf.mxu0 }
 0xcb9   : > { %v3804_v58 = vadd.f32 %v3803_v41, %v3714_v45  ;;  %v3855_v6 = vadd.f32 %v3854_v57, %v3802_v40 }
 0xcba   : > { %v3805_v27 = vpop.f32.mrf.mxu1  ;;  %v3858_v30 = vpop.f32.mrf.mxu0 }
 0xcbb   : > { %v3806_v10 = vadd.f32 %v3805_v27, %v3719_v55  ;;  %v3857_v15 = vadd.f32 %v3856_v24, %v3804_v58  ;;  %v3873_v11 = vmax.f32 %v3855_v6, 0.0 }
 0xcbc   : > { %v3807_v33 = vpop.f32.mrf.mxu1  ;;  %v3860_v34 = vpop.f32.mrf.mxu0 }
 0xcbd   : > { %v3808_v36 = vadd.f32 %v3807_v33, %v3719_v55  ;;  %v3859_v13 = vadd.f32 %v3858_v30, %v3806_v10  ;;  %v3874_v54 = vmax.f32 %v3857_v15, 0.0  ;;  %v3881_v27 = vmul.f32 %v3873_v11, %v6126_v16 }
 0xcbe   : > { %v3811_v51 = vpop.f32.mrf.mxu1  ;;  %v3864_v39 = vpop.f32.mrf.mxu0 }
 0xcbf   : > { %v3812_v12 = vadd.f32 %v3811_v51, %v3724_v31  ;;  %v3861_v56 = vadd.f32 %v3860_v34, %v3808_v36  ;;  %v3875_v61 = vmax.f32 %v3859_v13, 0.0  ;;  %v3882_v30 = vmul.f32 %v3874_v54, %v6128_v7  ;;  %v5433_v34 = vld [vmem:[#allocation6 + $0x4] ss:$12 sps:$4 sm:$0x3f]  }
 0xcc0   : > { %v3813_v28 = vpop.f32.mrf.mxu1  ;;  %v3866_v37 = vpop.f32.mrf.mxu0  ;;  %4123 = vmatprep.mubr.bf16.mxu0 %v5433_v34  ;;  %v5434_v34 = vld [vmem:[#allocation6 + $0x8] ss:$12 sps:$4 sm:$0x3f]  }
 0xcc1   : > { %v3814_v63 = vadd.f32 %v3813_v28, %v3724_v31  ;;  %v3865_v42 = vadd.f32 %v3864_v39, %v3812_v12  ;;  %v3876_v14 = vmax.f32 %v3861_v56, 0.0  ;;  %v3883_v57 = vmul.f32 %v3875_v61, %v6126_v16 }
 0xcc2   : > { %v3815_v8 = vpop.f32.mrf.mxu1  ;;  %v3868_v43 = vpop.f32.mrf.mxu0 }
 0xcc3   : > { %v3867_v53 = vadd.f32 %v3866_v37, %v3814_v63  ;;  %v3816_v50 = vadd.f32 %v3815_v8, %v3729_v52  ;;  %v3877_v2 = vmax.f32 %v3865_v42, 0.0  ;;  %v3884_v24 = vmul.f32 %v3876_v14, %v6128_v7 }
 0xcc4   : > { %v3817_v49 = vpop.f32.mrf.mxu1  ;;  %v3870_v0 = vpop.f32.mrf.mxu0  ;;  %v7384_v31 = vpack.c.bf16 %v3883_v57, %v3881_v27  ;;  %v5431_v27 = vld [vmem:[#allocation6] ss:$12 sps:$4 sm:$0x3f]  }
 0xcc5   : > { %v3818_v4 = vadd.f32 %v3817_v49, %v3729_v52  ;;  %v3869_v46 = vadd.f32 %v3868_v43, %v3816_v50  ;;  %v3878_v59 = vmax.f32 %v3867_v53, 0.0  ;;  %v3885_v44 = vmul.f32 %v3877_v2, %v6126_v16 }
 0xcc6   : > { %v7386_v33 = vpack.c.bf16 %v3884_v24, %v3882_v30  ;;  %v7522_v30 = vld [vmem:[#allocation7 + $0x18] sm:$0xf] }
 0xcc7   : > { %v3871_v3 = vadd.f32 %v3870_v0, %v3818_v4  ;;  %v3879_v62 = vmax.f32 %v3869_v46, 0.0  ;;  %v3886_v48 = vmul.f32 %v3878_v59, %v6128_v7 }
 0xcc9   : > { %v3880_v47 = vmax.f32 %v3871_v3, 0.0  ;;  %v3887_v1 = vmul.f32 %v3879_v62, %v6126_v16 }
 0xccb   : > { %v3888_v5 = vmul.f32 %v3880_v47, %v6128_v7  ;;  %v7373_v41 = vpack.c.bf16 %v3887_v1, %v3885_v44 }
 0xccd   : > { %v7376_v52 = vpack.c.bf16 %v3888_v5, %v3886_v48  ;;  %3927 = vrot.lane.b32.xlu0 %v7373_v41, %s7782_s23 }
 0xccf   : > { %4009 = vrot.lane.b32.xlu1 %v7376_v52, %s7782_s23 }
 0xcd1   : > { %3925 = vrot.lane.b32.xlu0 %v7384_v31, %s7782_s23 }
 0xcd3   : > { %4007 = vrot.lane.b32.xlu1 %v7386_v33, %s7782_s23  ;;  %s7808_s23 = sld [smem:[#allocation49_spill]] }
 0xcd5   : > { %3917 = vrot.lane.b32.xlu0 %v7373_v41, %s7783_s25 }
 0xcd7   : > { %3999 = vrot.lane.b32.xlu1 %v7376_v52, %s7767_s9 }
 0xcd9   : > { %3915 = vrot.lane.b32.xlu0 %v7384_v31, %s7783_s25  ;;  %v4225_v10 = vld [vmem:[%s7808_s23 + $0x8] sm:$0xf]  ;;  %v4224_v28 = vld [vmem:[%s7808_s23] sm:$0xff]  ;;  %v5270_v37 = vld [vmem:[%s7808_s23 + $0x18] sm:$0xf] }
 0xcda   : > { %v5269_v45 = vld [vmem:[%s7808_s23 + $0x10] sm:$0xff] }
 0xcdb   : > { %3997 = vrot.lane.b32.xlu1 %v7386_v33, %s7767_s9  ;;  %s7810_s9 = sld [smem:[#allocation50_spill]] }
 0xcdd   : > { %3907 = vrot.lane.b32.xlu0 %v7373_v41, %s7768_s30 }
 0xcdf   : > { %3989 = vrot.lane.b32.xlu1 %v7376_v52, %s7769_s5 }
 0xce1   : > { %3905 = vrot.lane.b32.xlu0 %v7384_v31, %s7768_s30  ;;  %s7806_s30 = sld [smem:[#allocation45_spill]] }
 0xce3   : > { %3987 = vrot.lane.b32.xlu1 %v7386_v33, %s7769_s5  ;;  %s858_s5 = scalar_lea.vmem %s7810_s9, %s5290_s19 }
 0xce5   : > { %3897 = vrot.lane.b32.xlu0 %v7373_v41, %s7770_s6 }
 0xce7   : > { %3979 = vrot.lane.b32.xlu1 %v7376_v52, %s7771_s8  ;;  %v4061_v51 = vld [vmem:[%s7806_s30] sm:$0xff]  ;;  %v4062_v39 = vld [vmem:[%s7806_s30 + $0x8] sm:$0xf] }
 0xce9   : > { %3895 = vrot.lane.b32.xlu0 %v7384_v31, %s7770_s6 }
 0xceb   : > { %3977 = vrot.lane.b32.xlu1 %v7386_v33, %s7771_s8  ;;  %s7811_s8 = sld [smem:[#allocation48_spill]] }
 0xced   : > { %4039 = vrot.lane.b32.xlu0 %v7376_v52, %s7772_s4 }
 0xcef   : > { %3957 = vrot.lane.b32.xlu1 %v7373_v41, %s7773_s27 }
 0xcf1   : > { %4037 = vrot.lane.b32.xlu0 %v7386_v33, %s7772_s4  ;;  %s7807_s4 = sld [smem:[#allocation42_spill]] }
 0xcf3   : > { %3955 = vrot.lane.b32.xlu1 %v7384_v31, %s7773_s27  ;;  %s7812_s27 = sld [smem:[#allocation51_spill]] }
 0xcf5   : > { %4029 = vrot.lane.b32.xlu0 %v7376_v52, %s7774_s29 }
 0xcf7   : > { %3947 = vrot.lane.b32.xlu1 %v7373_v41, %s7775_s28  ;;  %v2506_v55 = vld [vmem:[%s7807_s4 + $0x8] sm:$0xf]  ;;  %v2505_v12 = vld [vmem:[%s7807_s4] sm:$0xff] }
 0xcf9   : > { %4027 = vrot.lane.b32.xlu0 %v7386_v33, %s7774_s29  ;;  %s863_s29 = scalar_lea.vmem %s7812_s27, %s5290_s19 }
 0xcfb   : > { %3945 = vrot.lane.b32.xlu1 %v7384_v31, %s7775_s28 }
 0xcfd   : > { %4019 = vrot.lane.b32.xlu0 %v7376_v52, %s7776_s1 }
 0xcff   : > { %3937 = vrot.lane.b32.xlu1 %v7373_v41, %s7776_s1 }
 0xd01   : > { %4017 = vrot.lane.b32.xlu0 %v7386_v33, %s7776_s1 }
 0xd03   : > { %3935 = vrot.lane.b32.xlu1 %v7384_v31, %s7776_s1 }
 0xd05   : > { %4049 = vrot.lane.b32.xlu0 %v7376_v52, %s7778_s10 }
 0xd07   : > { %3967 = vrot.lane.b32.xlu1 %v7373_v41, %s7779_s17 }
 0xd09   : > { %4047 = vrot.lane.b32.xlu0 %v7386_v33, %s7778_s10 }
 0xd0b   : > { %3965 = vrot.lane.b32.xlu1 %v7384_v31, %s7779_s17 }
 0xd0d   : > { %4065 = vperm.xlu0 %5361, %v4061_v51   ;;  %v4210_v51 = vld [vmem:[#allocation7 + $0x8] sm:$0xff] }
 0xd0f   : > { %4070 = vperm.xlu1 %5362, %v4062_v39  }
 0xd11   : > { %2514 = vperm.xlu0 %5361, %v2506_v55  }
 0xd13   : > { %2509 = vperm.xlu1 %5362, %v2505_v12  }
 0xd15   : > { %4606 = vperm.xlu0 %5361, %v4225_v10  }
 0xd17   : > { %4601 = vperm.xlu1 %5362, %v4224_v28  }
 0xd19   : > { %4628 = vperm.xlu0 %5361, %v5270_v37  }
 0xd1b   : > { %4623 = vperm.xlu1 %5362, %v5269_v45  }
 0xd3f   : > { %v3928_v36 = vpop.permute.xlu0 %3927 }
 0xd41   : > { %v4010_v63 = vpop.permute.xlu1 %4009 }
 0xd42   : > { %5219 = vmatprep.subr.msk.bf16.mxu0 %vm5928_vm1, %v4010_v63 }
 0xd43   : > { %5221 = vmatpush1.bf16.msk.msra.mxu0 %vm5928_vm1, %v3928_v36  ;;  %v3926_v40 = vpop.permute.xlu0 %3925 }
 0xd45   : > { %v4008_v42 = vpop.permute.xlu1 %4007 }
 0xd46   : > { %5223 = vmatprep.subr.msk.bf16.mxu0 %vm5928_vm1, %v4008_v42 }
 0xd47   : > { %5225 = vmatpush1.bf16.msk.msra.mxu0 %vm5928_vm1, %v3926_v40  ;;  %v3918_v8 = vpop.permute.xlu0 %3917  ;;  %vm4236_vm1 = vcmask 1043456  }
 0xd49   : > { %v4000_v43 = vpop.permute.xlu1 %3999 }
 0xd4a   : > { %5227 = vmatprep.subr.msk.bf16.mxu0 %vm5949_vm3, %v4000_v43 }
 0xd4b   : > { %5229 = vmatpush1.bf16.msk.msra.mxu0 %vm5963_vm5, %v3918_v8  ;;  %v3916_v58 = vpop.permute.xlu0 %3915 }
 0xd4d   : > { %v3998_v53 = vpop.permute.xlu1 %3997 }
 0xd4e   : > { %5231 = vmatprep.subr.msk.bf16.mxu0 %vm5949_vm3, %v3998_v53  ;;  %vm4229_vm3 = vcmask 97280  }
 0xd4f   : > { %5233 = vmatpush1.bf16.msk.msra.mxu0 %vm5963_vm5, %v3916_v58  ;;  %v3908_v13 = vpop.permute.xlu0 %3907 }
 0xd51   : > { %v3990_v50 = vpop.permute.xlu1 %3989 }
 0xd52   : > { %5235 = vmatprep.subr.msk.bf16.mxu0 %vm5977_vm7, %v3990_v50 }
 0xd53   : > { %5237 = vmatpush1.bf16.msk.msra.mxu0 %vm5991_vm9, %v3908_v13  ;;  %v3906_v18 = vpop.permute.xlu0 %3905 }
 0xd55   : > { %v3988_v49 = vpop.permute.xlu1 %3987 }
 0xd56   : > { %5239 = vmatprep.subr.msk.bf16.mxu0 %vm5977_vm7, %v3988_v49 }
 0xd57   : > { %5241 = vmatpush1.bf16.msk.msra.mxu0 %vm5991_vm9, %v3906_v18  ;;  %v3898_v23 = vpop.permute.xlu0 %3897 }
 0xd59   : > { %v3980_v56 = vpop.permute.xlu1 %3979 }
 0xd5a   : > { %5243 = vmatprep.subr.msk.bf16.mxu0 %vm6005_vm11, %v3980_v56 }
 0xd5b   : > { %5245 = vmatpush1.bf16.msk.msra.mxu0 %vm6019_vm13, %v3898_v23  ;;  %v3896_v26 = vpop.permute.xlu0 %3895 }
 0xd5d   : > { %v3978_v4 = vpop.permute.xlu1 %3977 }
 0xd5e   : > { %5247 = vmatprep.subr.msk.bf16.mxu0 %vm6005_vm11, %v3978_v4  ;;  %v4209_v4 = vld [vmem:[#allocation7] sm:$0xff] }
 0xd5f   : > { %5249 = vmatpush1.bf16.msk.msra.mxu0 %vm6019_vm13, %v3896_v26  ;;  %v4040_v29 = vpop.permute.xlu0 %4039 }
 0xd60   : > { %5250 = vmatprep.subr.msk.bf16.mxu0 %vm1039_vm14, %v4040_v29  ;;  %v5606_v29 = vmov 0.0  }
 0xd61   : > { %v3958_v32 = vpop.permute.xlu1 %3957 }
 0xd62   : > { %v3963_v6 = vsel %vm951_vm15, %v3958_v32, 0  ;;  %v4213_v32 = vld [vmem:[%s7811_s8] sm:$0xff] }
 0xd63   : > { %4108 = vmatpush2.bf16.msra.mxu0 %v3963_v6  ;;  %v4038_v2 = vpop.permute.xlu0 %4037  ;;  %v4214_v6 = vld [vmem:[%s7811_s8 + $0x8] sm:$0xf] }
 0xd64   : > { %5251 = vmatprep.subr.msk.bf16.mxu0 %vm1039_vm14, %v4038_v2  ;;  %v5263_v2 = vld [vmem:[%s7811_s8 + $0x10] sm:$0xff] }
 0xd65   : > { %v3956_v46 = vpop.permute.xlu1 %3955 }
 0xd66   : > { %v3960_v0 = vsel %vm951_vm15, %v3956_v46, 0  ;;  %v5264_v46 = vld [vmem:[%s7811_s8 + $0x18] sm:$0xf] }
 0xd67   : > { %4110 = vmatpush2.bf16.msra.mxu0 %v3960_v0  ;;  %v4030_v15 = vpop.permute.xlu0 %4029 }
 0xd68   : > { %5252 = vmatprep.subr.msk.bf16.mxu0 %vm1028_vm0, %v4030_v15 }
 0xd69   : > { %v3948_v35 = vpop.permute.xlu1 %3947 }
 0xd6a   : > { %v3953_v38 = vsel %vm940_vm2, %v3948_v35, 0 }
 0xd6b   : > { %4112 = vmatpush2.bf16.msra.mxu0 %v3953_v38  ;;  %v4028_v59 = vpop.permute.xlu0 %4027 }
 0xd6c   : > { %5253 = vmatprep.subr.msk.bf16.mxu0 %vm1028_vm0, %v4028_v59 }
 0xd6d   : > { %v3946_v3 = vpop.permute.xlu1 %3945 }
 0xd6e   : > { %v3950_v61 = vsel %vm940_vm2, %v3946_v3, 0 }
 0xd6f   : > { %4114 = vmatpush2.bf16.msra.mxu0 %v3950_v61  ;;  %v4020_v62 = vpop.permute.xlu0 %4019 }
 0xd70   : > { %5254 = vmatprep.subr.msk.bf16.mxu0 %vm929_vm4, %v4020_v62 }
 0xd71   : > { %v3938_v14 = vpop.permute.xlu1 %3937 }
 0xd72   : > { %v3943_v47 = vsel %vm929_vm4, %v3938_v14, 0 }
 0xd73   : > { %4116 = vmatpush2.bf16.msra.mxu0 %v3943_v47  ;;  %v4018_v11 = vpop.permute.xlu0 %4017 }
 0xd74   : > { %5255 = vmatprep.subr.msk.bf16.mxu0 %vm929_vm4, %v4018_v11 }
 0xd75   : > { %v3936_v44 = vpop.permute.xlu1 %3935 }
 0xd76   : > { %v3940_v1 = vsel %vm929_vm4, %v3936_v44, 0 }
 0xd77   : > { %4118 = vmatpush2.bf16.msra.mxu0 %v3940_v1  ;;  %v4050_v54 = vpop.permute.xlu0 %4049 }
 0xd78   : > { %4119 = vmatprep.subr.bf16.mxu0 %v7376_v52  ;;  %5256 = vmatprep.subr.msk.bf16.mxu1 %vm1050_vm8, %v4050_v54 }
 0xd79   : > { %v3968_v48 = vpop.permute.xlu1 %3967 }
 0xd7a   : > { %v3973_v5 = vsel %vm962_vm6, %v3968_v48, 0 }
 0xd7b   : > { %4120 = vmatpush2.bf16.msra.mxu0 %v7373_v41  ;;  %4147 = vmatpush1.bf16.msra.mxu1 %v3973_v5  ;;  %v4048_v57 = vpop.permute.xlu0 %4047  ;;  %v4211_v41 = vld [vmem:[#allocation7 + $0x10] sm:$0xf] }
 0xd7c   : > { %4121 = vmatprep.subr.bf16.mxu0 %v7386_v33  ;;  %5257 = vmatprep.subr.msk.bf16.mxu1 %vm1050_vm8, %v4048_v57 }
 0xd7d   : > { %v3966_v24 = vpop.permute.xlu1 %3965 }
 0xd7e   : > { %v3970_v52 = vsel %vm962_vm6, %v3966_v24, 0 }
 0xd7f   : > { %4122 = vmatpush2.bf16.msra.mxu0 %v7384_v31  ;;  %4149 = vmatpush1.bf16.msra.mxu1 %v3970_v52  ;;  %v5265_v52 = vld [vmem:[%s7811_s8 + $0x20] sm:$0xff] }
 0xd80   : > { %5271 = vmatprep.subr.msk.mxu1 %vm4236_vm1, %v7522_v30 }
 0xd82   : > { %4124 = vmatmul.mubr.bf16.vlgmr.msra.gmra.mxu0 %v5431_v27  ;;  %5258 = vmatmul.mubr.msk.bf16.vlgmr.msra.gmra.mxu1 %vm1119_vm10, %v5434_v34  ;;  %v5267_v34 = vld [vmem:[%s7811_s8 + $0x30] sm:$0xff] }
 0xd83   : > { %5272 = vmatpush1.msk.msra.mxu1 %vm4236_vm1, %v4211_v41  ;;  %4307 = vmatprep.mubr.f32.mxu1 %v5606_v29 }
 0xd84   : > { %4273 = vmatprep.subr.mxu1 %v4210_v51  ;;  %4479 = vmatprep.mubr.f32.mxu0 %v5606_v29 }
 0xd85   : > { %4274 = vmatpush1.msra.mxu1 %v4209_v4 }
 0xd86   : > { %5275 = vmatprep.subr.msk.mxu1 %vm4236_vm1, %v7522_v30 }
 0xd88   : > { %v7530_v33 = vpop.permute.xlu0 %4065 }
 0xd8a   : > { %v7532_v39 = vpop.permute.xlu1 %4070  ;;  %5273 = vmatmul.mubr.msk.f32.vlgmr.msra.gmra.mxu1 %vm4229_vm3, %v4213_v32 }
 0xd8b   : > { %4313 = vmatprep.mubr.f32.mxu1 %v5606_v29  ;;  %5276 = vmatpush1.msk.msra.mxu1 %vm4236_vm1, %v4211_v41 }
 0xd8c   : > { %v2515_v55 = vpop.permute.xlu0 %2514  ;;  %4356 = vmatprep.subr.mxu1 %v4210_v51 }
 0xd8d   : > { %v2574_v12 = vadd.f32 %v6884_v22, %v2515_v55  ;;  %v2576_v31 = vadd.f32 %v6886_v25, %v2515_v55  ;;  %4357 = vmatpush1.msra.mxu1 %v4209_v4 }
 0xd8e   : > { %v2510_v10 = vpop.permute.xlu1 %2509  ;;  %5274 = vmatmul.mubr.msk.f32.gmra.mxu1 %vm4229_vm3, %v4214_v6 }
 0xd8f   : > { %v2570_v28 = vadd.f32 %v6878_v21, %v2510_v10  ;;  %v2572_v37 = vadd.f32 %v6882_v20, %v2510_v10  ;;  %v2617_v45 = vadd.f32 %v6876_v9, %v2574_v12  ;;  %v2619_v36 = vadd.f32 %v6880_v60, %v2576_v31  ;;  %4390 = vmatprep.mubr.f32.mxu1 %v5606_v29 }
 0xd91   : > { %v2613_v63 = vadd.f32 %v6872_v17, %v2570_v28  ;;  %v2615_v40 = vadd.f32 %v6874_v19, %v2572_v37  ;;  %v2623_v42 = vmul.f32 %v2617_v45, %v6126_v16  ;;  %v2624_v8 = vmul.f32 %v2619_v36, %v6128_v7 }
 0xd92   : > { %5277 = vmatmul.mubr.msk.f32.vlgmr.msra.gmra.mxu1 %vm4229_vm3, %v5263_v2 }
 0xd93   : > { %v2621_v22 = vmul.f32 %v2613_v63, %v6126_v16  ;;  %v2622_v25 = vmul.f32 %v2615_v40, %v6128_v7  ;;  %v5261_v43 = vmul.f32 -1.442695, %v2623_v42  ;;  %v5262_v21 = vmul.f32 -1.442695, %v2624_v8  ;;  %4396 = vmatprep.mubr.f32.mxu1 %v5606_v29 }
 0xd95   : > { %v5259_v58 = vmul.f32 -1.442695, %v2621_v22  ;;  %v5260_v20 = vmul.f32 -1.442695, %v2622_v25  ;;  %5435 = vpow2.f32 %v5261_v43 }
 0xd96   : > { %5437 = vpow2.f32 %v5262_v21  ;;  %5278 = vmatmul.mubr.msk.f32.gmra.mxu1 %vm4229_vm3, %v5264_v46 }
 0xd97   : > { %5439 = vpow2.f32 %v5259_v58  ;;  %4562 = vmatprep.mubr.f32.mxu1 %v5606_v29 }
 0xd98   : > { %5441 = vpow2.f32 %v5260_v20 }
 0xda2   : > { %v5436_v17 = vpop.eup %5435 }
 0xda3   : > { %v5438_v19 = vpop.eup %5437  ;;  %v4195_v9 = vadd.f32 1.0, %v5436_v17 }
 0xda4   : > { %v5440_v60 = vpop.eup %5439  ;;  %v4196_v53 = vadd.f32 1.0, %v5438_v19 }
 0xda5   : > { %v5442_v13 = vpop.eup %5441  ;;  %5443 = vrcp.f32 %v4195_v9  ;;  %v4193_v50 = vadd.f32 1.0, %v5440_v60 }
 0xda6   : > { %5445 = vrcp.f32 %v4196_v53  ;;  %v4194_v18 = vadd.f32 1.0, %v5442_v13 }
 0xda7   : > { %5447 = vrcp.f32 %v4193_v50  ;;  %v4602_v50 = vpop.permute.xlu1 %4601 }
 0xda8   : > { %5449 = vrcp.f32 %v4194_v18 }
 0xdb2   : > { %v5444_v49 = vpop.eup %5443 }
 0xdb3   : > { %v5446_v23 = vpop.eup %5445  ;;  %4207 = vst [vmem:[%s858_s5 + $0x10] sm:$0xf] %v5444_v49 }
 0xdb4   : > { %v5448_v56 = vpop.eup %5447  ;;  %4208 = vst [vmem:[%s858_s5 + $0x18] sm:$0xf] %v5446_v23 }
 0xdb5   : > { %v5450_v26 = vpop.eup %5449  ;;  %4205 = vst [vmem:[%s858_s5] sm:$0xff] %v5448_v56 }
 0xdb6   : > { %4206 = vst [vmem:[%s858_s5 + $0x8] sm:$0xff] %v5450_v26 }
 0xe42   : > { %v4125_v0 = vpop.f32.mrf.mxu0  ;;  %v4168_v15 = vpop.f32.mrf.mxu1 }
 0xe43   : > { %v4126_v14 = vadd.f32 %v4125_v0, %v7530_v33 }
 0xe44   : > { %v4127_v35 = vpop.f32.mrf.mxu0  ;;  %v4170_v38 = vpop.f32.mrf.mxu1 }
 0xe45   : > { %v4128_v61 = vadd.f32 %v4127_v35, %v7530_v33  ;;  %v4169_v5 = vadd.f32 %v4168_v15, %v4126_v14  ;;  %v4607_v15 = vpop.permute.xlu0 %4606 }
 0xe46   : > { %v4129_v59 = vpop.f32.mrf.mxu0  ;;  %v4172_v3 = vpop.f32.mrf.mxu1 }
 0xe47   : > { %v4130_v62 = vadd.f32 %v4129_v59, %v7532_v39  ;;  %v4171_v54 = vadd.f32 %v4170_v38, %v4128_v61  ;;  %v4177_v30 = vmul.f32 %v4169_v5, %v6126_v16 }
 0xe48   : > { %v4131_v47 = vpop.f32.mrf.mxu0  ;;  %v4174_v1 = vpop.f32.mrf.mxu1 }
 0xe49   : > { %v4132_v11 = vadd.f32 %v4131_v47, %v7532_v39  ;;  %v4173_v44 = vadd.f32 %v4172_v3, %v4130_v62  ;;  %v4178_v27 = vmul.f32 %v4171_v54, %v6128_v7  ;;  %v4624_v3 = vpop.permute.xlu1 %4623 }
 0xe4a   : > { %v4309_v41 = vpop.f32.mrf.mxu1 }
 0xe4b   : > { %v4175_v48 = vadd.f32 %v4174_v1, %v4132_v11  ;;  %v4179_v24 = vmul.f32 %v4173_v44, %v6126_v16  ;;  %v5266_v16 = vld [vmem:[%s7811_s8 + $0x28] sm:$0xf] }
 0xe4c   : > { %v4311_v51 = vpop.f32.mrf.mxu1 }
 0xe4d   : > { %v4180_v57 = vmul.f32 %v4175_v48, %v6128_v7  ;;  %v5268_v7 = vld [vmem:[%s7811_s8 + $0x38] sm:$0xf] }
 0xe4e   : > { %v4315_v33 = vpop.f32.mrf.mxu1 }
 0xe4f   : > { %5279 = vmatprep.subr.msk.mxu0 %vm4236_vm1, %v4180_v57  ;;  %5283 = vmatprep.subr.msk.mxu1 %vm4236_vm1, %v4180_v57  ;;  %v4629_v57 = vpop.permute.xlu0 %4628 }
 0xe50   : > { %5280 = vmatpush1.msk.msra.mxu0 %vm4236_vm1, %v4179_v24  ;;  %5284 = vmatpush1.msk.msra.mxu1 %vm4236_vm1, %v4179_v24  ;;  %v4317_v39 = vpop.f32.mrf.mxu1 }
 0xe51   : > { %4445 = vmatprep.subr.mxu0 %v4178_v27  ;;  %4528 = vmatprep.subr.mxu1 %v4178_v27 }
 0xe52   : > { %4446 = vmatpush1.msra.mxu0 %v4177_v30  ;;  %4529 = vmatpush1.msra.mxu1 %v4177_v30  ;;  %v4392_v55 = vpop.f32.mrf.mxu1 }
 0xe53   : > { %5281 = vmatmul.mubr.msk.f32.vlgmr.msra.gmra.mxu0 %vm4229_vm3, %v5265_v52  ;;  %5285 = vmatmul.mubr.msk.f32.vlgmr.msra.gmra.mxu1 %vm4229_vm3, %v5267_v34 }
 0xe54   : > { %4485 = vmatprep.mubr.f32.mxu0 %v5606_v29  ;;  %4568 = vmatprep.mubr.f32.mxu1 %v5606_v29  ;;  %v4394_v12 = vpop.f32.mrf.mxu1 }
 0xe56   : > { %v4398_v31 = vpop.f32.mrf.mxu1 }
 0xe57   : > { %5282 = vmatmul.mubr.msk.f32.gmra.mxu0 %vm4229_vm3, %v5266_v16  ;;  %5286 = vmatmul.mubr.msk.f32.gmra.mxu1 %vm4229_vm3, %v5268_v7 }
 0xe58   : > { %v4400_v10 = vpop.f32.mrf.mxu1 }
 0xf13   : > { %v4564_v28 = vpop.f32.mrf.mxu1  ;;  %v4481_v43 = vpop.f32.mrf.mxu0 }
 0xf14   : > { %v4583_v37 = vmin.f32 %v4564_v28, 4.1351666  ;;  %v4575_v19 = vmul.f32 %v4481_v43, %v4392_v55 }
 0xf15   : > { %v4566_v45 = vpop.f32.mrf.mxu1  ;;  %v4483_v20 = vpop.f32.mrf.mxu0 }
 0xf16   : > { %v4587_v36 = vmul.f32 1.442695, %v4583_v37  ;;  %v4584_v63 = vmin.f32 %v4566_v45, 4.1351666  ;;  %v4576_v53 = vmul.f32 %v4483_v20, %v4394_v12  ;;  %v4579_v49 = vadd.f32 %v4575_v19, %v4309_v41 }
 0xf17   : > { %v4570_v40 = vpop.f32.mrf.mxu1  ;;  %v4487_v17 = vpop.f32.mrf.mxu0 }
 0xf18   : > { %5451 = vpow2.f32 %v4587_v36  ;;  %v4589_v42 = vmul.f32 1.442695, %v4584_v63  ;;  %v4585_v8 = vmin.f32 %v4570_v40, 4.1351666  ;;  %v4577_v26 = vmul.f32 %v4487_v17, %v4398_v31 }
 0xf19   : > { %v4572_v22 = vpop.f32.mrf.mxu1  ;;  %v4489_v18 = vpop.f32.mrf.mxu0  ;;  %v4580_v32 = vadd.f32 %v4576_v53, %v4311_v51 }
 0xf1a   : > { %5453 = vpow2.f32 %v4589_v42  ;;  %v4586_v25 = vmin.f32 %v4572_v22, 4.1351666  ;;  %v4591_v21 = vmul.f32 1.442695, %v4585_v8  ;;  %v4578_v2 = vmul.f32 %v4489_v18, %v4400_v10 }
 0xf1b   : > { %v4581_v61 = vadd.f32 %v4577_v26, %v4315_v33 }
 0xf1c   : > { %v4593_v58 = vmul.f32 1.442695, %v4586_v25  ;;  %5455 = vpow2.f32 %v4591_v21  ;;  %v4582_v11 = vadd.f32 %v4578_v2, %v4317_v39 }
 0xf1e   : > { %5457 = vpow2.f32 %v4593_v58 }
 0xf25   : > { %v5452_v9 = vpop.eup %5451 }
 0xf26   : > { %v4595_v60 = vmul.f32 %v5452_v9, %v4392_v55 }
 0xf27   : > { %v5454_v13 = vpop.eup %5453 }
 0xf28   : > { %v4609_v23 = vmul.f32 %v4602_v50, %v4595_v60  ;;  %v4596_v56 = vmul.f32 %v5454_v13, %v4394_v12 }
 0xf29   : > { %v5456_v4 = vpop.eup %5455 }
 0xf2a   : > { %v4613_v29 = vadd.f32 %v4609_v23, %v4579_v49  ;;  %v4610_v6 = vmul.f32 %v4602_v50, %v4596_v56  ;;  %v4597_v0 = vmul.f32 %v5456_v4, %v4398_v31 }
 0xf2b   : > { %v5458_v46 = vpop.eup %5457 }
 0xf2c   : > { %v4617_v35 = vmax.f32 %v4613_v29, 0.0  ;;  %v4614_v38 = vadd.f32 %v4610_v6, %v4580_v32  ;;  %v4598_v59 = vmul.f32 %v5458_v46, %v4400_v10  ;;  %v4611_v62 = vmul.f32 %v4607_v15, %v4597_v0 }
 0xf2e   : > { %v4631_v14 = vmin.f32 %v4624_v3, %v4617_v35  ;;  %v4618_v47 = vmax.f32 %v4614_v38, 0.0  ;;  %v4612_v44 = vmul.f32 %v4607_v15, %v4598_v59  ;;  %v4615_v1 = vadd.f32 %v4611_v62, %v4581_v61 }
 0xf30   : > { %4635 = vst [vmem:[%s863_s29] sm:$0xff] %v4631_v14  ;;  %v4632_v54 = vmin.f32 %v4624_v3, %v4618_v47  ;;  %v4616_v48 = vadd.f32 %v4612_v44, %v4582_v11  ;;  %v4619_v5 = vmax.f32 %v4615_v1, 0.0 }
 0xf32   : > { %4636 = vst [vmem:[%s863_s29 + $0x8] sm:$0xff] %v4632_v54  ;;  %v4620_v24 = vmax.f32 %v4616_v48, 0.0  ;;  %v4633_v27 = vmin.f32 %v4629_v57, %v4619_v5 }
 0xf34   : > { %v4634_v30 = vmin.f32 %v4629_v57, %v4620_v24  ;;  %4637 = vst [vmem:[%s863_s29 + $0x10] sm:$0xf] %v4633_v27 }
 0xf36   : > { %4638 = vst [vmem:[%s863_s29 + $0x18] sm:$0xf] %v4634_v30 }
 0xf37 PF: > { %s7813_s26 = sld [smem:[#allocation12_spill]] }
 0xf3d   : > { %s40_s27 = sadd.s32 1, %s7813_s26  }
 0xf3e   : > { %p37_p2 = scmp.ge.s32.totalorder %s40_s27, 4  }
 0xf40   :  { %39 = sbr.rel (!%p37_p2) target bundleno = 24 (0x18), region = 183 }
 0xf45   :  { %4676 = vsyncpa [#allocation3], 1 }
 0xf46   :  { %4678 = vsyncpa [#allocation3 + $0x1], 1 }
 0xf47   :  { %4679 = vsyncpa [#allocation5], 1 }
 0xf48   :  { %4680 = vsyncpa [#allocation8], 1 }

</bundles_post_ra>
